<compile_context>
chip_gen: v5e
topology: v5e:2x2
jax: 0.10.0
libtpu: 0.0.40
codegen_flags: <defaults>
</compile_context>

<pallas_src>
import functools

import jax
import jax.numpy as jnp
from jax.experimental import pallas as pl
from jax.experimental.pallas import tpu as pltpu


def deepfm_kernel(flat_ref, lin_ref, w1sel_ref, b1_ref, w2_ref, b2_ref,
                  w3_ref, b3_ref, w4_ref, out_ref, *, hidden, emb_dim):
    flat = flat_ref[...]                                   # (TB, F*D)  val-scaled

    # fc1 and the FM field-sum share ONE MXU pass: RHS = [w1 | sel], (F*D, H+D).
    h_all = jnp.dot(flat, w1sel_ref[...], preferred_element_type=jnp.float32)
    sum_e = h_all[:, hidden:]                              # (TB, D) = sum_f e[b,f,d]

    # FM second-order term without the square_sum matmul:
    #   mean_d((sum_square - square_sum)/2) = 0.5/D * (sum_d sum_e^2 - sum_{f,d} e^2)
    flat_f32 = flat.astype(jnp.float32)                    # elementwise stays f32 (v5e VPU)
    fm = (0.5 / emb_dim) * (jnp.sum(sum_e * sum_e, axis=-1)
                            - jnp.sum(flat_f32 * flat_f32, axis=-1))   # (TB,)

    # DNN tower (f32 accumulation; activations cast to the weight dtype for the MXU).
    h = jnp.maximum(h_all[:, :hidden] + b1_ref[...], 0.0)
    h = jnp.dot(h.astype(w2_ref.dtype), w2_ref[...],
                preferred_element_type=jnp.float32) + b2_ref[...]
    h = jnp.maximum(h, 0.0)
    h = jnp.dot(h.astype(w3_ref.dtype), w3_ref[...],
                preferred_element_type=jnp.float32) + b3_ref[...]
    h = jnp.maximum(h, 0.0)
    # fc4 (out_dim=1) as a VPU multiply + lane reduce instead of an N=1 MXU pass.
    dnn = jnp.sum(h * w4_ref[...], axis=-1)                # (TB,)   w4_ref: (1, H)

    # lin already carries first-order term + global bias + fc4 bias.
    out_ref[...] = (fm + dnn)[None, :] + lin_ref[...]      # lane-dense (1, TB) store


def deepfm_forward(params, feature_ids, feature_vals, *, tile_b=512,
                   use_bf16=False):
    """params: dict of arrays; feature_ids: (B, F) int32; feature_vals: (B, F) f32."""
    B, F = feature_ids.shape
    D = params["emb"].shape[1]
    FD = F * D
    H = params["w1"].shape[1]

    mm_dtype = jnp.bfloat16 if use_bf16 else jnp.float32

    # Embedding gathers + val scaling + flatten are glue; XLA fuses them into the
    # HBM producer of the kernel's main (B, F*D) input stream.
    emb = jnp.take(params["emb"], feature_ids, axis=0)                  # (B, F, D)
    bemb = jnp.take(params["bias_emb"][:, 0], feature_ids, axis=0)      # (B, F)
    flat = (emb * feature_vals[:, :, None]).reshape(B, FD).astype(mm_dtype)

    # First-order term + global bias + fc4 bias folded into one lane-dense row.
    lin = jnp.sum(bemb * feature_vals, axis=1) + params["gbias"][0] + params["b4"][0, 0]

    # Pad the batch to a tile multiple (padded rows are garbage but sliced off).
    n_tiles = pl.cdiv(B, tile_b)
    b_pad = n_tiles * tile_b
    if b_pad != B:
        flat = jnp.pad(flat, ((0, b_pad - B), (0, 0)))
        lin = jnp.pad(lin, (0, b_pad - B))
    lin = lin[None, :]                                                  # (1, B_pad)

    # Fused fc1 / FM-field-sum RHS:  [w1 | sel]  with sel = tiled identity (0/1).
    sel = jnp.tile(jnp.eye(D, dtype=jnp.float32), (F, 1))               # (F*D, D)
    w1sel = jnp.concatenate([params["w1"], sel], axis=1).astype(mm_dtype)  # (FD, H+D)
    w2 = params["w2"].astype(mm_dtype)
    w3 = params["w3"].astype(mm_dtype)
    w4_row = params["w4"].T                                             # (1, H), f32

    kernel = functools.partial(deepfm_kernel, hidden=H, emb_dim=D)

    out = pl.pallas_call(
        kernel,
        out_shape=jax.ShapeDtypeStruct((1, b_pad), jnp.float32),
        grid=(n_tiles,),
        in_specs=[
            pl.BlockSpec((tile_b, FD), lambda i: (i, 0)),   # flat   (tiled over batch)
            pl.BlockSpec((1, tile_b), lambda i: (0, i)),    # lin    (tiled over batch)
            pl.BlockSpec((FD, H + D), lambda i: (0, 0)),    # [w1|sel] (VMEM-resident)
            pl.BlockSpec((1, H), lambda i: (0, 0)),         # b1
            pl.BlockSpec((H, H), lambda i: (0, 0)),         # w2
            pl.BlockSpec((1, H), lambda i: (0, 0)),         # b2
            pl.BlockSpec((H, H), lambda i: (0, 0)),         # w3
            pl.BlockSpec((1, H), lambda i: (0, 0)),         # b3
            pl.BlockSpec((1, H), lambda i: (0, 0)),         # w4 row
        ],
        out_specs=pl.BlockSpec((1, tile_b), lambda i: (0, i)),
        compiler_params=pltpu.CompilerParams(
            dimension_semantics=("parallel",),
            vmem_limit_bytes=32 * 1024 * 1024,
        ),
    )(flat, lin, w1sel,
      params["b1"], w2, params["b2"], w3, params["b3"], w4_row)

    return out[0, :B]                                                   # (B,)


def deepfm_reference(params, feature_ids, feature_vals):
    """Pure-JAX reference mirroring the PyTorch forward."""
    emb = jnp.take(params["emb"], feature_ids, axis=0)                  # (B, F, D)
    emb = emb * feature_vals[:, :, None]
    square_sum = jnp.sum(emb ** 2, axis=1)
    sum_square = jnp.sum(emb, axis=1) ** 2
    pred_fm = jnp.mean((sum_square - square_sum) / 2.0, axis=1)
    biases = jnp.take(params["bias_emb"][:, 0], feature_ids, axis=0) * feature_vals
    pred_fm = pred_fm + jnp.sum(biases, axis=1) + params["gbias"][0]
    flat = emb.reshape(emb.shape[0], -1)
    h = jax.nn.relu(flat @ params["w1"] + params["b1"])
    h = jax.nn.relu(h @ params["w2"] + params["b2"])
    h = jax.nn.relu(h @ params["w3"] + params["b3"])
    pred_dnn = (h @ params["w4"] + params["b4"])[:, 0]
    return pred_fm + pred_dnn


def init_params(key, num_features, embedding_dim, num_fields, hidden_size):
    ks = jax.random.split(key, 10)
    input_dim = embedding_dim * num_fields

    def xavier(k, shape):
        fan_in, fan_out = shape
        std = (2.0 / (fan_in + fan_out)) ** 0.5
        return std * jax.random.normal(k, shape, dtype=jnp.float32)

    def linear(kw, kb, in_dim, out_dim):
        bound = 1.0 / (in_dim ** 0.5)
        w = jax.random.uniform(kw, (in_dim, out_dim), jnp.float32, -bound, bound)
        b = jax.random.uniform(kb, (1, out_dim), jnp.float32, -bound, bound)
        return w, b

    w1, b1 = linear(ks[2], ks[3], input_dim, hidden_size)
    w2, b2 = linear(ks[4], ks[5], hidden_size, hidden_size)
    w3, b3 = linear(ks[6], ks[7], hidden_size, hidden_size)
    w4, b4 = linear(ks[8], ks[9], hidden_size, 1)

    return {
        "emb": xavier(ks[0], (num_features, embedding_dim)),
        "bias_emb": xavier(ks[1], (num_features, 1)),
        "w1": w1, "b1": b1,
        "w2": w2, "b2": b2,
        "w3": w3, "b3": b3,
        "w4": w4, "b4": b4,
        "gbias": jnp.zeros((1,), jnp.float32),   # nn.Parameter(torch.zeros(1))
    }


if __name__ == "__main__":
    # Small deterministic synthetic config.  F*D = 128 (lane-dense flat slab),
    # hidden = 128 (lane-dense activations).  Batch chosen so the 512-row tiles
    # give an even, >=2-step grid (both v7x TCs busy) and exercise the padding
    # path (1000 -> 1024).
    NUM_FEATURES = 1000
    EMBEDDING_DIM = 16
    NUM_FIELDS = 8
    HIDDEN_SIZE = 128
    BATCH = 1000
    TILE_B = 512

    key = jax.random.PRNGKey(0)
    kp, kid, kval = jax.random.split(key, 3)

    params = init_params(kp, NUM_FEATURES, EMBEDDING_DIM, NUM_FIELDS, HIDDEN_SIZE)
    feature_ids = jax.random.randint(kid, (BATCH, NUM_FIELDS), 0, NUM_FEATURES,
                                     dtype=jnp.int32)
    feature_vals = jax.random.uniform(kval, (BATCH, NUM_FIELDS), jnp.float32)

    fwd = jax.jit(functools.partial(deepfm_forward, params, tile_b=TILE_B,
                                    use_bf16=False))
    out = fwd(feature_ids, feature_vals)
    out = jax.block_until_ready(out)

    ref = deepfm_reference(params, feature_ids, feature_vals)
    assert out.shape == (BATCH,)
    assert jnp.allclose(out, ref, rtol=5e-4, atol=5e-4), (
        float(jnp.max(jnp.abs(out - ref))))

    print("KERNEL_OK")
</pallas_src>

<mosaic_0001>
module attributes {stable_mosaic.version = 11 : i64} {
  func.func @deepfm_kernel(%arg0: i32, %arg1: memref<512x128xf32, #tpu.memory_space<vmem>>, %arg2: memref<1x512xf32, #tpu.memory_space<vmem>>, %arg3: memref<128x144xf32, #tpu.memory_space<vmem>>, %arg4: memref<1x128xf32, #tpu.memory_space<vmem>>, %arg5: memref<128x128xf32, #tpu.memory_space<vmem>>, %arg6: memref<1x128xf32, #tpu.memory_space<vmem>>, %arg7: memref<128x128xf32, #tpu.memory_space<vmem>>, %arg8: memref<1x128xf32, #tpu.memory_space<vmem>>, %arg9: memref<1x128xf32, #tpu.memory_space<vmem>>, %arg10: memref<1x512xf32, #tpu.memory_space<vmem>>) attributes {dimension_semantics = [#tpu.dimension_semantics<parallel>], iteration_bounds = array<i64: 2>, scalar_prefetch = 0 : i64, scratch_operands = 0 : i64, tpu.core_type = #tpu.core_type<tc>, window_params = [{transform_indices = @transform_0, window_bounds = array<i64: 512, 128>}, {transform_indices = @transform_1, window_bounds = array<i64: 1, 512>}, {pipeline_mode = #tpu.pipeline_mode<synchronous>, transform_indices = @transform_2, window_bounds = array<i64: 128, 144>}, {pipeline_mode = #tpu.pipeline_mode<synchronous>, transform_indices = @transform_3, window_bounds = array<i64: 1, 128>}, {pipeline_mode = #tpu.pipeline_mode<synchronous>, transform_indices = @transform_4, window_bounds = array<i64: 128, 128>}, {pipeline_mode = #tpu.pipeline_mode<synchronous>, transform_indices = @transform_5, window_bounds = array<i64: 1, 128>}, {pipeline_mode = #tpu.pipeline_mode<synchronous>, transform_indices = @transform_6, window_bounds = array<i64: 128, 128>}, {pipeline_mode = #tpu.pipeline_mode<synchronous>, transform_indices = @transform_7, window_bounds = array<i64: 1, 128>}, {pipeline_mode = #tpu.pipeline_mode<synchronous>, transform_indices = @transform_8, window_bounds = array<i64: 1, 128>}, {transform_indices = @transform_9, window_bounds = array<i64: 1, 512>}]} {
    %c0 = arith.constant 0 : index
    %c0_0 = arith.constant 0 : index
    %0 = vector.load %arg1[%c0, %c0_0] : memref<512x128xf32, #tpu.memory_space<vmem>>, vector<512x128xf32>
    %c0_1 = arith.constant 0 : index
    %c0_2 = arith.constant 0 : index
    %1 = vector.load %arg3[%c0_1, %c0_2] : memref<128x144xf32, #tpu.memory_space<vmem>>, vector<128x144xf32>
    %cst = arith.constant dense<0.000000e+00> : vector<512x144xf32>
    %2 = tpu.matmul %0, %1, %cst {dimension_numbers = #tpu.dot_dimension_numbers<[1], [0], [0], [1], [0, 0, 1, 1], [], []>} : vector<512x128xf32>, vector<128x144xf32>, vector<512x144xf32> -> vector<512x144xf32>
    %3 = vector.extract_strided_slice %2 {offsets = [0, 128], sizes = [512, 16], strides = [1, 1]} : vector<512x144xf32> to vector<512x16xf32>
    %4 = arith.mulf %3, %3 : vector<512x16xf32>
    %cst_3 = arith.constant dense<0.000000e+00> : vector<512xf32>
    %5 = vector.multi_reduction <add>, %4, %cst_3 [1] : vector<512x16xf32> to vector<512xf32>
    %6 = arith.mulf %0, %0 : vector<512x128xf32>
    %cst_4 = arith.constant dense<0.000000e+00> : vector<512xf32>
    %7 = vector.multi_reduction <add>, %6, %cst_4 [1] : vector<512x128xf32> to vector<512xf32>
    %8 = arith.subf %5, %7 : vector<512xf32>
    %cst_5 = arith.constant 3.125000e-02 : f32
    %9 = vector.broadcast %cst_5 : f32 to vector<512xf32>
    %10 = arith.mulf %9, %8 : vector<512xf32>
    %11 = vector.extract_strided_slice %2 {offsets = [0, 0], sizes = [512, 128], strides = [1, 1]} : vector<512x144xf32> to vector<512x128xf32>
    %c0_6 = arith.constant 0 : index
    %c0_7 = arith.constant 0 : index
    %12 = vector.load %arg4[%c0_6, %c0_7] : memref<1x128xf32, #tpu.memory_space<vmem>>, vector<1x128xf32>
    %13 = vector.broadcast %12 : vector<1x128xf32> to vector<512x128xf32>
    %14 = arith.addf %11, %13 : vector<512x128xf32>
    %cst_8 = arith.constant 0.000000e+00 : f32
    %15 = vector.broadcast %cst_8 : f32 to vector<512x128xf32>
    %16 = arith.maximumf %14, %15 : vector<512x128xf32>
    %c0_9 = arith.constant 0 : index
    %c0_10 = arith.constant 0 : index
    %17 = vector.load %arg5[%c0_9, %c0_10] : memref<128x128xf32, #tpu.memory_space<vmem>>, vector<128x128xf32>
    %cst_11 = arith.constant dense<0.000000e+00> : vector<512x128xf32>
    %18 = tpu.matmul %16, %17, %cst_11 {dimension_numbers = #tpu.dot_dimension_numbers<[1], [0], [0], [1], [0, 0, 1, 1], [], []>} : vector<512x128xf32>, vector<128x128xf32>, vector<512x128xf32> -> vector<512x128xf32>
    %c0_12 = arith.constant 0 : index
    %c0_13 = arith.constant 0 : index
    %19 = vector.load %arg6[%c0_12, %c0_13] : memref<1x128xf32, #tpu.memory_space<vmem>>, vector<1x128xf32>
    %20 = vector.broadcast %19 : vector<1x128xf32> to vector<512x128xf32>
    %21 = arith.addf %18, %20 : vector<512x128xf32>
    %cst_14 = arith.constant 0.000000e+00 : f32
    %22 = vector.broadcast %cst_14 : f32 to vector<512x128xf32>
    %23 = arith.maximumf %21, %22 : vector<512x128xf32>
    %c0_15 = arith.constant 0 : index
    %c0_16 = arith.constant 0 : index
    %24 = vector.load %arg7[%c0_15, %c0_16] : memref<128x128xf32, #tpu.memory_space<vmem>>, vector<128x128xf32>
    %cst_17 = arith.constant dense<0.000000e+00> : vector<512x128xf32>
    %25 = tpu.matmul %23, %24, %cst_17 {dimension_numbers = #tpu.dot_dimension_numbers<[1], [0], [0], [1], [0, 0, 1, 1], [], []>} : vector<512x128xf32>, vector<128x128xf32>, vector<512x128xf32> -> vector<512x128xf32>
    %c0_18 = arith.constant 0 : index
    %c0_19 = arith.constant 0 : index
    %26 = vector.load %arg8[%c0_18, %c0_19] : memref<1x128xf32, #tpu.memory_space<vmem>>, vector<1x128xf32>
    %27 = vector.broadcast %26 : vector<1x128xf32> to vector<512x128xf32>
    %28 = arith.addf %25, %27 : vector<512x128xf32>
    %cst_20 = arith.constant 0.000000e+00 : f32
    %29 = vector.broadcast %cst_20 : f32 to vector<512x128xf32>
    %30 = arith.maximumf %28, %29 : vector<512x128xf32>
    %c0_21 = arith.constant 0 : index
    %c0_22 = arith.constant 0 : index
    %31 = vector.load %arg9[%c0_21, %c0_22] : memref<1x128xf32, #tpu.memory_space<vmem>>, vector<1x128xf32>
    %32 = vector.broadcast %31 : vector<1x128xf32> to vector<512x128xf32>
    %33 = arith.mulf %30, %32 : vector<512x128xf32>
    %cst_23 = arith.constant dense<0.000000e+00> : vector<512xf32>
    %34 = vector.multi_reduction <add>, %33, %cst_23 [1] : vector<512x128xf32> to vector<512xf32>
    %35 = arith.addf %10, %34 : vector<512xf32>
    %36 = vector.shape_cast %35 : vector<512xf32> to vector<1x512xf32>
    %c0_24 = arith.constant 0 : index
    %c0_25 = arith.constant 0 : index
    %37 = vector.load %arg2[%c0_24, %c0_25] : memref<1x512xf32, #tpu.memory_space<vmem>>, vector<1x512xf32>
    %38 = arith.addf %36, %37 : vector<1x512xf32>
    %c0_26 = arith.constant 0 : index
    %c0_27 = arith.constant 0 : index
    %39 = vector.load %arg10[%c0_26, %c0_27] : memref<1x512xf32, #tpu.memory_space<vmem>>, vector<1x512xf32>
    tpu.vector_store %arg10[%c0_26, %c0_27], %38 {strides = array<i32>} : memref<1x512xf32, #tpu.memory_space<vmem>>, vector<1x512xf32>,
    return
  }
  func.func @transform_0(%arg0: i32) -> (i32, i32) {
    %c0_i32 = arith.constant 0 : i32
    %c0_i32_0 = arith.constant 0 : i32
    return %arg0, %c0_i32 : i32, i32
  }
  func.func @transform_1(%arg0: i32) -> (i32, i32) {
    %c0_i32 = arith.constant 0 : i32
    %c0_i32_0 = arith.constant 0 : i32
    return %c0_i32, %arg0 : i32, i32
  }
  func.func @transform_2(%arg0: i32) -> (i32, i32) {
    %c0_i32 = arith.constant 0 : i32
    %c0_i32_0 = arith.constant 0 : i32
    %c0_i32_1 = arith.constant 0 : i32
    return %c0_i32, %c0_i32_0 : i32, i32
  }
  func.func @transform_3(%arg0: i32) -> (i32, i32) {
    %c0_i32 = arith.constant 0 : i32
    %c0_i32_0 = arith.constant 0 : i32
    %c0_i32_1 = arith.constant 0 : i32
    return %c0_i32, %c0_i32_0 : i32, i32
  }
  func.func @transform_4(%arg0: i32) -> (i32, i32) {
    %c0_i32 = arith.constant 0 : i32
    %c0_i32_0 = arith.constant 0 : i32
    %c0_i32_1 = arith.constant 0 : i32
    return %c0_i32, %c0_i32_0 : i32, i32
  }
  func.func @transform_5(%arg0: i32) -> (i32, i32) {
    %c0_i32 = arith.constant 0 : i32
    %c0_i32_0 = arith.constant 0 : i32
    %c0_i32_1 = arith.constant 0 : i32
    return %c0_i32, %c0_i32_0 : i32, i32
  }
  func.func @transform_6(%arg0: i32) -> (i32, i32) {
    %c0_i32 = arith.constant 0 : i32
    %c0_i32_0 = arith.constant 0 : i32
    %c0_i32_1 = arith.constant 0 : i32
    return %c0_i32, %c0_i32_0 : i32, i32
  }
  func.func @transform_7(%arg0: i32) -> (i32, i32) {
    %c0_i32 = arith.constant 0 : i32
    %c0_i32_0 = arith.constant 0 : i32
    %c0_i32_1 = arith.constant 0 : i32
    return %c0_i32, %c0_i32_0 : i32, i32
  }
  func.func @transform_8(%arg0: i32) -> (i32, i32) {
    %c0_i32 = arith.constant 0 : i32
    %c0_i32_0 = arith.constant 0 : i32
    %c0_i32_1 = arith.constant 0 : i32
    return %c0_i32, %c0_i32_0 : i32, i32
  }
  func.func @transform_9(%arg0: i32) -> (i32, i32) {
    %c0_i32 = arith.constant 0 : i32
    %c0_i32_0 = arith.constant 0 : i32
    return %c0_i32, %arg0 : i32, i32
  }
}

</mosaic_0001>

<bundles_post_ra>
// kernel: deepfm_forward.1
= control target key start
LH: loop header
LB: loop body
LE: loop exit
PB: predicated region body
PF: predicated region fallthrough
CT: control target
= control target key end

     0   :  { %14 = vsyncpa [#allocation3], 0  ;;  %s7242_s0 = inlined_call_operand.vmem [shape: f32[1024,128], index: 0, kind: input, shape index: {}]   ;;  %s7243_s1 = inlined_call_operand.vmem [shape: f32[1,1024], index: 1, kind: input, shape index: {}]   ;;  %s7244_s2 = inlined_call_operand.vmem [shape: f32[128,144], index: 2, kind: input, shape index: {}]   ;;  %s7245_s3 = inlined_call_operand.vmem [shape: f32[1,128], index: 3, kind: input, shape index: {}]   ;;  %s7246_s4 = inlined_call_operand.vmem [shape: f32[128,128], index: 4, kind: input, shape index: {}]   ;;  %s7247_s5 = inlined_call_operand.vmem [shape: f32[1,128], index: 5, kind: input, shape index: {}]   ;;  %s7248_s6 = inlined_call_operand.vmem [shape: f32[128,128], index: 6, kind: input, shape index: {}]   ;;  %s7249_s7 = inlined_call_operand.vmem [shape: f32[1,128], index: 7, kind: input, shape index: {}]   ;;  %s7250_s8 = inlined_call_operand.vmem [shape: f32[1,128], index: 8, kind: input, shape index: {}]   ;;  %s7251_s9 = inlined_call_operand.hbm [shape: f32[1,1024], index: 9, kind: output, shape index: {}]  }
   0x1   :  { %16 = vsyncpa [#allocation3 + $0x1], 0  ;;  %s4768_s30 = smov 0   ;;  %s4770_s10 = smov 0  }
   0x2   :  { %s4772_s11 = smov 0   ;;  %s4774_s12 = smov 0  }
   0x3 LB: > { %s4789_s13 = sadd.s32 4294967295, %s4715_s12   ;;  %s4482_s14 = sadd.s32 4294967294, %s4715_s12   ;;  %s4715_s12 = sphi %s4774_s12, %s7650_s12   ;;  %s4711_s11 = sphi %s4772_s11, %s7649_s11   ;;  %s4707_s10 = sphi %s4770_s10, %s7648_s10   ;;  %s4703_s30 = sphi %s4768_s30, %s7647_s30  }
   0x4   : > { %s4793_s15 = sadd.s32 1, %s4715_s12   ;;  %s228_s16 = sadd.s32 1, %s4711_s11 }
   0x5   : > { %s225_s17 = ssub.s32 %s4715_s12, %s4793_s15  ;;  %p238_p0 = scmp.ne.s32.totalorder %s4711_s11, %s4707_s10 }
   0x6   : > { %p226_p1 = scmp.eq.s32.totalorder %s225_s17, 0  ;;  %p239_p2 = scmp.eq.s32.totalorder %s4789_s13, 1 }
   0x7   : > { %p244_p3 = scmp.ne.s32.totalorder %s4707_s10, %s4703_s30  ;;  %p245_p4 = scmp.eq.s32.totalorder %s4482_s14, 1 }
   0x8   : > { %s4804_s18 = scalar_select %p226_p1, %s4711_s11, %s228_s16  }
   0x9   : > { %p4806_p5 = por %p239_p2, %p238_p0  ;;  %p4810_p6 = por %p245_p4, %p244_p3 }
   0xa   : > { %p4485_p7 = scmp.ge.s32.totalorder %s4715_s12, 1  ;;  %p301_p8 = scmp.lt.s32.totalorder %s4715_s12, 3 }
   0xc   : > { %p302_p9 = pnand %p4485_p7, %p301_p8 }
   0xe   : > { %305 = sbr.rel (%p302_p9) target bundleno = 2776 (0xad8), region = 56 }
  0x13   : > { %v448_v0 = vld [vmem:[%s7244_s2 + $0xf8] sm:$0xff]  ;;  %v446_v1 = vld [vmem:[%s7244_s2 + $0xe8] sm:$0xff]  ;;  %s4487_s25 = sshll.u32 %s4789_s13, 6  ;;  %vm931_vm0 = vcmask 130048   ;;  %s5180_s24 = sshll.u32 %s4789_s13, 2  ;;  %vm4232_vm1 = vcmask 130112  }
  0x14   : > { %658 = vmatpush.msra.mxu1 %v448_v0  ;;  %p342_p10 = scmp.lt.s32.totalorder %s4487_s25, 127  ;;  %v444_v2 = vld [vmem:[%s7244_s2 + $0xd8] sm:$0xff]  ;;  %v442_v3 = vld [vmem:[%s7244_s2 + $0xc8] sm:$0xff]  ;;  %p348_p11 = scmp.lt.s32.totalorder %s5180_s24, 7  ;;  %vm4236_vm2 = vcmask 195712   ;;  %vm4240_vm3 = vcmask 261312  }
  0x15   : > { %v440_v4 = vld [vmem:[%s7244_s2 + $0xb8] sm:$0xff]  ;;  %v438_v11 = vld [vmem:[%s7244_s2 + $0xa8] sm:$0xff]  ;;  %vm4244_vm4 = vcmask 326912   ;;  %vm4248_vm5 = vcmask 392512   ;;  %vm4252_vm6 = vcmask 458112   ;;  %vm4256_vm7 = vcmask 523712   ;;  %s4409_s29 = scalar_lea.hbm %s7251_s9, %s5180_s24 }
  0x16   : > { %659 = vmatpush.msra.mxu1 %v446_v1  ;;  %s7652_s25 = smov (!%p342_p10, %s4487_s25), 127  ;;  %v436_v12 = vld [vmem:[%s7244_s2 + $0x98] sm:$0xff]  ;;  %v434_v15 = vld [vmem:[%s7244_s2 + $0x88] sm:$0xff]  ;;  %vm4260_vm8 = vcmask 589312   ;;  %vm4264_vm9 = vcmask 654912   ;;  %vm4268_vm10 = vcmask 720512  }
  0x17   : > { %s4488_s14 = sshll.u32 %s7652_s25, 3  ;;  %v432_v17 = vld [vmem:[%s7244_s2 + $0x78] sm:$0xff]  ;;  %v430_v21 = vld [vmem:[%s7244_s2 + $0x68] sm:$0xff]  ;;  %vm4272_vm11 = vcmask 786112   ;;  %vm4276_vm12 = vcmask 851712   ;;  %vm4280_vm13 = vcmask 917312  }
  0x18   : > { %660 = vmatpush.msra.mxu1 %v444_v2  ;;  %s4835_s23 = scalar_lea.vmem %s7242_s0, %s4488_s14  ;;  %v428_v22 = vld [vmem:[%s7244_s2 + $0x58] sm:$0xff]  ;;  %v426_v25 = vld [vmem:[%s7244_s2 + $0x48] sm:$0xff]  ;;  %vm4284_vm14 = vcmask 982912   ;;  %vm4288_vm15 = vcmask 1048512   ;;  %s4413_s16 = sshll.u32 %s4409_s29, 4  ;;  %s4414_s16 = int_to_ptr.hbm [resolvable:$true] %s4413_s16 }
  0x19   : > { %v4838_v5 = vld [vmem:[%s4835_s23 + $0x10] sm:$0xff]  ;;  %v4841_v6 = vld [vmem:[%s4835_s23 + $0x8] sm:$0xff]  ;;  %v4844_v7 = vld [vmem:[%s4835_s23] sm:$0xff]  ;;  %s349_s25 = scalar_select %p348_p11, %s5180_s24, 7 }
  0x1a   : > { %661 = vmatpush.msra.mxu1 %v442_v3  ;;  %v1126_v8 = vmul.f32 %v4838_v5, %v4838_v5  ;;  %v1125_v9 = vmul.f32 %v4841_v6, %v4841_v6  ;;  %v1124_v10 = vmul.f32 %v4844_v7, %v4844_v7  ;;  %v4859_v13 = vld [vmem:[%s4835_s23 + $0x28] sm:$0xff]  ;;  %v4862_v14 = vld [vmem:[%s4835_s23 + $0x20] sm:$0xff]  ;;  %v4868_v16 = vld [vmem:[%s4835_s23 + $0x18] sm:$0xff] }
  0x1b   : > { %v1129_v18 = vmul.f32 %v4859_v13, %v4859_v13  ;;  %v1128_v19 = vmul.f32 %v4862_v14, %v4862_v14  ;;  %v1127_v20 = vmul.f32 %v4868_v16, %v4868_v16  ;;  %v4886_v23 = vld [vmem:[%s4835_s23 + $0x40] sm:$0xff]  ;;  %v4889_v24 = vld [vmem:[%s4835_s23 + $0x38] sm:$0xff]  ;;  %v4895_v26 = vld [vmem:[%s4835_s23 + $0x30] sm:$0xff]  ;;  %s5195_s27 = scalar_lea.vmem %s7243_s1, %s349_s25  ;;  %s338_s25 = sand.u32 1, %s4707_s10  }
  0x1c   : > { %662 = vmatpush.msra.mxu1 %v440_v4  ;;  %1192 = vadd.xlane.f32.xlu0 %v1126_v8  ;;  %v424_v27 = vld [vmem:[%s7244_s2 + $0x38] sm:$0xff]  ;;  %v1132_v28 = vmul.f32 %v4886_v23, %v4886_v23  ;;  %v1131_v29 = vmul.f32 %v4889_v24, %v4889_v24  ;;  %v1130_v30 = vmul.f32 %v4895_v26, %v4895_v26  ;;  %v422_v31 = vld [vmem:[%s7244_s2 + $0x28] sm:$0xff]  ;;  %v4916_v34 = vld [vmem:[%s4835_s23 + $0x50] sm:$0xff]  ;;  %s4486_s13 = sshll.u32 %s338_s25, 2  ;;  %s4399_s24 = scalar_lea.sflag [#allocation3], %s338_s25 }
  0x1d   : > { %1190 = vadd.xlane.f32.xlu2 %v1125_v9  ;;  %1188 = vadd.xlane.f32.xlu1 %v1124_v10  ;;  %v420_v32 = vld [vmem:[%s7244_s2 + $0x18] sm:$0xff]  ;;  %v418_v35 = vld [vmem:[%s7244_s2 + $0x8] sm:$0xff]  ;;  %v1134_v38 = vmul.f32 %v4916_v34, %v4916_v34  ;;  %v4932_v40 = vld [vmem:[%s4835_s23 + $0x70] sm:$0xff]  ;;  %s340_s14 = scalar_lea.vmem [#allocation2], %s4486_s13  ;;  %s4673_s13 = scalar_lea.hbm %s7251_s9, 8 }
  0x1e   : > { %663 = vmatpush.msra.mxu1 %v438_v11  ;;  %v4913_v33 = vld [vmem:[%s4835_s23 + $0x58] sm:$0xff]  ;;  %v4922_v36 = vld [vmem:[%s4835_s23 + $0x48] sm:$0xff]  ;;  %v4938_v42 = vld [vmem:[%s4835_s23 + $0x60] sm:$0xff]  ;;  %v1138_v43 = vmul.f32 %v4932_v40, %v4932_v40 }
  0x1f   : > { %v1135_v37 = vmul.f32 %v4913_v33, %v4913_v33  ;;  %v1133_v39 = vmul.f32 %v4922_v36, %v4922_v36  ;;  %v4935_v41 = vld [vmem:[%s4835_s23 + $0x68] sm:$0xff]  ;;  %v1136_v45 = vmul.f32 %v4938_v42, %v4938_v42  ;;  %v4951_v47 = vld [vmem:[%s4835_s23 + $0x80] sm:$0xff]  ;;  %v4954_v48 = vld [vmem:[%s4835_s23 + $0x78] sm:$0xff] }
  0x20   : > { %664 = vmatpush.msra.mxu1 %v436_v12  ;;  %v1137_v44 = vmul.f32 %v4935_v41, %v4935_v41  ;;  %v4948_v46 = vld [vmem:[%s4835_s23 + $0x88] sm:$0xff]  ;;  %v1140_v50 = vmul.f32 %v4951_v47, %v4951_v47  ;;  %v1139_v51 = vmul.f32 %v4954_v48, %v4954_v48  ;;  %v4964_v52 = vld [vmem:[%s4835_s23 + $0xa0] sm:$0xff]  ;;  %v4967_v53 = vld [vmem:[%s4835_s23 + $0x98] sm:$0xff] }
  0x21   : > { %v1141_v49 = vmul.f32 %v4948_v46, %v4948_v46  ;;  %v4970_v54 = vld [vmem:[%s4835_s23 + $0x90] sm:$0xff]  ;;  %v1144_v55 = vmul.f32 %v4964_v52, %v4964_v52  ;;  %v1143_v56 = vmul.f32 %v4967_v53, %v4967_v53  ;;  %v4980_v58 = vld [vmem:[%s4835_s23 + $0xb8] sm:$0xff]  ;;  %v4986_v60 = vld [vmem:[%s4835_s23 + $0xa8] sm:$0xff] }
  0x22   : > { %665 = vmatpush.msra.mxu1 %v434_v15  ;;  %v1142_v57 = vmul.f32 %v4970_v54, %v4970_v54  ;;  %v4983_v59 = vld [vmem:[%s4835_s23 + $0xb0] sm:$0xff]  ;;  %v1147_v61 = vmul.f32 %v4980_v58, %v4980_v58  ;;  %v1145_v63 = vmul.f32 %v4986_v60, %v4986_v60  ;;  %v4999_v1 = vld [vmem:[%s4835_s23 + $0xc8] sm:$0xff]  ;;  %v5002_v2 = vld [vmem:[%s4835_s23 + $0xc0] sm:$0xff] }
  0x23   : > { %v1146_v62 = vmul.f32 %v4983_v59, %v4983_v59  ;;  %v4996_v0 = vld [vmem:[%s4835_s23 + $0xd0] sm:$0xff]  ;;  %v1149_v4 = vmul.f32 %v4999_v1, %v4999_v1  ;;  %v1148_v8 = vmul.f32 %v5002_v2, %v5002_v2  ;;  %v5012_v9 = vld [vmem:[%s4835_s23 + $0xe8] sm:$0xff]  ;;  %v5015_v10 = vld [vmem:[%s4835_s23 + $0xe0] sm:$0xff] }
  0x24   : > { %666 = vmatpush.msra.mxu1 %v432_v17  ;;  %1198 = vadd.xlane.f32.xlu0 %v1129_v18  ;;  %v1150_v3 = vmul.f32 %v4996_v0, %v4996_v0  ;;  %v5018_v11 = vld [vmem:[%s4835_s23 + $0xd8] sm:$0xff]  ;;  %v1153_v12 = vmul.f32 %v5012_v9, %v5012_v9  ;;  %v1152_v15 = vmul.f32 %v5015_v10, %v5015_v10  ;;  %v5028_v18 = vld [vmem:[%s4835_s23 + $0x100] sm:$0xff] }
  0x25   : > { %1196 = vadd.xlane.f32.xlu2 %v1128_v19  ;;  %1194 = vadd.xlane.f32.xlu1 %v1127_v20  ;;  %7284 = vst [vmem:[#allocation5_spill] sm:$0xff] %v5018_v11  ;;  %v1151_v17 = vmul.f32 %v5018_v11, %v5018_v11  ;;  %v5031_v19 = vld [vmem:[%s4835_s23 + $0xf8] sm:$0xff]  ;;  %v5034_v20 = vld [vmem:[%s4835_s23 + $0xf0] sm:$0xff] }
  0x26   : > { %667 = vmatpush.msra.mxu1 %v430_v21  ;;  %v1156_v21 = vmul.f32 %v5028_v18, %v5028_v18 }
  0x28   : > { %668 = vmatpush.msra.mxu1 %v428_v22  ;;  %v1155_v22 = vmul.f32 %v5031_v19, %v5031_v19 }
  0x2a   : > { %669 = vmatpush.msra.mxu1 %v426_v25  ;;  %v1154_v25 = vmul.f32 %v5034_v20, %v5034_v20 }
  0x2c   : > { %670 = vmatpush.msra.mxu1 %v424_v27  ;;  %1204 = vadd.xlane.f32.xlu0 %v1132_v28  ;;  %v5044_v27 = vld [vmem:[%s4835_s23 + $0x118] sm:$0xff]  ;;  %v5047_v28 = vld [vmem:[%s4835_s23 + $0x110] sm:$0xff] }
  0x2d   : > { %1202 = vadd.xlane.f32.xlu2 %v1131_v29  ;;  %1200 = vadd.xlane.f32.xlu1 %v1130_v30  ;;  %7285 = vst [vmem:[#allocation6_spill] sm:$0xff] %v5044_v27  ;;  %v5050_v29 = vld [vmem:[%s4835_s23 + $0x108] sm:$0xff]  ;;  %v1159_v30 = vmul.f32 %v5044_v27, %v5044_v27 }
  0x2e   : > { %671 = vmatpush.msra.mxu1 %v422_v31  ;;  %7286 = vst [vmem:[#allocation7_spill] sm:$0xff] %v5047_v28  ;;  %v1158_v31 = vmul.f32 %v5047_v28, %v5047_v28 }
  0x2f   : > { %7287 = vst [vmem:[#allocation8_spill] sm:$0xff] %v5050_v29 }
  0x30   : > { %672 = vmatpush.msra.mxu1 %v420_v32  ;;  %v1157_v32 = vmul.f32 %v5050_v29, %v5050_v29 }
  0x32   : > { %673 = vmatpush.msra.mxu1 %v418_v35  ;;  %v5060_v35 = vld [vmem:[%s4835_s23 + $0x130] sm:$0xff] }
  0x33   : > { %674 = vmatmul.f32.vlgmr.msra.gmra.mxu1 %v4844_v7 }
  0x34   : > { %1210 = vadd.xlane.f32.xlu0 %v1135_v37  ;;  %v5063_v37 = vld [vmem:[%s4835_s23 + $0x128] sm:$0xff] }
  0x35   : > { %1208 = vadd.xlane.f32.xlu2 %v1134_v38  ;;  %1206 = vadd.xlane.f32.xlu1 %v1133_v39  ;;  %v5066_v38 = vld [vmem:[%s4835_s23 + $0x120] sm:$0xff]  ;;  %v1162_v39 = vmul.f32 %v5060_v35, %v5060_v35 }
  0x3b   : > { %677 = vmatmul.f32.gmra.mxu1 %v4841_v6 }
  0x3c   : > { %1216 = vadd.xlane.f32.xlu0 %v1138_v43  ;;  %v1161_v43 = vmul.f32 %v5063_v37, %v5063_v37 }
  0x3d   : > { %1214 = vadd.xlane.f32.xlu2 %v1137_v44  ;;  %1212 = vadd.xlane.f32.xlu1 %v1136_v45  ;;  %v1160_v44 = vmul.f32 %v5066_v38, %v5066_v38  ;;  %v5076_v45 = vld [vmem:[%s4835_s23 + $0x148] sm:$0xff] }
  0x43   : > { %680 = vmatmul.f32.gmra.mxu1 %v4838_v5 }
  0x44   : > { %1222 = vadd.xlane.f32.xlu0 %v1141_v49  ;;  %v5079_v49 = vld [vmem:[%s4835_s23 + $0x140] sm:$0xff] }
  0x45   : > { %1220 = vadd.xlane.f32.xlu2 %v1140_v50  ;;  %1218 = vadd.xlane.f32.xlu1 %v1139_v51  ;;  %v5082_v50 = vld [vmem:[%s4835_s23 + $0x138] sm:$0xff]  ;;  %v1165_v51 = vmul.f32 %v5076_v45, %v5076_v45 }
  0x4b   : > { %683 = vmatmul.f32.gmra.mxu1 %v4868_v16 }
  0x4c   : > { %1228 = vadd.xlane.f32.xlu0 %v1144_v55  ;;  %v1164_v55 = vmul.f32 %v5079_v49, %v5079_v49 }
  0x4d   : > { %1226 = vadd.xlane.f32.xlu2 %v1143_v56  ;;  %1224 = vadd.xlane.f32.xlu1 %v1142_v57  ;;  %v1163_v56 = vmul.f32 %v5082_v50, %v5082_v50  ;;  %v5092_v57 = vld [vmem:[%s4835_s23 + $0x160] sm:$0xff] }
  0x53   : > { %686 = vmatmul.f32.gmra.mxu1 %v4862_v14 }
  0x54   : > { %1234 = vadd.xlane.f32.xlu0 %v1147_v61  ;;  %v5095_v61 = vld [vmem:[%s4835_s23 + $0x158] sm:$0xff] }
  0x55   : > { %1232 = vadd.xlane.f32.xlu2 %v1146_v62  ;;  %1230 = vadd.xlane.f32.xlu1 %v1145_v63  ;;  %v5098_v62 = vld [vmem:[%s4835_s23 + $0x150] sm:$0xff]  ;;  %v1168_v63 = vmul.f32 %v5092_v57, %v5092_v57 }
  0x5b   : > { %689 = vmatmul.f32.gmra.mxu1 %v4859_v13 }
  0x5c   : > { %1240 = vadd.xlane.f32.xlu0 %v1150_v3  ;;  %v1167_v3 = vmul.f32 %v5095_v61, %v5095_v61 }
  0x5d   : > { %1238 = vadd.xlane.f32.xlu2 %v1149_v4  ;;  %1236 = vadd.xlane.f32.xlu1 %v1148_v8  ;;  %v1166_v4 = vmul.f32 %v5098_v62, %v5098_v62  ;;  %v5108_v8 = vld [vmem:[%s4835_s23 + $0x178] sm:$0xff] }
  0x63   : > { %692 = vmatmul.f32.gmra.mxu1 %v4895_v26 }
  0x64   : > { %1246 = vadd.xlane.f32.xlu0 %v1153_v12  ;;  %v5111_v12 = vld [vmem:[%s4835_s23 + $0x170] sm:$0xff] }
  0x65   : > { %1244 = vadd.xlane.f32.xlu2 %v1152_v15  ;;  %1242 = vadd.xlane.f32.xlu1 %v1151_v17  ;;  %v5114_v15 = vld [vmem:[%s4835_s23 + $0x168] sm:$0xff]  ;;  %v1171_v17 = vmul.f32 %v5108_v8, %v5108_v8 }
  0x6b   : > { %695 = vmatmul.f32.gmra.mxu1 %v4889_v24 }
  0x6c   : > { %1252 = vadd.xlane.f32.xlu0 %v1156_v21  ;;  %v1170_v21 = vmul.f32 %v5111_v12, %v5111_v12 }
  0x6d   : > { %1250 = vadd.xlane.f32.xlu2 %v1155_v22  ;;  %1248 = vadd.xlane.f32.xlu1 %v1154_v25  ;;  %v1169_v22 = vmul.f32 %v5114_v15, %v5114_v15  ;;  %v5124_v25 = vld [vmem:[%s4835_s23 + $0x190] sm:$0xff] }
  0x6e   : > { %7288 = vst [vmem:[#allocation9_spill] sm:$0xff] %v5124_v25 }
  0x73   : > { %698 = vmatmul.f32.gmra.mxu1 %v4886_v23 }
  0x74   : > { %1258 = vadd.xlane.f32.xlu0 %v1159_v30  ;;  %v5127_v30 = vld [vmem:[%s4835_s23 + $0x188] sm:$0xff] }
  0x75   : > { %1256 = vadd.xlane.f32.xlu2 %v1158_v31  ;;  %1254 = vadd.xlane.f32.xlu1 %v1157_v32  ;;  %7289 = vst [vmem:[#allocation10_spill] sm:$0xff] %v5127_v30  ;;  %v5130_v31 = vld [vmem:[%s4835_s23 + $0x180] sm:$0xff]  ;;  %v1174_v32 = vmul.f32 %v5124_v25, %v5124_v25 }
  0x76   : > { %7290 = vst [vmem:[#allocation11_spill] sm:$0xff] %v5130_v31 }
  0x7b   : > { %701 = vmatmul.f32.gmra.mxu1 %v4922_v36 }
  0x7c   : > { %1264 = vadd.xlane.f32.xlu0 %v1162_v39  ;;  %v1173_v39 = vmul.f32 %v5127_v30, %v5127_v30 }
  0x7d   : > { %1262 = vadd.xlane.f32.xlu2 %v1161_v43  ;;  %1260 = vadd.xlane.f32.xlu1 %v1160_v44  ;;  %v1172_v43 = vmul.f32 %v5130_v31, %v5130_v31  ;;  %v5140_v44 = vld [vmem:[%s4835_s23 + $0x1a8] sm:$0xff] }
  0x7e   : > { %7291 = vst [vmem:[#allocation12_spill] sm:$0xff] %v5140_v44 }
  0x83   : > { %704 = vmatmul.f32.gmra.mxu1 %v4916_v34 }
  0x84   : > { %1270 = vadd.xlane.f32.xlu0 %v1165_v51  ;;  %v5143_v51 = vld [vmem:[%s4835_s23 + $0x1a0] sm:$0xff] }
  0x85   : > { %1268 = vadd.xlane.f32.xlu2 %v1164_v55  ;;  %1266 = vadd.xlane.f32.xlu1 %v1163_v56  ;;  %7292 = vst [vmem:[#allocation13_spill] sm:$0xff] %v5143_v51  ;;  %v5146_v55 = vld [vmem:[%s4835_s23 + $0x198] sm:$0xff]  ;;  %v1177_v56 = vmul.f32 %v5140_v44, %v5140_v44 }
  0x86   : > { %7293 = vst [vmem:[#allocation14_spill] sm:$0xff] %v5146_v55 }
  0x8b   : > { %707 = vmatmul.f32.gmra.mxu1 %v4913_v33 }
  0x8c   : > { %1276 = vadd.xlane.f32.xlu0 %v1168_v63  ;;  %v1176_v63 = vmul.f32 %v5143_v51, %v5143_v51 }
  0x8d   : > { %1274 = vadd.xlane.f32.xlu2 %v1167_v3  ;;  %1272 = vadd.xlane.f32.xlu1 %v1166_v4  ;;  %v1175_v3 = vmul.f32 %v5146_v55, %v5146_v55  ;;  %v409_v4 = vld [vmem:[%s4835_s23 + $0x1c0] sm:$0xff] }
  0x93   : > { %710 = vmatmul.f32.gmra.mxu1 %v4938_v42 }
  0x94   : > { %1282 = vadd.xlane.f32.xlu0 %v1171_v17  ;;  %v408_v17 = vld [vmem:[%s4835_s23 + $0x1b8] sm:$0xff] }
  0x95   : > { %1280 = vadd.xlane.f32.xlu2 %v1170_v21  ;;  %1278 = vadd.xlane.f32.xlu1 %v1169_v22  ;;  %v5158_v21 = vld [vmem:[%s4835_s23 + $0x1b0] sm:$0xff]  ;;  %v7255_v22 = vlaneseq }
  0x96   : > { %7294 = vst [vmem:[#allocation15_spill] sm:$0xff] %v5158_v21 }
  0x97   : > { %v5163_v44 = vshrl.u32 %v7255_v22, 7 }
  0x9b   : > { %713 = vmatmul.f32.gmra.mxu1 %v4935_v41 }
  0x9c   : > { %1288 = vadd.xlane.f32.xlu0 %v1174_v32  ;;  %v1180_v32 = vmul.f32 %v409_v4, %v409_v4  ;;  %v410_v4 = vld [vmem:[%s4835_s23 + $0x1c8] sm:$0xff] }
  0x9d   : > { %1286 = vadd.xlane.f32.xlu2 %v1173_v39  ;;  %1284 = vadd.xlane.f32.xlu1 %v1172_v43  ;;  %v1179_v39 = vmul.f32 %v408_v17, %v408_v17  ;;  %v1178_v43 = vmul.f32 %v5158_v21, %v5158_v21  ;;  %v1181_v22 = vmul.f32 %v410_v4, %v410_v4 }
  0xa3   : > { %716 = vmatmul.f32.gmra.mxu1 %v4932_v40 }
  0xa4   : > { %1294 = vadd.xlane.f32.xlu0 %v1177_v56  ;;  %v5167_v56 = vadd.s32 16, %v5163_v44 }
  0xa5   : > { %1292 = vadd.xlane.f32.xlu2 %v1176_v63  ;;  %1290 = vadd.xlane.f32.xlu1 %v1175_v3  ;;  %v412_v63 = vld [vmem:[%s4835_s23 + $0x1d8] sm:$0xff]  ;;  %v411_v3 = vld [vmem:[%s4835_s23 + $0x1d0] sm:$0xff] }
  0xa6   : > { %4535 = vset.pattern.permute.xlu2 %v5167_v56  ;;  %v1183_v21 = vmul.f32 %v412_v63, %v412_v63  ;;  %v1182_v51 = vmul.f32 %v411_v3, %v411_v3 }
  0xab   : > { %719 = vmatmul.f32.gmra.mxu1 %v4954_v48 }
  0xac   : > { %1300 = vadd.xlane.f32.xlu0 %v1180_v32  ;;  %v414_v32 = vld [vmem:[%s4835_s23 + $0x1e8] sm:$0xff] }
  0xad   : > { %1298 = vadd.xlane.f32.xlu2 %v1179_v39  ;;  %1296 = vadd.xlane.f32.xlu1 %v1178_v43  ;;  %v413_v39 = vld [vmem:[%s4835_s23 + $0x1e0] sm:$0xff]  ;;  %v1185_v25 = vmul.f32 %v414_v32, %v414_v32 }
  0xae   : > { %v1184_v30 = vmul.f32 %v413_v39, %v413_v39  ;;  %v5199_v32 = vld [vmem:[%s5195_s27] sm:$0xf] }
  0xb0   : > { %v675_v17 = vpop.f32.mrf.mxu1 }
  0xb1   : > { %v867_v55 = vmul.f32 %v675_v17, %v675_v17 }
  0xb3   : > { %722 = vmatmul.f32.gmra.mxu1 %v4951_v47  ;;  %v932_v31 = vsel %vm931_vm0, %v867_v55, 0.0  ;;  %v5186_v55 = vadd.s32 8, %v5163_v44 }
  0xb4   : > { %1306 = vadd.xlane.f32.xlu0 %v1183_v21  ;;  %v416_v21 = vld [vmem:[%s4835_s23 + $0x1f8] sm:$0xff] }
  0xb5   : > { %1304 = vadd.xlane.f32.xlu2 %v1182_v51  ;;  %1302 = vadd.xlane.f32.xlu1 %v1181_v22  ;;  %v1187_v22 = vmul.f32 %v416_v21, %v416_v21  ;;  %7295 = vst [vmem:[#allocation16_spill] sm:$0xff] %v5186_v55  ;;  %v5205_v21 = vperm.slane %v5199_v32, 0 }
  0xb6   : > { %4534 = vset.pattern.permute.xlu1 %v5186_v55 }
  0xb8   : > { %v678_v43 = vpop.f32.mrf.mxu1 }
  0xb9   : > { %v868_v63 = vmul.f32 %v678_v43, %v678_v43  ;;  %v5202_v43 = vadd.s32 56, %v5163_v44 }
  0xbb   : > { %725 = vmatmul.f32.gmra.mxu1 %v4948_v46  ;;  %v935_v3 = vsel %vm931_vm0, %v868_v63, 0.0  ;;  %4540 = vset.pattern.permute.xlu0 %v5202_v43 }
  0xbc   : > { %933 = vadd.xlane.f32.xlu0 %v932_v31 }
  0xbd   : > { %1310 = vadd.xlane.f32.xlu2 %v1185_v25  ;;  %1308 = vadd.xlane.f32.xlu1 %v1184_v30  ;;  %v415_v25 = vld [vmem:[%s4835_s23 + $0x1f0] sm:$0xff] }
  0xbe   : > { %v1186_v4 = vmul.f32 %v415_v25, %v415_v25 }
  0xc0   : > { %v681_v51 = vpop.f32.mrf.mxu1 }
  0xc1   : > { %v869_v31 = vmul.f32 %v681_v51, %v681_v51 }
  0xc3   : > { %728 = vmatmul.f32.gmra.mxu1 %v4970_v54  ;;  %v938_v17 = vsel %vm931_vm0, %v869_v31, 0.0 }
  0xc4   : > { %936 = vadd.xlane.f32.xlu0 %v935_v3 }
  0xc5   : > { %1314 = vadd.xlane.f32.xlu1 %v1187_v22 }
  0xc8   : > { %v684_v30 = vpop.f32.mrf.mxu1 }
  0xc9   : > { %v870_v39 = vmul.f32 %v684_v30, %v684_v30  ;;  %v5217_v30 = vadd.s32 24, %v5163_v44 }
  0xcb   : > { %731 = vmatmul.f32.gmra.mxu1 %v4967_v53  ;;  %v941_v51 = vsel %vm931_vm0, %v870_v39, 0.0 }
  0xcc   : > { %1312 = vadd.xlane.f32.xlu0 %v1186_v4 }
  0xcd   : > { %939 = vadd.xlane.f32.xlu1 %v938_v17 }
  0xd0   : > { %v687_v63 = vpop.f32.mrf.mxu1 }
  0xd1   : > { %v871_v4 = vmul.f32 %v687_v63, %v687_v63  ;;  %v5232_v63 = vadd.s32 96, %v5163_v44 }
  0xd3   : > { %734 = vmatmul.f32.gmra.mxu1 %v4964_v52  ;;  %v944_v17 = vsel %vm931_vm0, %v871_v4, 0.0  ;;  %7296 = vst [vmem:[#allocation17_spill] sm:$0xff] %v5232_v63 }
  0xd5   : > { %2444 = vperm.xlu2 %4535, %v5205_v21   ;;  %942 = vadd.xlane.f32.xlu1 %v941_v51 }
  0xd8   : > { %v690_v22 = vpop.f32.mrf.mxu1 }
  0xd9   : > { %v872_v39 = vmul.f32 %v690_v22, %v690_v22 }
  0xdb   : > { %737 = vmatmul.f32.gmra.mxu1 %v4986_v60  ;;  %v947_v51 = vsel %vm931_vm0, %v872_v39, 0.0 }
  0xdd   : > { %4536 = vset.pattern.permute.xlu2 %v5217_v30 }
  0xe0   : > { %v693_v3 = vpop.f32.mrf.mxu1 }
  0xe1   : > { %v873_v25 = vmul.f32 %v693_v3, %v693_v3 }
  0xe3   : > { %v950_v31 = vsel %vm931_vm0, %v873_v25, 0.0  ;;  %740 = vmatmul.f32.gmra.mxu1 %v4983_v59  ;;  %v5227_v25 = vadd.s32 32, %v5163_v44 }
  0xe4   : > { %951 = vadd.xlane.f32.xlu0 %v950_v31 }
  0xe8   : > { %v696_v3 = vpop.f32.mrf.mxu1 }
  0xe9   : > { %v874_v22 = vmul.f32 %v696_v3, %v696_v3  ;;  %v5251_v3 = vadd.s32 48, %v5163_v44 }
  0xeb   : > { %743 = vmatmul.f32.gmra.mxu1 %v4980_v58  ;;  %v953_v4 = vsel %vm931_vm0, %v874_v22, 0.0  ;;  %v447_v22 = vld [vmem:[%s7244_s2 + $0xf0] sm:$0xff] }
  0xec   : > { %449 = vmatpush.msra.mxu0 %v447_v22  ;;  %v441_v22 = vld [vmem:[%s7244_s2 + $0xc0] sm:$0xff] }
  0xee   : > { %2438 = vperm.xlu1 %4534, %v5205_v21  }
  0xf0   : > { %v699_v31 = vpop.f32.mrf.mxu1 }
  0xf3   : > { %746 = vmatmul.f32.gmra.mxu1 %v5002_v2 }
  0xf6   : > { %4537 = vset.pattern.permute.xlu1 %v5227_v25 }
  0xf8   : > { %2474 = vperm.xlu0 %4540, %v5205_v21  }
  0xfb   : > { %749 = vmatmul.f32.gmra.mxu1 %v4999_v1 }
  0xfe   : > { %945 = vadd.xlane.f32.xlu2 %v944_v17  ;;  %v702_v17 = vpop.f32.mrf.mxu1 }
  0xff   : > { %v876_v39 = vmul.f32 %v702_v17, %v702_v17  ;;  %v445_v17 = vld [vmem:[%s7244_s2 + $0xe0] sm:$0xff] }
 0x100   : > { %4545 = vset.pattern.permute.xlu0 %v5232_v63  ;;  %450 = vmatpush.msra.mxu0 %v445_v17  ;;  %v437_v63 = vld [vmem:[%s7244_s2 + $0xa0] sm:$0xff] }
 0x103   : > { %752 = vmatmul.f32.gmra.mxu1 %v4996_v0 }
 0x106   : > { %948 = vadd.xlane.f32.xlu2 %v947_v51  ;;  %v959_v51 = vsel %vm931_vm0, %v876_v39, 0.0  ;;  %v443_v39 = vld [vmem:[%s7244_s2 + $0xd0] sm:$0xff] }
 0x107   : > { %451 = vmatpush.msra.mxu0 %v443_v39  ;;  %v433_v39 = vld [vmem:[%s7244_s2 + $0x80] sm:$0xff] }
 0x109   : > { %452 = vmatpush.msra.mxu0 %v441_v22  ;;  %v431_v22 = vld [vmem:[%s7244_s2 + $0x70] sm:$0xff] }
 0x10b   : > { %755 = vmatmul.f32.gmra.mxu1 %v5018_v11  ;;  %v5241_v11 = vadd.s32 40, %v5163_v44 }
 0x113   : > { %758 = vmatmul.f32.gmra.mxu1 %v5015_v10 }
 0x118   : > { %954 = vadd.xlane.f32.xlu1 %v953_v4  ;;  %v705_v4 = vpop.f32.mrf.mxu1 }
 0x11b   : > { %761 = vmatmul.f32.gmra.mxu1 %v5012_v9 }
 0x11e   : > { %2450 = vperm.xlu2 %4536, %v5205_v21  }
 0x120   : > { %v5280_v17 = vpop.f32.mrf.mxu1 }
 0x122   : > { %960 = vadd.xlane.f32.xlu0 %v959_v51  ;;  %v5266_v51 = vadd.s32 64, %v5163_v44 }
 0x123   : > { %764 = vmatmul.f32.gmra.mxu1 %v5034_v20 }
 0x126   : > { %4538 = vset.pattern.permute.xlu2 %v5241_v11 }
 0x12b   : > { %767 = vmatmul.f32.gmra.mxu1 %v5031_v19 }
 0x12e   : > { %2462 = vperm.xlu2 %4538, %v5205_v21  }
 0x131   : > { %2456 = vperm.xlu1 %4537, %v5205_v21  }
 0x133   : > { %770 = vmatmul.f32.gmra.mxu1 %v5028_v18 }
 0x136   : > { %2504 = vperm.xlu0 %4545, %v5205_v21   ;;  %4541 = vset.pattern.permute.xlu2 %v5266_v51 }
 0x139   : > { %4539 = vset.pattern.permute.xlu1 %v5251_v3 }
 0x13b   : > { %773 = vmatmul.f32.gmra.mxu1 %v5050_v29  ;;  %v435_v29 = vld [vmem:[%s7244_s2 + $0x90] sm:$0xff] }
 0x13e   : > { %4550 = vset.pattern.permute.xlu0 %v5186_v55  ;;  %v439_v55 = vld [vmem:[%s7244_s2 + $0xb0] sm:$0xff] }
 0x13f   : > { %453 = vmatpush.msra.mxu0 %v439_v55  ;;  %v429_v55 = vld [vmem:[%s7244_s2 + $0x60] sm:$0xff] }
 0x141   : > { %2468 = vperm.xlu1 %4539, %v5205_v21   ;;  %454 = vmatpush.msra.mxu0 %v437_v63  ;;  %v427_v63 = vld [vmem:[%s7244_s2 + $0x50] sm:$0xff] }
 0x143   : > { %776 = vmatmul.f32.gmra.mxu1 %v5047_v28  ;;  %455 = vmatpush.msra.mxu0 %v435_v29  ;;  %v875_v28 = vmul.f32 %v699_v31, %v699_v31  ;;  %v711_v29 = vpop.f32.mrf.mxu1  ;;  %v423_v31 = vld [vmem:[%s7244_s2 + $0x30] sm:$0xff] }
 0x145   : > { %456 = vmatpush.msra.mxu0 %v433_v39  ;;  %v425_v39 = vld [vmem:[%s7244_s2 + $0x40] sm:$0xff] }
 0x147   : > { %457 = vmatpush.msra.mxu0 %v431_v22  ;;  %v421_v22 = vld [vmem:[%s7244_s2 + $0x20] sm:$0xff] }
 0x149   : > { %458 = vmatpush.msra.mxu0 %v429_v55  ;;  %v879_v55 = vmul.f32 %v711_v29, %v711_v29  ;;  %v877_v29 = vmul.f32 %v705_v4, %v705_v4  ;;  %v5365_v4 = vadd.s32 112, %v5163_v44 }
 0x14b   : > { %779 = vmatmul.f32.gmra.mxu1 %v5044_v27  ;;  %v956_v27 = vsel %vm931_vm0, %v875_v28, 0.0  ;;  %459 = vmatpush.msra.mxu0 %v427_v63  ;;  %v419_v28 = vld [vmem:[%s7244_s2 + $0x10] sm:$0xff]  ;;  %v5313_v63 = vadd.s32 72, %v5163_v44 }
 0x14d   : > { %460 = vmatpush.msra.mxu0 %v425_v39  ;;  %v417_v39 = vld [vmem:[%s7244_s2] sm:$0xff]  ;;  %4542 = vset.pattern.permute.xlu1 %v5313_v63 }
 0x14f   : > { %461 = vmatpush.msra.mxu0 %v423_v31  ;;  %v714_v31 = vpop.f32.mrf.mxu1 }
 0x151   : > { %462 = vmatpush.msra.mxu0 %v421_v22  ;;  %v962_v22 = vsel %vm931_vm0, %v877_v29, 0.0  ;;  %v1583_v29 = vld [vmem:[%s7246_s4 + $0x38] sm:$0xff] }
 0x153   : > { %782 = vmatmul.f32.gmra.mxu1 %v5066_v38  ;;  %463 = vmatpush.msra.mxu0 %v419_v28 }
 0x155   : > { %464 = vmatpush.msra.mxu0 %v417_v39  ;;  %v1586_v39 = vld [vmem:[%s7246_s4 + $0x50] sm:$0xff] }
 0x156   : > { %465 = vmatmul.f32.vlgmr.msra.gmra.mxu0 %v4844_v7  ;;  %v5333_v7 = vadd.s32 80, %v5163_v44 }
 0x157   : > { %957 = vadd.xlane.f32.xlu2 %v956_v27  ;;  %v968_v27 = vsel %vm931_vm0, %v879_v55, 0.0  ;;  %v5325_v28 = vpop.f32.mrf.mxu1  ;;  %v5329_v55 = vperm.slane %v5199_v32, 1 }
 0x15b   : > { %785 = vmatmul.f32.gmra.mxu1 %v5063_v37 }
 0x15e   : > { %468 = vmatmul.f32.gmra.mxu0 %v4841_v6 }
 0x15f   : > { %v720_v6 = vpop.f32.mrf.mxu1 }
 0x160   : > { %969 = vadd.xlane.f32.xlu0 %v968_v27  ;;  %v1585_v27 = vld [vmem:[%s7246_s4 + $0x48] sm:$0xff] }
 0x163   : > { %788 = vmatmul.f32.gmra.mxu1 %v5060_v35  ;;  %v882_v35 = vmul.f32 %v720_v6, %v720_v6 }
 0x166   : > { %471 = vmatmul.f32.gmra.mxu0 %v4838_v5  ;;  %v5345_v5 = vadd.s32 88, %v5163_v44 }
 0x168   : > { %7297 = vst [vmem:[#allocation18_spill] sm:$0xff] %v5345_v5 }
 0x16b   : > { %963 = vadd.xlane.f32.xlu1 %v962_v22  ;;  %791 = vmatmul.f32.gmra.mxu1 %v5082_v50  ;;  %v5361_v50 = vpop.f32.mrf.mxu1  ;;  %v1581_v22 = vld [vmem:[%s7246_s4 + $0x28] sm:$0xff] }
 0x16e   : > { %474 = vmatmul.f32.gmra.mxu0 %v4868_v16  ;;  %v5350_v16 = vadd.s32 104, %v5163_v44 }
 0x16f   : > { %2480 = vperm.xlu2 %4541, %v5205_v21  }
 0x170   : > { %7298 = vst [vmem:[#allocation19_spill] sm:$0xff] %v5350_v16 }
 0x173   : > { %794 = vmatmul.f32.gmra.mxu1 %v5079_v49 }
 0x174   : > { %2534 = vperm.xlu0 %4550, %v5329_v55  }
 0x176   : > { %477 = vmatmul.f32.gmra.mxu0 %v4862_v14  ;;  %v977_v14 = vsel %vm931_vm0, %v882_v35, 0.0  ;;  %v1579_v35 = vld [vmem:[%s7246_s4 + $0x18] sm:$0xff] }
 0x177   : > { %4543 = vset.pattern.permute.xlu2 %v5333_v7 }
 0x17c   : > { %4555 = vset.pattern.permute.xlu0 %v5251_v3 }
 0x17e   : > { %480 = vmatmul.f32.gmra.mxu0 %v4859_v13  ;;  %v878_v13 = vmul.f32 %v5280_v17, %v5280_v17  ;;  %v1587_v17 = vld [vmem:[%s7246_s4 + $0x58] sm:$0xff] }
 0x17f   : > { %2492 = vperm.xlu2 %4543, %v5205_v21  }
 0x184   : > { %2486 = vperm.xlu1 %4542, %v5205_v21  }
 0x186   : > { %483 = vmatmul.f32.gmra.mxu0 %v4895_v26  ;;  %v965_v26 = vsel %vm931_vm0, %v878_v13, 0.0  ;;  %v5431_v13 = vld [vmem:[%s7245_s3] ss:$0 sm:$0xff] }
 0x187   : > { %4546 = vset.pattern.permute.xlu2 %v5350_v16 }
 0x18c   : > { %4544 = vset.pattern.permute.xlu1 %v5345_v5 }
 0x18e   : > { %486 = vmatmul.f32.gmra.mxu0 %v4889_v24  ;;  %v880_v24 = vmul.f32 %v714_v31, %v714_v31  ;;  %v1582_v31 = vld [vmem:[%s7246_s4 + $0x30] sm:$0xff] }
 0x190   : > { %v971_v49 = vsel %vm931_vm0, %v880_v24, 0.0 }
 0x194   : > { %2498 = vperm.xlu1 %4544, %v5205_v21  }
 0x196   : > { %489 = vmatmul.f32.gmra.mxu0 %v4886_v23  ;;  %v5369_v23 = vpop.f32.mrf.mxu1  ;;  %797 = vmatmul.f32.gmra.mxu1 %v5076_v45  ;;  %v1589_v45 = vld [vmem:[%s7246_s4 + $0x68] sm:$0xff] }
 0x19c   : > { %4547 = vset.pattern.permute.xlu1 %v5365_v4 }
 0x19e   : > { %978 = vadd.xlane.f32.xlu0 %v977_v14  ;;  %492 = vmatmul.f32.gmra.mxu0 %v4922_v36  ;;  %v729_v36 = vpop.f32.mrf.mxu1 }
 0x19f   : > { %800 = vmatmul.f32.gmra.mxu1 %v5098_v62  ;;  %v5389_v62 = vadd.s32 120, %v5163_v44  ;;  %v885_v6 = vmul.f32 %v729_v36, %v729_v36 }
 0x1a1   : > { %v986_v14 = vsel %vm931_vm0, %v885_v6, 0.0 }
 0x1a6   : > { %495 = vmatmul.f32.gmra.mxu0 %v4916_v34  ;;  %v1591_v34 = vld [vmem:[%s7246_s4 + $0x78] sm:$0xff] }
 0x1a7   : > { %1596 = vmatpush.msra.mxu2 %v1591_v34 }
 0x1a8   : > { %966 = vadd.xlane.f32.xlu2 %v965_v26  ;;  %v1578_v26 = vld [vmem:[%s7246_s4 + $0x10] sm:$0xff] }
 0x1ae   : > { %498 = vmatmul.f32.gmra.mxu0 %v4913_v33  ;;  %v1590_v33 = vld [vmem:[%s7246_s4 + $0x70] sm:$0xff] }
 0x1af   : > { %1597 = vmatpush.msra.mxu2 %v1590_v33 }
 0x1b1   : > { %1598 = vmatpush.msra.mxu2 %v1589_v45 }
 0x1b2   : > { %2564 = vperm.xlu0 %4555, %v5329_v55  }
 0x1b6   : > { %501 = vmatmul.f32.gmra.mxu0 %v4938_v42  ;;  %v1588_v42 = vld [vmem:[%s7246_s4 + $0x60] sm:$0xff] }
 0x1b7   : > { %1599 = vmatpush.msra.mxu2 %v1588_v42  ;;  %v5447_v42 = vpop.f32.mrf.mxu1  ;;  %803 = vmatmul.f32.gmra.mxu1 %v5095_v61 }
 0x1b9   : > { %1600 = vmatpush.msra.mxu2 %v1587_v17 }
 0x1ba   : > { %4560 = vset.pattern.permute.xlu0 %v5345_v5 }
 0x1bb   : > { %1601 = vmatpush.msra.mxu2 %v1586_v39 }
 0x1bd   : > { %1602 = vmatpush.msra.mxu2 %v1585_v27 }
 0x1be   : > { %972 = vadd.xlane.f32.xlu1 %v971_v49  ;;  %504 = vmatmul.f32.gmra.mxu0 %v4935_v41  ;;  %v1584_v41 = vld [vmem:[%s7246_s4 + $0x40] sm:$0xff] }
 0x1bf   : > { %1603 = vmatpush.msra.mxu2 %v1584_v41  ;;  %v1576_v49 = vld [vmem:[%s7246_s4] sm:$0xff]  ;;  %v5452_v39 = vpop.f32.mrf.mxu1  ;;  %806 = vmatmul.f32.gmra.mxu1 %v5092_v57 }
 0x1c0   : > { %2510 = vperm.xlu2 %4546, %v5205_v21  }
 0x1c1   : > { %1604 = vmatpush.msra.mxu2 %v1583_v29 }
 0x1c3   : > { %1605 = vmatpush.msra.mxu2 %v1582_v31 }
 0x1c5   : > { %1606 = vmatpush.msra.mxu2 %v1581_v22 }
 0x1c6   : > { %507 = vmatmul.f32.gmra.mxu0 %v4932_v40  ;;  %v1580_v40 = vld [vmem:[%s7246_s4 + $0x20] sm:$0xff] }
 0x1c7   : > { %1607 = vmatpush.msra.mxu2 %v1580_v40  ;;  %v738_v27 = vpop.f32.mrf.mxu1  ;;  %809 = vmatmul.f32.gmra.mxu1 %v5114_v15 }
 0x1c8   : > { %4548 = vset.pattern.permute.xlu2 %v5389_v62  ;;  %v888_v61 = vmul.f32 %v738_v27, %v738_v27  ;;  %v1875_v27 = vld [vmem:[%s7248_s6 + $0x30] sm:$0xff] }
 0x1c9   : > { %1608 = vmatpush.msra.mxu2 %v1579_v35 }
 0x1ca   : > { %v995_v41 = vsel %vm931_vm0, %v888_v61, 0.0 }
 0x1cb   : > { %1609 = vmatpush.msra.mxu2 %v1578_v26 }
 0x1ce   : > { %510 = vmatmul.f32.gmra.mxu0 %v4954_v48  ;;  %v1577_v48 = vld [vmem:[%s7246_s4 + $0x8] sm:$0xff] }
 0x1cf   : > { %1610 = vmatpush.msra.mxu2 %v1577_v48 }
 0x1d0   : > { %2522 = vperm.xlu2 %4548, %v5205_v21  }
 0x1d1   : > { %1611 = vmatpush.msra.mxu2 %v1576_v49 }
 0x1d3   : > { %v466_v24 = vpop.f32.mrf.mxu0 }
 0x1d4   : > { %v1448_v36 = vadd.f32 %v5431_v13, %v466_v24 }
 0x1d6   : > { %v1512_v34 = vmax.f32 %v1448_v36, 0.0  ;;  %513 = vmatmul.f32.gmra.mxu0 %v4951_v47  ;;  %v881_v47 = vmul.f32 %v5325_v28, %v5325_v28  ;;  %v1884_v36 = vld [vmem:[%s7248_s6 + $0x78] sm:$0xff] }
 0x1d7   : > { %2516 = vperm.xlu1 %4547, %v5205_v21   ;;  %1889 = vmatpush.msra.mxu3 %v1884_v36 }
 0x1d8   : > { %4551 = vset.pattern.permute.xlu2 %v5167_v56  ;;  %1612 = vmatmul.f32.vlgmr.msra.gmra.mxu2 %v1512_v34  ;;  %v1883_v34 = vld [vmem:[%s7248_s6 + $0x70] sm:$0xff] }
 0x1d9   : > { %1890 = vmatpush.msra.mxu3 %v1883_v34 }
 0x1db   : > { %v469_v33 = vpop.f32.mrf.mxu0 }
 0x1dc   : > { %987 = vadd.xlane.f32.xlu0 %v986_v14  ;;  %v1449_v45 = vadd.f32 %v5431_v13, %v469_v33  ;;  %v7299_v14 = vld [vmem:[#allocation11_spill] sm:$0xff]  ;;  %v1880_v33 = vld [vmem:[%s7248_s6 + $0x58] sm:$0xff] }
 0x1de   : > { %v1513_v17 = vmax.f32 %v1449_v45, 0.0  ;;  %516 = vmatmul.f32.gmra.mxu0 %v4948_v46  ;;  %v974_v46 = vsel %vm931_vm0, %v881_v47, 0.0  ;;  %v1879_v45 = vld [vmem:[%s7248_s6 + $0x50] sm:$0xff]  ;;  %v1877_v47 = vld [vmem:[%s7248_s6 + $0x40] sm:$0xff] }
 0x1df   : > { %4549 = vset.pattern.permute.xlu1 %v5163_v44 }
 0x1e0   : > { %1615 = vmatmul.f32.gmra.mxu2 %v1513_v17  ;;  %v1878_v17 = vld [vmem:[%s7248_s6 + $0x48] sm:$0xff] }
 0x1e6   : > { %519 = vmatmul.f32.gmra.mxu0 %v4970_v54  ;;  %v883_v54 = vmul.f32 %v5361_v50, %v5361_v50 }
 0x1e7   : > { %2528 = vperm.xlu1 %4549, %v5329_v55  }
 0x1e8   : > { %v980_v57 = vsel %vm931_vm0, %v883_v54, 0.0  ;;  %v1874_v54 = vld [vmem:[%s7248_s6 + $0x28] sm:$0xff] }
 0x1ee   : > { %522 = vmatmul.f32.gmra.mxu0 %v4967_v53  ;;  %v472_v53 = vpop.f32.mrf.mxu0 }
 0x1ef   : > { %4552 = vset.pattern.permute.xlu1 %v5217_v30  ;;  %v1450_v15 = vadd.f32 %v5431_v13, %v472_v53  ;;  %v1873_v53 = vld [vmem:[%s7248_s6 + $0x20] sm:$0xff] }
 0x1f0   : > { %2594 = vperm.xlu0 %4560, %v5329_v55  }
 0x1f1   : > { %v1514_v28 = vmax.f32 %v1450_v15, 0.0  ;;  %v7301_v15 = vld [vmem:[#allocation10_spill] sm:$0xff] }
 0x1f3   : > { %1618 = vmatmul.f32.gmra.mxu2 %v1514_v28  ;;  %v1871_v28 = vld [vmem:[%s7248_s6 + $0x10] sm:$0xff] }
 0x1f6   : > { %525 = vmatmul.f32.gmra.mxu0 %v4964_v52  ;;  %v475_v52 = vpop.f32.mrf.mxu0 }
 0x1f8   : > { %4561 = vset.pattern.permute.xlu0 %v5163_v44 }
 0x1f9   : > { %975 = vadd.xlane.f32.xlu2 %v974_v46 }
 0x1fe   : > { %528 = vmatmul.f32.gmra.mxu0 %v4986_v60  ;;  %v1451_v60 = vadd.f32 %v5431_v13, %v475_v52  ;;  %v478_v29 = vpop.f32.mrf.mxu0 }
 0x1ff   : > { %v1452_v31 = vadd.f32 %v5431_v13, %v478_v29  ;;  %v1869_v29 = vld [vmem:[%s7248_s6] sm:$0xff] }
 0x200   : > { %v1515_v50 = vmax.f32 %v1451_v60, 0.0 }
 0x202   : > { %1621 = vmatmul.f32.gmra.mxu2 %v1515_v50  ;;  %v1870_v50 = vld [vmem:[%s7248_s6 + $0x8] sm:$0xff] }
 0x206   : > { %531 = vmatmul.f32.gmra.mxu0 %v4983_v59  ;;  %v5476_v59 = vpop.f32.mrf.mxu1  ;;  %812 = vmatmul.f32.gmra.mxu1 %v5111_v12  ;;  %v481_v22 = vpop.f32.mrf.mxu0 }
 0x20e   : > { %534 = vmatmul.f32.gmra.mxu0 %v4980_v58  ;;  %v1516_v58 = vmax.f32 %v1452_v31, 0.0  ;;  %v5484_v6 = vpop.f32.mrf.mxu1  ;;  %815 = vmatmul.f32.gmra.mxu1 %v5108_v8  ;;  %v484_v40 = vpop.f32.mrf.mxu0  ;;  %v7300_v8 = vld [vmem:[#allocation5_spill] sm:$0xff] }
 0x210   : > { %1624 = vmatmul.f32.gmra.mxu2 %v1516_v58  ;;  %v5568_v58 = vperm.slane %v5199_v32, 2 }
 0x211   : > { %2540 = vperm.xlu2 %4551, %v5329_v55   ;;  %981 = vadd.xlane.f32.xlu1 %v980_v57  ;;  %v886_v57 = vmul.f32 %v5447_v42, %v5447_v42  ;;  %v5556_v42 = vld [vmem:[%s7247_s5] ss:$0 sm:$0xff] }
 0x216   : > { %537 = vmatmul.f32.gmra.mxu0 %v5002_v2  ;;  %v1453_v2 = vadd.f32 %v5431_v13, %v481_v22  ;;  %v747_v35 = vpop.f32.mrf.mxu1  ;;  %818 = vmatmul.f32.gmra.mxu1 %v7299_v14  ;;  %v487_v48 = vpop.f32.mrf.mxu0 }
 0x217   : > { %v5578_v14 = vpop.xlane.xlu2 %1190 }
 0x218   : > { %v1517_v12 = vmax.f32 %v1453_v2, 0.0 }
 0x219   : > { %4553 = vset.pattern.permute.xlu2 %v5227_v25 }
 0x21a   : > { %996 = vadd.xlane.f32.xlu0 %v995_v41  ;;  %1627 = vmatmul.f32.gmra.mxu2 %v1517_v12  ;;  %v989_v41 = vsel %vm931_vm0, %v886_v57, 0.0  ;;  %v7302_v12 = vld [vmem:[#allocation9_spill] sm:$0xff] }
 0x21e   : > { %540 = vmatmul.f32.gmra.mxu0 %v4999_v1  ;;  %v1454_v1 = vadd.f32 %v5431_v13, %v484_v40  ;;  %v5547_v61 = vpop.f32.mrf.mxu1  ;;  %821 = vmatmul.f32.gmra.mxu1 %v7301_v15  ;;  %v490_v22 = vpop.f32.mrf.mxu0 }
 0x21f   : > { %v1456_v40 = vadd.f32 %v5431_v13, %v490_v22 }
 0x220   : > { %v1518_v26 = vmax.f32 %v1454_v1, 0.0 }
 0x221   : > { %2552 = vperm.xlu2 %4553, %v5329_v55   ;;  %v1520_v1 = vmax.f32 %v1456_v40, 0.0 }
 0x222   : > { %1630 = vmatmul.f32.gmra.mxu2 %v1518_v26 }
 0x226   : > { %543 = vmatmul.f32.gmra.mxu0 %v4996_v0  ;;  %v884_v0 = vmul.f32 %v5369_v23, %v5369_v23  ;;  %v1881_v23 = vld [vmem:[%s7248_s6 + $0x60] sm:$0xff]  ;;  %v5570_v2 = vpop.f32.mrf.mxu1  ;;  %824 = vmatmul.f32.gmra.mxu1 %v7302_v12 }
 0x228   : > { %v983_v49 = vsel %vm931_vm0, %v884_v0, 0.0 }
 0x229   : > { %4556 = vset.pattern.permute.xlu2 %v5202_v43 }
 0x22a   : > { %2546 = vperm.xlu1 %4552, %v5329_v55  }
 0x22e   : > { %2432 = vperm.xlu0 %4561, %v5205_v21   ;;  %546 = vmatmul.f32.gmra.mxu0 %v7300_v8  ;;  %v1455_v21 = vadd.f32 %v5431_v13, %v487_v48  ;;  %v493_v8 = vpop.f32.mrf.mxu0  ;;  %v756_v48 = vpop.f32.mrf.mxu1 }
 0x230   : > { %v1519_v24 = vmax.f32 %v1455_v21, 0.0  ;;  %v7303_v21 = vld [vmem:[#allocation14_spill] sm:$0xff] }
 0x231   : > { %827 = vmatmul.f32.gmra.mxu1 %v7303_v21 }
 0x232   : > { %4554 = vset.pattern.permute.xlu1 %v5241_v11  ;;  %1633 = vmatmul.f32.gmra.mxu2 %v1519_v24  ;;  %v1457_v24 = vadd.f32 %v5431_v13, %v493_v8 }
 0x234   : > { %v1521_v0 = vmax.f32 %v1457_v24, 0.0  ;;  %v889_v24 = vmul.f32 %v5476_v59, %v5476_v59 }
 0x236   : > { %549 = vmatmul.f32.gmra.mxu0 %v5015_v10  ;;  %v1882_v10 = vld [vmem:[%s7248_s6 + $0x68] sm:$0xff]  ;;  %v496_v36 = vpop.f32.mrf.mxu0 }
 0x237   : > { %1891 = vmatpush.msra.mxu3 %v1882_v10  ;;  %v1458_v34 = vadd.f32 %v5431_v13, %v496_v36  ;;  %v7305_v10 = vld [vmem:[#allocation7_spill] sm:$0xff] }
 0x239   : > { %1892 = vmatpush.msra.mxu3 %v1881_v23  ;;  %v7306_v23 = vld [vmem:[#allocation17_spill] sm:$0xff] }
 0x23a   : > { %2558 = vperm.xlu1 %4554, %v5329_v55   ;;  %1636 = vmatmul.f32.gmra.mxu2 %v1520_v1 }
 0x23b   : > { %1893 = vmatpush.msra.mxu3 %v1880_v33  ;;  %v1522_v33 = vmax.f32 %v1458_v34, 0.0 }
 0x23d   : > { %1894 = vmatpush.msra.mxu3 %v1879_v45 }
 0x23e   : > { %552 = vmatmul.f32.gmra.mxu0 %v5012_v9  ;;  %v891_v9 = vmul.f32 %v747_v35, %v747_v35 }
 0x23f   : > { %1895 = vmatpush.msra.mxu3 %v1878_v17  ;;  %v7307_v17 = vld [vmem:[#allocation6_spill] sm:$0xff] }
 0x240   : > { %v1004_v46 = vsel %vm931_vm0, %v891_v9, 0.0  ;;  %v499_v9 = vpop.f32.mrf.mxu0 }
 0x241   : > { %1896 = vmatpush.msra.mxu3 %v1877_v47  ;;  %v1459_v45 = vadd.f32 %v5431_v13, %v499_v9 }
 0x242   : > { %4557 = vset.pattern.permute.xlu1 %v5266_v51  ;;  %1639 = vmatmul.f32.gmra.mxu2 %v1521_v0  ;;  %v7315_v0 = vld [vmem:[#allocation15_spill] sm:$0xff] }
 0x246   : > { %555 = vmatmul.f32.gmra.mxu0 %v5034_v20  ;;  %v1876_v20 = vld [vmem:[%s7248_s6 + $0x38] sm:$0xff] }
 0x247   : > { %1897 = vmatpush.msra.mxu3 %v1876_v20 }
 0x248   : > { %v502_v20 = vpop.f32.mrf.mxu0 }
 0x249   : > { %1898 = vmatpush.msra.mxu3 %v1875_v27  ;;  %v1460_v27 = vadd.f32 %v5431_v13, %v502_v20 }
 0x24a   : > { %984 = vadd.xlane.f32.xlu2 %v983_v49  ;;  %v5585_v49 = vpop.xlane.xlu2 %1196  ;;  %1642 = vmatmul.f32.gmra.mxu2 %v1522_v33  ;;  %v998_v33 = vsel %vm931_vm0, %v889_v24, 0.0  ;;  %v5656_v24 = vpop.xlane.xlu0 %1192 }
 0x24b   : > { %1899 = vmatpush.msra.mxu3 %v1874_v54  ;;  %v1524_v54 = vmax.f32 %v1460_v27, 0.0 }
 0x24d   : > { %1900 = vmatpush.msra.mxu3 %v1873_v53  ;;  %v894_v53 = vmul.f32 %v756_v48, %v756_v48 }
 0x24e   : > { %558 = vmatmul.f32.gmra.mxu0 %v5031_v19  ;;  %v1872_v19 = vld [vmem:[%s7248_s6 + $0x18] sm:$0xff] }
 0x24f   : > { %1901 = vmatpush.msra.mxu3 %v1872_v19 }
 0x250   : > { %v505_v19 = vpop.f32.mrf.mxu0 }
 0x251   : > { %1902 = vmatpush.msra.mxu3 %v1871_v28  ;;  %v1461_v15 = vadd.f32 %v5431_v13, %v505_v19  ;;  %v1013_v28 = vsel %vm931_vm0, %v894_v53, 0.0 }
 0x252   : > { %v5593_v47 = vpop.xlane.xlu2 %1202 }
 0x253   : > { %1903 = vmatpush.msra.mxu3 %v1870_v50  ;;  %7308 = vst [vmem:[#allocation11_spill] sm:$0xff] %v5593_v47 }
 0x255   : > { %1904 = vmatpush.msra.mxu3 %v1869_v29 }
 0x256   : > { %561 = vmatmul.f32.gmra.mxu0 %v5028_v18  ;;  %v7304_v18 = vld [vmem:[#allocation8_spill] sm:$0xff] }
 0x258   : > { %1005 = vadd.xlane.f32.xlu0 %v1004_v46  ;;  %v1523_v46 = vmax.f32 %v1459_v45, 0.0 }
 0x25a   : > { %1645 = vmatmul.f32.gmra.mxu2 %v1523_v46  ;;  %v5598_v57 = vpop.xlane.xlu2 %1208  ;;  %v4604_v46 = vld [vmem:[%s4835_s23 + $0x130] sm:$0xff] }
 0x25b   : > { %v1613_v52 = vpop.f32.mrf.mxu2  ;;  %7309 = vst [vmem:[#allocation5_spill] sm:$0xff] %v5598_v57 }
 0x25c   : > { %v1614_v60 = vadd.f32 %v5556_v42, %v1613_v52  ;;  %v887_v52 = vmul.f32 %v5452_v39, %v5452_v39 }
 0x25e   : > { %v1805_v31 = vmax.f32 %v1614_v60, 0.0  ;;  %564 = vmatmul.f32.gmra.mxu0 %v7304_v18  ;;  %v992_v60 = vsel %vm931_vm0, %v887_v52, 0.0  ;;  %v4605_v52 = vld [vmem:[%s4835_s23 + $0x138] sm:$0xff] }
 0x260   : > { %1905 = vmatmul.f32.vlgmr.msra.gmra.mxu3 %v1805_v31  ;;  %v5611_v31 = vpop.f32.mrf.mxu1 }
 0x262   : > { %2570 = vperm.xlu2 %4556, %v5329_v55   ;;  %1648 = vmatmul.f32.gmra.mxu2 %v1524_v54 }
 0x263   : > { %v1616_v35 = vpop.f32.mrf.mxu2 }
 0x264   : > { %990 = vadd.xlane.f32.xlu1 %v989_v41  ;;  %v1617_v32 = vadd.f32 %v5556_v42, %v1616_v35  ;;  %v1525_v41 = vmax.f32 %v1461_v15, 0.0  ;;  %v7313_v35 = vld [vmem:[#allocation12_spill] sm:$0xff] }
 0x266   : > { %v1806_v26 = vmax.f32 %v1617_v32, 0.0  ;;  %567 = vmatmul.f32.gmra.mxu0 %v7305_v10 }
 0x268   : > { %1908 = vmatmul.f32.gmra.mxu3 %v1806_v26  ;;  %v5617_v1 = vpop.f32.mrf.mxu1 }
 0x26a   : > { %4558 = vset.pattern.permute.xlu2 %v5313_v63  ;;  %1651 = vmatmul.f32.gmra.mxu2 %v1525_v41 }
 0x26c   : > { %2624 = vperm.xlu0 %4561, %v5568_v58  }
 0x26e   : > { %570 = vmatmul.f32.gmra.mxu0 %v7307_v17  ;;  %v508_v17 = vpop.f32.mrf.mxu0 }
 0x26f   : > { %v1462_v20 = vadd.f32 %v5431_v13, %v508_v17 }
 0x270   : > { %v765_v18 = vpop.f32.mrf.mxu1 }
 0x271   : > { %v1526_v53 = vmax.f32 %v1462_v20, 0.0  ;;  %v5669_v20 = vpop.xlane.xlu0 %1198 }
 0x272   : > { %2582 = vperm.xlu2 %4558, %v5329_v55  }
 0x273   : > { %1654 = vmatmul.f32.gmra.mxu2 %v1526_v53 }
 0x274   : > { %4570 = vset.pattern.permute.xlu0 %v5241_v11 }
 0x276   : > { %573 = vmatmul.f32.gmra.mxu0 %v5066_v38  ;;  %v5607_v38 = vpop.xlane.xlu2 %1214  ;;  %v1619_v50 = vpop.f32.mrf.mxu2 }
 0x277   : > { %7310 = vst [vmem:[#allocation10_spill] sm:$0xff] %v5607_v38  ;;  %v1620_v29 = vadd.f32 %v5556_v42, %v1619_v50 }
 0x279   : > { %v1807_v22 = vmax.f32 %v1620_v29, 0.0 }
 0x27a   : > { %4562 = vset.pattern.permute.xlu2 %v7306_v23 }
 0x27b   : > { %1911 = vmatmul.f32.gmra.mxu3 %v1807_v22 }
 0x27d   : > { %2576 = vperm.xlu1 %4557, %v5329_v55  }
 0x27e   : > { %576 = vmatmul.f32.gmra.mxu0 %v5063_v37  ;;  %v7311_v37 = vld [vmem:[#allocation13_spill] sm:$0xff]  ;;  %v5614_v12 = vpop.xlane.xlu2 %1220 }
 0x27f   : > { %830 = vmatmul.f32.gmra.mxu1 %v7311_v37  ;;  %7312 = vst [vmem:[#allocation9_spill] sm:$0xff] %v5614_v12  ;;  %v7319_v37 = vld [vmem:[#allocation16_spill] sm:$0xff] }
 0x285   : > { %4559 = vset.pattern.permute.xlu1 %v5333_v7  ;;  %v1622_v39 = vpop.f32.mrf.mxu2 }
 0x286   : > { %v1623_v40 = vadd.f32 %v5556_v42, %v1622_v39  ;;  %v5621_v8 = vpop.xlane.xlu2 %1226  ;;  %579 = vmatmul.f32.gmra.mxu0 %v4604_v46  ;;  %v4606_v39 = vld [vmem:[%s4835_s23 + $0x140] sm:$0xff]  ;;  %v4610_v46 = vld [vmem:[%s4835_s23 + $0x150] sm:$0xff] }
 0x287   : > { %833 = vmatmul.f32.gmra.mxu1 %v7313_v35  ;;  %7314 = vst [vmem:[#allocation14_spill] sm:$0xff] %v5621_v8 }
 0x288   : > { %v1808_v32 = vmax.f32 %v1623_v40, 0.0  ;;  %v897_v40 = vmul.f32 %v765_v18, %v765_v18 }
 0x28a   : > { %1914 = vmatmul.f32.gmra.mxu3 %v1808_v32 }
 0x28d   : > { %2588 = vperm.xlu1 %4559, %v5329_v55  }
 0x28e   : > { %v5630_v10 = vpop.xlane.xlu2 %1232 }
 0x28f   : > { %836 = vmatmul.f32.gmra.mxu1 %v7315_v0  ;;  %7316 = vst [vmem:[#allocation8_spill] sm:$0xff] %v5630_v10 }
 0x293   : > { %v1625_v26 = vpop.f32.mrf.mxu2 }
 0x294   : > { %v1626_v48 = vadd.f32 %v5556_v42, %v1625_v26  ;;  %v5648_v26 = vpop.f32.mrf.mxu1 }
 0x295   : > { %4563 = vset.pattern.permute.xlu1 %v5350_v16 }
 0x296   : > { %1014 = vadd.xlane.f32.xlu0 %v1013_v28  ;;  %v1809_v21 = vmax.f32 %v1626_v48, 0.0  ;;  %v5637_v54 = vpop.xlane.xlu2 %1238  ;;  %v511_v28 = vpop.f32.mrf.mxu0  ;;  %582 = vmatmul.f32.gmra.mxu0 %v4605_v52  ;;  %v5651_v48 = vld [vmem:[%s4835_s23 + $0x1b8] sm:$0xff]  ;;  %v4611_v52 = vld [vmem:[%s4835_s23 + $0x1c8] sm:$0xff] }
 0x297   : > { %7317 = vst [vmem:[#allocation7_spill] sm:$0xff] %v5637_v54  ;;  %v1463_v41 = vadd.f32 %v5431_v13, %v511_v28  ;;  %839 = vmatmul.f32.gmra.mxu1 %v5651_v48 }
 0x298   : > { %1917 = vmatmul.f32.gmra.mxu3 %v1809_v21  ;;  %v1022_v21 = vsel %vm931_vm0, %v897_v40, 0.0 }
 0x299   : > { %v1527_v50 = vmax.f32 %v1463_v41, 0.0 }
 0x29b   : > { %993 = vadd.xlane.f32.xlu2 %v992_v60  ;;  %1657 = vmatmul.f32.gmra.mxu2 %v1527_v50  ;;  %v890_v50 = vmul.f32 %v5484_v6, %v5484_v6 }
 0x29d   : > { %v1628_v36 = vpop.f32.mrf.mxu2 }
 0x29e   : > { %v1629_v34 = vadd.f32 %v5556_v42, %v1628_v36  ;;  %v5643_v29 = vpop.xlane.xlu2 %1244  ;;  %v514_v22 = vpop.f32.mrf.mxu0  ;;  %585 = vmatmul.f32.gmra.mxu0 %v4606_v39  ;;  %v4608_v36 = vld [vmem:[%s4835_s23 + $0x148] sm:$0xff] }
 0x29f   : > { %7318 = vst [vmem:[#allocation17_spill] sm:$0xff] %v5643_v29  ;;  %v1464_v35 = vadd.f32 %v5431_v13, %v514_v22  ;;  %v5682_v39 = vpop.xlane.xlu0 %1204 }
 0x2a0   : > { %v1810_v9 = vmax.f32 %v1629_v34, 0.0  ;;  %7322 = vst [vmem:[#allocation12_spill] sm:$0xff] %v5682_v39 }
 0x2a1   : > { %v1528_v32 = vmax.f32 %v1464_v35, 0.0 }
 0x2a2   : > { %1920 = vmatmul.f32.gmra.mxu3 %v1810_v9  ;;  %v5662_v9 = vpop.f32.mrf.mxu1 }
 0x2a3   : > { %1660 = vmatmul.f32.gmra.mxu2 %v1528_v32 }
 0x2a5   : > { %v1631_v45 = vpop.f32.mrf.mxu2 }
 0x2a6   : > { %v1632_v59 = vadd.f32 %v5556_v42, %v1631_v45  ;;  %v5658_v0 = vpop.xlane.xlu2 %1250  ;;  %v517_v18 = vpop.f32.mrf.mxu0  ;;  %588 = vmatmul.f32.gmra.mxu0 %v4608_v36  ;;  %v4609_v45 = vld [vmem:[%s4835_s23 + $0x1c0] sm:$0xff] }
 0x2a7   : > { %7320 = vst [vmem:[#allocation6_spill] sm:$0xff] %v5658_v0  ;;  %v1465_v34 = vadd.f32 %v5431_v13, %v517_v18  ;;  %842 = vmatmul.f32.gmra.mxu1 %v4609_v45  ;;  %v5695_v36 = vpop.xlane.xlu0 %1210 }
 0x2a8   : > { %v1811_v27 = vmax.f32 %v1632_v59, 0.0  ;;  %v5665_v59 = vpop.xlane.xlu1 %1188  ;;  %7325 = vst [vmem:[#allocation20_spill] sm:$0xff] %v5695_v36 }
 0x2aa   : > { %2654 = vperm.xlu0 %4570, %v5568_v58   ;;  %1923 = vmatmul.f32.gmra.mxu3 %v1811_v27  ;;  %v774_v41 = vpop.f32.mrf.mxu1 }
 0x2ae   : > { %v520_v17 = vpop.f32.mrf.mxu0  ;;  %591 = vmatmul.f32.gmra.mxu0 %v4610_v46  ;;  %v5671_v27 = vpop.xlane.xlu2 %1256  ;;  %v4614_v46 = vld [vmem:[%s4835_s23 + $0x1d8] sm:$0xff] }
 0x2af   : > { %7321 = vst [vmem:[#allocation13_spill] sm:$0xff] %v5671_v27  ;;  %v1466_v53 = vadd.f32 %v5431_v13, %v520_v17  ;;  %845 = vmatmul.f32.gmra.mxu1 %v4611_v52  ;;  %v5706_v52 = vpop.xlane.xlu0 %1216 }
 0x2b0   : > { %7328 = vst [vmem:[#allocation23_spill] sm:$0xff] %v5706_v52 }
 0x2b2   : > { %4575 = vset.pattern.permute.xlu0 %v5333_v7  ;;  %v5689_v32 = vpop.f32.mrf.mxu1 }
 0x2b3   : > { %2600 = vperm.xlu2 %4562, %v5329_v55  }
 0x2b5   : > { %v1634_v19 = vpop.f32.mrf.mxu2 }
 0x2b6   : > { %v1635_v15 = vadd.f32 %v5556_v42, %v1634_v19  ;;  %v1530_v19 = vmax.f32 %v1466_v53, 0.0  ;;  %v523_v28 = vpop.f32.mrf.mxu0  ;;  %v5684_v40 = vpop.xlane.xlu2 %1262 }
 0x2b7   : > { %999 = vadd.xlane.f32.xlu1 %v998_v33  ;;  %v1529_v33 = vmax.f32 %v1465_v34, 0.0  ;;  %v1467_v22 = vadd.f32 %v5431_v13, %v523_v28  ;;  %7323 = vst [vmem:[#allocation15_spill] sm:$0xff] %v5684_v40 }
 0x2b8   : > { %v1812_v60 = vmax.f32 %v1635_v15, 0.0  ;;  %v5675_v15 = vpop.xlane.xlu1 %1194 }
 0x2b9   : > { %1663 = vmatmul.f32.gmra.mxu2 %v1529_v33  ;;  %v1531_v35 = vmax.f32 %v1467_v22, 0.0 }
 0x2ba   : > { %1926 = vmatmul.f32.gmra.mxu3 %v1812_v60  ;;  %v4612_v60 = vld [vmem:[%s4835_s23 + $0x158] sm:$0xff]  ;;  %v5700_v17 = vpop.f32.mrf.mxu1 }
 0x2bb   : > { %4564 = vset.pattern.permute.xlu2 %v5365_v4  ;;  %594 = vmatmul.f32.gmra.mxu0 %v4612_v60 }
 0x2bd   : > { %v1637_v18 = vpop.f32.mrf.mxu2 }
 0x2be   : > { %v5697_v34 = vpop.xlane.xlu2 %1268  ;;  %v1638_v33 = vadd.f32 %v5556_v42, %v1637_v18 }
 0x2bf   : > { %7326 = vst [vmem:[#allocation21_spill] sm:$0xff] %v5697_v34 }
 0x2c0   : > { %v5692_v6 = vpop.xlane.xlu1 %1200  ;;  %v1813_v45 = vmax.f32 %v1638_v33, 0.0 }
 0x2c1   : > { %1666 = vmatmul.f32.gmra.mxu2 %v1530_v19  ;;  %7324 = vst [vmem:[#allocation16_spill] sm:$0xff] %v5692_v6  ;;  %v4626_v6 = vld [vmem:[%s4835_s23 + $0x190] sm:$0xff] }
 0x2c2   : > { %1929 = vmatmul.f32.gmra.mxu3 %v1813_v45  ;;  %v783_v22 = vpop.f32.mrf.mxu1 }
 0x2c3   : > { %2612 = vperm.xlu2 %4564, %v5329_v55   ;;  %v903_v10 = vmul.f32 %v783_v22, %v783_v22 }
 0x2c5   : > { %v1640_v19 = vpop.f32.mrf.mxu2 }
 0x2c6   : > { %v1641_v28 = vadd.f32 %v5556_v42, %v1640_v19  ;;  %v5708_v60 = vpop.xlane.xlu2 %1274  ;;  %v5719_v19 = vpop.xlane.xlu0 %1222 }
 0x2c7   : > { %7329 = vst [vmem:[#allocation24_spill] sm:$0xff] %v5708_v60 }
 0x2c8   : > { %v5703_v53 = vpop.xlane.xlu1 %1206  ;;  %7331 = vst [vmem:[#allocation26_spill] sm:$0xff] %v5719_v19 }
 0x2c9   : > { %1669 = vmatmul.f32.gmra.mxu2 %v1531_v35  ;;  %7327 = vst [vmem:[#allocation22_spill] sm:$0xff] %v5703_v53 }
 0x2cb   : > { %4566 = vset.pattern.permute.xlu2 %v7319_v37 }
 0x2cd   : > { %v1643_v35 = vpop.f32.mrf.mxu2 }
 0x2ce   : > { %v1644_v18 = vadd.f32 %v5556_v42, %v1643_v35  ;;  %v5728_v35 = vld [vmem:[%s7249_s7] ss:$0 sm:$0xff] }
 0x2d0   : > { %2606 = vperm.xlu1 %4563, %v5329_v55   ;;  %v5714_v33 = vpop.xlane.xlu1 %1212  ;;  %v1815_v45 = vmax.f32 %v1644_v18, 0.0  ;;  %v900_v18 = vmul.f32 %v774_v41, %v774_v41 }
 0x2d1   : > { %7330 = vst [vmem:[#allocation25_spill] sm:$0xff] %v5714_v33 }
 0x2d4   : > { %1023 = vadd.xlane.f32.xlu0 %v1022_v21  ;;  %v4613_v21 = vld [vmem:[%s4835_s23 + $0x1d0] sm:$0xff] }
 0x2d5   : > { %848 = vmatmul.f32.gmra.mxu1 %v4613_v21 }
 0x2d8   : > { %4565 = vset.pattern.permute.xlu1 %v5389_v62  ;;  %v5730_v40 = vpop.xlane.xlu1 %1218 }
 0x2d9   : > { %7333 = vst [vmem:[#allocation28_spill] sm:$0xff] %v5730_v40 }
 0x2dd   : > { %851 = vmatmul.f32.gmra.mxu1 %v4614_v46  ;;  %v892_v46 = vmul.f32 %v5547_v61, %v5547_v61 }
 0x2e0   : > { %2618 = vperm.xlu1 %4565, %v5329_v55   ;;  %v1001_v55 = vsel %vm931_vm0, %v890_v50, 0.0  ;;  %v1814_v50 = vmax.f32 %v1641_v28, 0.0  ;;  %v5721_v28 = vpop.xlane.xlu2 %1280 }
 0x2e1   : > { %7332 = vst [vmem:[#allocation27_spill] sm:$0xff] %v5721_v28  ;;  %v1031_v28 = vsel %vm931_vm0, %v900_v18, 0.0  ;;  %v5748_v18 = vpop.xlane.xlu1 %1224 }
 0x2e2   : > { %1932 = vmatmul.f32.gmra.mxu3 %v1814_v50  ;;  %v1007_v50 = vsel %vm931_vm0, %v892_v46, 0.0  ;;  %v5734_v46 = vpop.xlane.xlu0 %1228  ;;  %7336 = vst [vmem:[#allocation31_spill] sm:$0xff] %v5748_v18 }
 0x2e3   : > { %v5711_v21 = vpop.f32.mrf.mxu3  ;;  %7334 = vst [vmem:[#allocation29_spill] sm:$0xff] %v5734_v46 }
 0x2e8   : > { %2684 = vperm.xlu0 %4575, %v5568_v58   ;;  %4567 = vset.pattern.permute.xlu1 %v5167_v56 }
 0x2ea   : > { %1935 = vmatmul.f32.gmra.mxu3 %v1815_v45  ;;  %v5751_v29 = vpop.xlane.xlu0 %1234 }
 0x2eb   : > { %v1909_v61 = vpop.f32.mrf.mxu3  ;;  %7337 = vst [vmem:[#allocation32_spill] sm:$0xff] %v5751_v29 }
 0x2ec   : > { %1002 = vadd.xlane.f32.xlu2 %v1001_v55  ;;  %v4615_v55 = vld [vmem:[%s4835_s23 + $0x1e0] sm:$0xff]  ;;  %v1910_v45 = vadd.f32 %v5728_v35, %v1909_v61 }
 0x2ed   : > { %854 = vmatmul.f32.gmra.mxu1 %v4615_v55  ;;  %v1646_v55 = vpop.f32.mrf.mxu2  ;;  %v4616_v61 = vld [vmem:[%s4835_s23 + $0x160] sm:$0xff] }
 0x2ee   : > { %v1647_v60 = vadd.f32 %v5556_v42, %v1646_v55  ;;  %v5736_v55 = vpop.xlane.xlu2 %1286 }
 0x2ef   : > { %7335 = vst [vmem:[#allocation30_spill] sm:$0xff] %v5736_v55 }
 0x2f0   : > { %4580 = vset.pattern.permute.xlu0 %v5389_v62  ;;  %v1816_v34 = vmax.f32 %v1647_v60, 0.0  ;;  %v5743_v60 = vld [vmem:[%s7250_s8] ss:$0 sm:$0xff] }
 0x2f2   : > { %1938 = vmatmul.f32.gmra.mxu3 %v1816_v34  ;;  %v526_v34 = vpop.f32.mrf.mxu0  ;;  %597 = vmatmul.f32.gmra.mxu0 %v4616_v61  ;;  %v5762_v22 = vpop.xlane.xlu0 %1240 }
 0x2f3   : > { %v1468_v55 = vadd.f32 %v5431_v13, %v526_v34  ;;  %7340 = vst [vmem:[#allocation35_spill] sm:$0xff] %v5762_v22  ;;  %v4621_v22 = vld [vmem:[%s4835_s23 + $0x1f0] sm:$0xff] }
 0x2f5   : > { %v1649_v27 = vpop.f32.mrf.mxu2 }
 0x2f6   : > { %v1650_v41 = vadd.f32 %v5556_v42, %v1649_v27  ;;  %v5753_v54 = vpop.xlane.xlu2 %1292 }
 0x2f7   : > { %7338 = vst [vmem:[#allocation33_spill] sm:$0xff] %v5753_v54  ;;  %v5760_v54 = vpop.xlane.xlu1 %1230 }
 0x2f8   : > { %v1817_v0 = vmax.f32 %v1650_v41, 0.0  ;;  %7339 = vst [vmem:[#allocation34_spill] sm:$0xff] %v5760_v54  ;;  %v4623_v54 = vld [vmem:[%s4835_s23 + $0x1f8] sm:$0xff] }
 0x2fa   : > { %1941 = vmatmul.f32.gmra.mxu3 %v1817_v0  ;;  %v529_v46 = vpop.f32.mrf.mxu0  ;;  %v4617_v0 = vld [vmem:[%s4835_s23 + $0x168] sm:$0xff] }
 0x2fb   : > { %600 = vmatmul.f32.gmra.mxu0 %v4617_v0  ;;  %v4619_v0 = vld [vmem:[%s4835_s23 + $0x1e8] sm:$0xff] }
 0x304   : > { %2630 = vperm.xlu2 %4566, %v5568_v58  }
 0x30a   : > { %1008 = vadd.xlane.f32.xlu1 %v1007_v50  ;;  %v2099_v50 = vmax.f32 %v1910_v45, 0.0  ;;  %v1652_v45 = vpop.f32.mrf.mxu2 }
 0x30b   : > { %v1653_v41 = vadd.f32 %v5556_v42, %v1652_v45  ;;  %v4618_v45 = vld [vmem:[%s4835_s23 + $0x170] sm:$0xff] }
 0x30c   : > { %4568 = vset.pattern.permute.xlu2 %v5217_v30  ;;  %v2167_v27 = vmul.f32 %v5743_v60, %v2099_v50  ;;  %v1469_v50 = vadd.f32 %v5431_v13, %v529_v46 }
 0x30d   : > { %v1818_v61 = vmax.f32 %v1653_v41, 0.0 }
 0x30e   : > { %v1533_v34 = vmax.f32 %v1469_v50, 0.0 }
 0x30f   : > { %1944 = vmatmul.f32.gmra.mxu3 %v1818_v61  ;;  %v5771_v61 = vpop.f32.mrf.mxu1  ;;  %857 = vmatmul.f32.gmra.mxu1 %v4619_v0 }
 0x312   : > { %1032 = vadd.xlane.f32.xlu0 %v1031_v28  ;;  %v1532_v28 = vmax.f32 %v1468_v55, 0.0  ;;  %v1040_v55 = vsel %vm931_vm0, %v903_v10, 0.0  ;;  %v5769_v10 = vpop.xlane.xlu1 %1236 }
 0x313   : > { %7342 = vst [vmem:[#allocation37_spill] sm:$0xff] %v5769_v10  ;;  %v4622_v10 = vld [vmem:[%s4835_s23 + $0x180] sm:$0xff] }
 0x314   : > { %2642 = vperm.xlu2 %4568, %v5568_v58   ;;  %1672 = vmatmul.f32.gmra.mxu2 %v1532_v28  ;;  %v532_v28 = vpop.f32.mrf.mxu0 }
 0x315   : > { %603 = vmatmul.f32.gmra.mxu0 %v4618_v45  ;;  %v1470_v46 = vadd.f32 %v5431_v13, %v532_v28 }
 0x317   : > { %v1534_v41 = vmax.f32 %v1470_v46, 0.0  ;;  %v5781_v46 = vpop.f32.mrf.mxu3 }
 0x31a   : > { %2232 = vadd.xlane.f32.xlu0 %v2167_v27  ;;  %v5764_v27 = vpop.xlane.xlu2 %1298  ;;  %v5786_v0 = vpop.xlane.xlu1 %1242 }
 0x31b   : > { %7341 = vst [vmem:[#allocation36_spill] sm:$0xff] %v5764_v27  ;;  %v5783_v27 = vpop.f32.mrf.mxu1  ;;  %860 = vmatmul.f32.gmra.mxu1 %v4621_v22 }
 0x31c   : > { %4571 = vset.pattern.permute.xlu2 %v5251_v3  ;;  %1675 = vmatmul.f32.gmra.mxu2 %v1533_v34  ;;  %v535_v50 = vpop.f32.mrf.mxu0  ;;  %v5776_v34 = vpop.xlane.xlu0 %1246  ;;  %7345 = vst [vmem:[#allocation40_spill] sm:$0xff] %v5786_v0 }
 0x31d   : > { %7343 = vst [vmem:[#allocation38_spill] sm:$0xff] %v5776_v34  ;;  %v1471_v28 = vadd.f32 %v5431_v13, %v535_v50  ;;  %v893_v50 = vmul.f32 %v5570_v2, %v5570_v2 }
 0x31f   : > { %v5798_v34 = vpop.f32.mrf.mxu3  ;;  %v1010_v0 = vsel %vm931_vm0, %v893_v50, 0.0 }
 0x322   : > { %1041 = vadd.xlane.f32.xlu0 %v1040_v55  ;;  %v4620_v55 = vld [vmem:[%s4835_s23 + $0x178] sm:$0xff]  ;;  %v5778_v45 = vpop.xlane.xlu2 %1304 }
 0x323   : > { %2636 = vperm.xlu1 %4567, %v5568_v58   ;;  %606 = vmatmul.f32.gmra.mxu0 %v4620_v55  ;;  %7344 = vst [vmem:[#allocation39_spill] sm:$0xff] %v5778_v45  ;;  %v792_v29 = vpop.f32.mrf.mxu1 }
 0x324   : > { %1678 = vmatmul.f32.gmra.mxu2 %v1534_v41  ;;  %v1535_v41 = vmax.f32 %v1471_v28, 0.0  ;;  %v538_v55 = vpop.f32.mrf.mxu0  ;;  %v5794_v28 = vpop.xlane.xlu0 %1252  ;;  %863 = vmatmul.f32.gmra.mxu1 %v4623_v54 }
 0x325   : > { %v1472_v45 = vadd.f32 %v5431_v13, %v538_v55  ;;  %7346 = vst [vmem:[#allocation41_spill] sm:$0xff] %v5794_v28  ;;  %v4624_v55 = vld [vmem:[%s4835_s23 + $0x188] sm:$0xff]  ;;  %v5805_v28 = vpop.xlane.xlu1 %1248  ;;  %v1655_v54 = vpop.f32.mrf.mxu2 }
 0x326   : > { %7348 = vst [vmem:[#allocation43_spill] sm:$0xff] %v5805_v28  ;;  %v1656_v8 = vadd.f32 %v5556_v42, %v1655_v54 }
 0x327   : > { %v1536_v22 = vmax.f32 %v1472_v45, 0.0  ;;  %v1918_v50 = vpop.f32.mrf.mxu3 }
 0x32b   : > { %4569 = vset.pattern.permute.xlu1 %v5227_v25  ;;  %609 = vmatmul.f32.gmra.mxu0 %v4622_v10 }
 0x32c   : > { %1681 = vmatmul.f32.gmra.mxu2 %v1535_v41  ;;  %v5796_v41 = vpop.xlane.xlu2 %1310  ;;  %v541_v10 = vpop.f32.mrf.mxu0 }
 0x32d   : > { %7347 = vst [vmem:[#allocation42_spill] sm:$0xff] %v5796_v41  ;;  %v1473_v2 = vadd.f32 %v5431_v13, %v541_v10  ;;  %v5808_v41 = vpop.xlane.xlu0 %1258  ;;  %v5813_v18 = vpop.xlane.xlu1 %1254 }
 0x32e   : > { %7349 = vst [vmem:[#allocation44_spill] sm:$0xff] %v5808_v41 }
 0x32f   : > { %v1537_v45 = vmax.f32 %v1473_v2, 0.0  ;;  %7350 = vst [vmem:[#allocation45_spill] sm:$0xff] %v5813_v18  ;;  %v5819_v10 = vpop.f32.mrf.mxu3 }
 0x333   : > { %2648 = vperm.xlu1 %4569, %v5568_v58   ;;  %612 = vmatmul.f32.gmra.mxu0 %v4624_v55  ;;  %v1819_v55 = vmax.f32 %v1656_v8, 0.0 }
 0x334   : > { %1684 = vmatmul.f32.gmra.mxu2 %v1536_v22  ;;  %v5810_v22 = vpop.permute.xlu2 %2444 }
 0x335   : > { %1947 = vmatmul.f32.gmra.mxu3 %v1819_v55  ;;  %v5822_v28 = vpop.xlane.xlu1 %1260  ;;  %v895_v55 = vmul.f32 %v5611_v31, %v5611_v31 }
 0x336   : > { %2714 = vperm.xlu0 %4580, %v5568_v58   ;;  %7352 = vst [vmem:[#allocation47_spill] sm:$0xff] %v5822_v28  ;;  %v5835_v28 = vpop.f32.mrf.mxu1 }
 0x33b   : > { %4572 = vset.pattern.permute.xlu1 %v5202_v43 }
 0x33c   : > { %1687 = vmatmul.f32.gmra.mxu2 %v1537_v45  ;;  %v5817_v13 = vpop.xlane.xlu2 %945  ;;  %v1919_v45 = vadd.f32 %v5728_v35, %v1918_v50 }
 0x33d   : > { %1011 = vadd.xlane.f32.xlu2 %v1010_v0  ;;  %v5815_v0 = vpop.xlane.xlu0 %1264  ;;  %v5838_v50 = vpop.xlane.xlu1 %1266 }
 0x33e   : > { %4585 = vset.pattern.permute.xlu0 %v5227_v25  ;;  %7351 = vst [vmem:[#allocation46_spill] sm:$0xff] %v5815_v0  ;;  %v1658_v25 = vpop.f32.mrf.mxu2  ;;  %v5832_v0 = vpop.f32.mrf.mxu3 }
 0x33f   : > { %v1659_v2 = vadd.f32 %v5556_v42, %v1658_v25  ;;  %7355 = vst [vmem:[#allocation50_spill] sm:$0xff] %v5838_v50 }
 0x341   : > { %v1820_v41 = vmax.f32 %v1659_v2, 0.0  ;;  %v2102_v2 = vmax.f32 %v1919_v45, 0.0 }
 0x343   : > { %1950 = vmatmul.f32.gmra.mxu3 %v1820_v41  ;;  %v1016_v41 = vsel %vm931_vm0, %v895_v55, 0.0  ;;  %v5848_v55 = vpop.f32.mrf.mxu1 }
 0x344   : > { %v5827_v18 = vpop.xlane.xlu2 %948 }
 0x345   : > { %v5825_v54 = vpop.xlane.xlu0 %1270  ;;  %7354 = vst [vmem:[#allocation49_spill] sm:$0xff] %v5827_v18  ;;  %v5852_v50 = vpop.xlane.xlu1 %1272  ;;  %v4628_v18 = vld [vmem:[%s4835_s23 + $0x198] sm:$0xff] }
 0x346   : > { %7353 = vst [vmem:[#allocation48_spill] sm:$0xff] %v5825_v54  ;;  %v1661_v8 = vpop.f32.mrf.mxu2  ;;  %v2170_v54 = vmul.f32 %v5743_v60, %v2102_v2 }
 0x347   : > { %v1662_v25 = vadd.f32 %v5556_v42, %v1661_v8  ;;  %v906_v8 = vmul.f32 %v792_v29, %v792_v29  ;;  %7357 = vst [vmem:[#allocation52_spill] sm:$0xff] %v5852_v50 }
 0x349   : > { %v1821_v19 = vmax.f32 %v1662_v25, 0.0  ;;  %v1927_v25 = vpop.f32.mrf.mxu3  ;;  %v1049_v2 = vsel %vm931_vm0, %v906_v8, 0.0 }
 0x34b   : > { %1953 = vmatmul.f32.gmra.mxu3 %v1821_v19  ;;  %v1928_v19 = vadd.f32 %v5728_v35, %v1927_v25  ;;  %v801_v25 = vpop.f32.mrf.mxu1 }
 0x34c   : > { %v5841_v12 = vpop.permute.xlu2 %2450 }
 0x34d   : > { %v5844_v40 = vpop.xlane.xlu0 %1276  ;;  %v2105_v29 = vmax.f32 %v1928_v19, 0.0  ;;  %v5862_v50 = vpop.xlane.xlu1 %1278 }
 0x34e   : > { %v1664_v31 = vpop.f32.mrf.mxu2  ;;  %7356 = vst [vmem:[#allocation51_spill] sm:$0xff] %v5844_v40 }
 0x34f   : > { %v1665_v45 = vadd.f32 %v5556_v42, %v1664_v31  ;;  %7360 = vst [vmem:[#allocation55_spill] sm:$0xff] %v5862_v50 }
 0x351   : > { %v1822_v52 = vmax.f32 %v1665_v45, 0.0  ;;  %v2173_v45 = vmul.f32 %v5743_v60, %v2105_v29 }
 0x353   : > { %1956 = vmatmul.f32.gmra.mxu3 %v1822_v52 }
 0x354   : > { %v5854_v38 = vpop.permute.xlu2 %2462 }
 0x355   : > { %2660 = vperm.xlu2 %4571, %v5568_v58   ;;  %7358 = vst [vmem:[#allocation53_spill] sm:$0xff] %v5854_v38 }
 0x35c   : > { %v5864_v33 = vpop.xlane.xlu2 %957 }
 0x35d   : > { %4573 = vset.pattern.permute.xlu2 %v5266_v51  ;;  %1017 = vadd.xlane.f32.xlu1 %v1016_v41  ;;  %v1667_v41 = vpop.f32.mrf.mxu2  ;;  %7361 = vst [vmem:[#allocation56_spill] sm:$0xff] %v5864_v33 }
 0x35e   : > { %v1668_v31 = vadd.f32 %v5556_v42, %v1667_v41  ;;  %v909_v41 = vmul.f32 %v801_v25, %v801_v25 }
 0x360   : > { %2238 = vadd.xlane.f32.xlu0 %v2170_v54  ;;  %v5857_v54 = vpop.xlane.xlu0 %1282  ;;  %v1823_v52 = vmax.f32 %v1668_v31, 0.0  ;;  %v1058_v31 = vsel %vm931_vm0, %v909_v41, 0.0  ;;  %v896_v41 = vmul.f32 %v5617_v1, %v5617_v1  ;;  %v5902_v1 = vpop.f32.mrf.mxu1 }
 0x361   : > { %7359 = vst [vmem:[#allocation54_spill] sm:$0xff] %v5857_v54 }
 0x362   : > { %1959 = vmatmul.f32.gmra.mxu3 %v1823_v52  ;;  %v5872_v52 = vpop.xlane.xlu1 %1284 }
 0x363   : > { %7364 = vst [vmem:[#allocation59_spill] sm:$0xff] %v5872_v52 }
 0x364   : > { %v5870_v29 = vpop.permute.xlu2 %2480 }
 0x365   : > { %2672 = vperm.xlu2 %4573, %v5568_v58   ;;  %v1670_v40 = vpop.f32.mrf.mxu2  ;;  %7363 = vst [vmem:[#allocation58_spill] sm:$0xff] %v5870_v29 }
 0x366   : > { %v1671_v8 = vadd.f32 %v5556_v42, %v1670_v40 }
 0x368   : > { %1050 = vadd.xlane.f32.xlu0 %v1049_v2  ;;  %v1824_v2 = vmax.f32 %v1671_v8, 0.0  ;;  %v5866_v19 = vpop.xlane.xlu0 %1288  ;;  %v5881_v8 = vpop.f32.mrf.mxu3 }
 0x369   : > { %7362 = vst [vmem:[#allocation57_spill] sm:$0xff] %v5866_v19 }
 0x36a   : > { %1962 = vmatmul.f32.gmra.mxu3 %v1824_v2  ;;  %v5879_v25 = vpop.xlane.xlu1 %1290 }
 0x36b   : > { %7367 = vst [vmem:[#allocation62_spill] sm:$0xff] %v5879_v25 }
 0x36d   : > { %4576 = vset.pattern.permute.xlu2 %v5345_v5 }
 0x370   : > { %2244 = vadd.xlane.f32.xlu0 %v2173_v45  ;;  %v5874_v40 = vpop.xlane.xlu0 %1294  ;;  %v5877_v45 = vpop.permute.xlu2 %2492 }
 0x371   : > { %7365 = vst [vmem:[#allocation60_spill] sm:$0xff] %v5874_v40  ;;  %v1019_v40 = vsel %vm931_vm0, %v896_v41, 0.0  ;;  %v5897_v25 = vpop.f32.mrf.mxu3 }
 0x372   : > { %7366 = vst [vmem:[#allocation61_spill] sm:$0xff] %v5877_v45  ;;  %v5895_v54 = vpop.xlane.xlu1 %1296 }
 0x373   : > { %7370 = vst [vmem:[#allocation65_spill] sm:$0xff] %v5895_v54 }
 0x376   : > { %2666 = vperm.xlu1 %4572, %v5568_v58  }
 0x378   : > { %1059 = vadd.xlane.f32.xlu0 %v1058_v31  ;;  %v5883_v2 = vpop.xlane.xlu0 %1300  ;;  %v4625_v31 = vld [vmem:[%s5195_s27] sm:$0xf]  ;;  %v5893_v52 = vpop.xlane.xlu2 %966  ;;  %s4667_s27 = sshra.s32 %s4414_s16, 4  ;;  %s4668_s27 = int_to_ptr.hbm [resolvable:$true] %s4667_s27 }
 0x379   : > { %7368 = vst [vmem:[#allocation63_spill] sm:$0xff] %v5883_v2  ;;  %v5889_v19 = vperm.slane %v4625_v31, 3  ;;  %v1936_v50 = vpop.f32.mrf.mxu3  ;;  %s4669_s17 = scalar_lea.hbm %s4668_s27, 4  ;;  %p4674_p1 = scmp.lt.s32.totalorder %s4668_s27, %s7251_s9 }
 0x37a   : > { %7369 = vst [vmem:[#allocation64_spill] sm:$0xff] %v5893_v52  ;;  %v5907_v41 = vpop.xlane.xlu1 %1302  ;;  %v5911_v52 = vpop.f32.mrf.mxu1  ;;  %p4670_p12 = scmp.ne.s32.totalorder %s4668_s27, %s4669_s17  ;;  %p4675_p2 = scmp.lt.s32.totalorder %s4673_s13, %s4669_s17 }
 0x37b   : > { %7373 = vst [vmem:[#allocation68_spill] sm:$0xff] %v5907_v41 }
 0x37c   : > { %p4671_p13 = pnand %p4670_p12, %p4806_p5  ;;  %p4676_p3 = por %p4675_p2, %p4674_p1 }
 0x37e   : > { %4574 = vset.pattern.permute.xlu1 %v5313_v63  ;;  %p4672_p0 = pneg %p4671_p13 }
 0x380   : > { %v5900_v2 = vpop.xlane.xlu0 %1306  ;;  %v5905_v31 = vpop.permute.xlu2 %2510  ;;  %p4677_p4 = pnand %p4676_p3, %p4672_p0 }
 0x381   : > { %7371 = vst [vmem:[#allocation66_spill] sm:$0xff] %v5900_v2  ;;  %v5918_v53 = vpop.f32.mrf.mxu3 }
 0x382   : > { %7372 = vst [vmem:[#allocation67_spill] sm:$0xff] %v5905_v31  ;;  %v5916_v2 = vpop.xlane.xlu1 %1308  ;;  %v810_v41 = vpop.f32.mrf.mxu1 }
 0x383   : > { %7375 = vst [vmem:[#allocation70_spill] sm:$0xff] %v5916_v2 }
 0x384   : > { %7376 = vst [vmem:[#allocation71_spill] sm:$0xff] %v5918_v53 }
 0x386   : > { %2678 = vperm.xlu1 %4574, %v5568_v58  }
 0x388   : > { %v5909_v36 = vpop.xlane.xlu0 %933  ;;  %v5914_v45 = vpop.permute.xlu2 %2522 }
 0x389   : > { %7374 = vst [vmem:[#allocation69_spill] sm:$0xff] %v5914_v45  ;;  %v5933_v53 = vpop.f32.mrf.mxu3 }
 0x38c   : > { %2744 = vperm.xlu0 %4585, %v5889_v19  }
 0x38e   : > { %1020 = vadd.xlane.f32.xlu2 %v1019_v40  ;;  %4577 = vset.pattern.permute.xlu1 %v7306_v23 }
 0x390   : > { %v5920_v31 = vpop.xlane.xlu0 %936  ;;  %v5924_v39 = vpop.xlane.xlu2 %975 }
 0x391   : > { %7377 = vst [vmem:[#allocation72_spill] sm:$0xff] %v5924_v39 }
 0x394   : > { %4590 = vset.pattern.permute.xlu0 %v5313_v63 }
 0x397   : > { %v1673_v40 = vpop.f32.mrf.mxu2 }
 0x398   : > { %v1674_v54 = vadd.f32 %v5556_v42, %v1673_v40  ;;  %v5929_v40 = vpop.xlane.xlu1 %1314  ;;  %v5931_v45 = vpop.xlane.xlu0 %1312 }
 0x399   : > { %7378 = vst [vmem:[#allocation73_spill] sm:$0xff] %v5929_v40  ;;  %v5940_v39 = vpop.permute.xlu2 %2540  ;;  %v544_v40 = vpop.f32.mrf.mxu0  ;;  %615 = vmatmul.f32.gmra.mxu0 %v4626_v6 }
 0x39a   : > { %v1825_v57 = vmax.f32 %v1674_v54, 0.0  ;;  %v898_v54 = vmul.f32 %v5648_v26, %v5648_v26  ;;  %7379 = vst [vmem:[#allocation74_spill] sm:$0xff] %v5931_v45 }
 0x39b   : > { %7381 = vst [vmem:[#allocation76_spill] sm:$0xff] %v5940_v39 }
 0x39c   : > { %1965 = vmatmul.f32.gmra.mxu3 %v1825_v57  ;;  %v1937_v57 = vadd.f32 %v5728_v35, %v1936_v50 }
 0x39e   : > { %v2108_v47 = vmax.f32 %v1937_v57, 0.0 }
 0x39f   : > { %v1676_v63 = vpop.f32.mrf.mxu2 }
 0x3a0   : > { %v1677_v29 = vadd.f32 %v5556_v42, %v1676_v63  ;;  %v2176_v50 = vmul.f32 %v5743_v60, %v2108_v47  ;;  %v5954_v47 = vpop.xlane.xlu0 %951 }
 0x3a1   : > { %7382 = vst [vmem:[#allocation77_spill] sm:$0xff] %v5954_v47  ;;  %v547_v38 = vpop.f32.mrf.mxu0  ;;  %618 = vmatmul.f32.gmra.mxu0 %v4628_v18 }
 0x3a2   : > { %v1826_v33 = vmax.f32 %v1677_v29, 0.0  ;;  %v5938_v29 = vpop.f32.mrf.mxu1 }
 0x3a3   : > { %7380 = vst [vmem:[#allocation75_spill] sm:$0xff] %v5938_v29  ;;  %v5959_v29 = vpop.permute.xlu2 %2552 }
 0x3a4   : > { %1968 = vmatmul.f32.gmra.mxu3 %v1826_v33  ;;  %v1025_v33 = vsel %vm931_vm0, %v898_v54, 0.0  ;;  %7383 = vst [vmem:[#allocation78_spill] sm:$0xff] %v5959_v29 }
 0x3a6   : > { %2690 = vperm.xlu2 %4576, %v5568_v58  }
 0x3a7   : > { %v1679_v2 = vpop.f32.mrf.mxu2 }
 0x3a8   : > { %v1680_v63 = vadd.f32 %v5556_v42, %v1679_v2  ;;  %v5947_v2 = vld [vmem:[%s7245_s3] ss:$0 sm:$0xff] }
 0x3a9   : > { %v1474_v54 = vadd.f32 %v5947_v2, %v544_v40  ;;  %v550_v29 = vpop.f32.mrf.mxu0 }
 0x3aa   : > { %v1827_v26 = vmax.f32 %v1680_v63, 0.0  ;;  %v5951_v63 = vpop.xlane.xlu1 %939 }
 0x3ab   : > { %v1538_v6 = vmax.f32 %v1474_v54, 0.0 }
 0x3ac   : > { %1971 = vmatmul.f32.gmra.mxu3 %v1827_v26  ;;  %v1945_v26 = vpop.f32.mrf.mxu3 }
 0x3ad   : > { %1690 = vmatmul.f32.gmra.mxu2 %v1538_v6  ;;  %v1946_v40 = vadd.f32 %v5728_v35, %v1945_v26 }
 0x3ae   : > { %4578 = vset.pattern.permute.xlu2 %v5350_v16  ;;  %v5956_v16 = vpop.f32.mrf.mxu1 }
 0x3af   : > { %v1682_v45 = vpop.f32.mrf.mxu2  ;;  %v2111_v54 = vmax.f32 %v1946_v40, 0.0  ;;  %v1476_v40 = vadd.f32 %v5947_v2, %v550_v29 }
 0x3b0   : > { %1026 = vadd.xlane.f32.xlu1 %v1025_v33  ;;  %v1683_v57 = vadd.f32 %v5556_v42, %v1682_v45  ;;  %v912_v33 = vmul.f32 %v810_v41, %v810_v41  ;;  %v1475_v41 = vadd.f32 %v5947_v2, %v547_v38  ;;  %v4629_v38 = vld [vmem:[%s4835_s23 + $0x1a0] sm:$0xff] }
 0x3b1   : > { %621 = vmatmul.f32.gmra.mxu0 %v4629_v38 }
 0x3b2   : > { %v1828_v39 = vmax.f32 %v1683_v57, 0.0  ;;  %v1067_v45 = vsel %vm931_vm0, %v912_v33, 0.0  ;;  %v1539_v57 = vmax.f32 %v1475_v41, 0.0  ;;  %v5968_v6 = vpop.xlane.xlu1 %942  ;;  %v2179_v33 = vmul.f32 %v5743_v60, %v2111_v54 }
 0x3b3   : > { %v1540_v41 = vmax.f32 %v1476_v40, 0.0  ;;  %v1907_v40 = vadd.f32 %v5728_v35, %v5711_v21 }
 0x3b4   : > { %1974 = vmatmul.f32.gmra.mxu3 %v1828_v39  ;;  %v5966_v39 = vpop.permute.xlu0 %2474 }
 0x3b5   : > { %7384 = vst [vmem:[#allocation79_spill] sm:$0xff] %v5966_v39  ;;  %1693 = vmatmul.f32.gmra.mxu2 %v1539_v57 }
 0x3b6   : > { %2702 = vperm.xlu2 %4578, %v5568_v58   ;;  %2250 = vadd.xlane.f32.xlu0 %v2176_v50  ;;  %v819_v18 = vpop.f32.mrf.mxu1 }
 0x3b7   : > { %v1685_v5 = vpop.f32.mrf.mxu2 }
 0x3b8   : > { %v1686_v50 = vadd.f32 %v5556_v42, %v1685_v5  ;;  %v5972_v5 = vpop.xlane.xlu2 %984 }
 0x3b9   : > { %7385 = vst [vmem:[#allocation80_spill] sm:$0xff] %v5972_v5 }
 0x3ba   : > { %v1829_v26 = vmax.f32 %v1686_v50, 0.0  ;;  %v5976_v39 = vpop.permute.xlu1 %2438 }
 0x3bc   : > { %1977 = vmatmul.f32.gmra.mxu3 %v1829_v26  ;;  %v5978_v57 = vpop.xlane.xlu0 %960 }
 0x3bd   : > { %1696 = vmatmul.f32.gmra.mxu2 %v1540_v41  ;;  %v2098_v41 = vmax.f32 %v1907_v40, 0.0 }
 0x3be   : > { %1068 = vadd.xlane.f32.xlu0 %v1067_v45  ;;  %4581 = vset.pattern.permute.xlu2 %v5163_v44  ;;  %v915_v45 = vmul.f32 %v819_v18, %v819_v18  ;;  %v899_v18 = vmul.f32 %v5662_v9, %v5662_v9  ;;  %v6018_v40 = vpop.f32.mrf.mxu1 }
 0x3bf   : > { %v1688_v47 = vpop.f32.mrf.mxu2  ;;  %v2166_v9 = vmul.f32 %v5743_v60, %v2098_v41  ;;  %7393 = vst [vmem:[#allocation88_spill] sm:$0xff] %v6018_v40 }
 0x3c0   : > { %v1689_v44 = vadd.f32 %v5556_v42, %v1688_v47  ;;  %v1076_v54 = vsel %vm931_vm0, %v915_v45, 0.0  ;;  %v5982_v26 = vpop.permute.xlu2 %2570  ;;  %v1028_v45 = vsel %vm931_vm0, %v899_v18, 0.0  ;;  %v902_v18 = vmul.f32 %v5700_v17, %v5700_v17 }
 0x3c1   : > { %7386 = vst [vmem:[#allocation81_spill] sm:$0xff] %v5982_v26 }
 0x3c2   : > { %v1830_v50 = vmax.f32 %v1689_v44, 0.0  ;;  %v5984_v29 = vpop.xlane.xlu1 %954  ;;  %v6000_v44 = vpop.f32.mrf.mxu3 }
 0x3c3   : > { %7390 = vst [vmem:[#allocation85_spill] sm:$0xff] %v6000_v44 }
 0x3c4   : > { %1980 = vmatmul.f32.gmra.mxu3 %v1830_v50  ;;  %v5986_v42 = vpop.permute.xlu0 %2504 }
 0x3c5   : > { %7387 = vst [vmem:[#allocation82_spill] sm:$0xff] %v5986_v42 }
 0x3c6   : > { %2256 = vadd.xlane.f32.xlu0 %v2179_v33 }
 0x3c8   : > { %v5989_v47 = vpop.permute.xlu2 %2582 }
 0x3c9   : > { %2696 = vperm.xlu1 %4577, %v5568_v58   ;;  %7388 = vst [vmem:[#allocation83_spill] sm:$0xff] %v5989_v47 }
 0x3ca   : > { %v5991_v33 = vpop.permute.xlu1 %2456  ;;  %v6012_v47 = vpop.f32.mrf.mxu3 }
 0x3cc   : > { %v5996_v38 = vpop.xlane.xlu0 %969 }
 0x3cd   : > { %7389 = vst [vmem:[#allocation84_spill] sm:$0xff] %v5996_v38 }
 0x3ce   : > { %1077 = vadd.xlane.f32.xlu0 %v1076_v54 }
 0x3d0   : > { %v6005_v54 = vpop.xlane.xlu2 %993 }
 0x3d1   : > { %4579 = vset.pattern.permute.xlu1 %v5365_v4  ;;  %7391 = vst [vmem:[#allocation86_spill] sm:$0xff] %v6005_v54 }
 0x3d2   : > { %v6003_v50 = vpop.permute.xlu1 %2468  ;;  %v1954_v41 = vpop.f32.mrf.mxu3 }
 0x3d3   : > { %v1955_v38 = vadd.f32 %v5728_v35, %v1954_v41 }
 0x3d9   : > { %2708 = vperm.xlu1 %4579, %v5568_v58   ;;  %v6009_v58 = vpop.permute.xlu0 %2534 }
 0x3da   : > { %7392 = vst [vmem:[#allocation87_spill] sm:$0xff] %v6009_v58  ;;  %v6014_v21 = vpop.xlane.xlu1 %963  ;;  %v6036_v42 = vpop.f32.mrf.mxu3 }
 0x3db   : > { %7399 = vst [vmem:[#allocation94_spill] sm:$0xff] %v6036_v42 }
 0x3df   : > { %1029 = vadd.xlane.f32.xlu2 %v1028_v45  ;;  %v6020_v45 = vpop.permute.xlu2 %2600 }
 0x3e0   : > { %7394 = vst [vmem:[#allocation89_spill] sm:$0xff] %v6020_v45 }
 0x3e1   : > { %4582 = vset.pattern.permute.xlu1 %v7319_v37  ;;  %v1037_v37 = vsel %vm931_vm0, %v902_v18, 0.0  ;;  %v6024_v26 = vpop.xlane.xlu0 %978 }
 0x3e2   : > { %2774 = vperm.xlu0 %4590, %v5889_v19   ;;  %7395 = vst [vmem:[#allocation90_spill] sm:$0xff] %v6024_v26  ;;  %v6026_v54 = vpop.permute.xlu1 %2486 }
 0x3e5   : > { %v6048_v40 = vpop.f32.mrf.mxu3 }
 0x3e7   : > { %2230 = vadd.xlane.f32.xlu2 %v2166_v9  ;;  %v6028_v9 = vpop.f32.mrf.mxu1  ;;  %v6030_v58 = vpop.permute.xlu2 %2612 }
 0x3e8   : > { %7396 = vst [vmem:[#allocation91_spill] sm:$0xff] %v6030_v58 }
 0x3e9   : > { %v6032_v5 = vpop.permute.xlu0 %2564 }
 0x3ea   : > { %4595 = vset.pattern.permute.xlu0 %v5365_v4  ;;  %7397 = vst [vmem:[#allocation92_spill] sm:$0xff] %v6032_v5  ;;  %v6034_v17 = vpop.permute.xlu1 %2498  ;;  %v901_v4 = vmul.f32 %v5689_v32, %v5689_v32  ;;  %v2114_v5 = vmax.f32 %v1955_v38, 0.0 }
 0x3eb   : > { %7398 = vst [vmem:[#allocation93_spill] sm:$0xff] %v6034_v17 }
 0x3ec   : > { %v1034_v58 = vsel %vm931_vm0, %v901_v4, 0.0 }
 0x3ef   : > { %1038 = vadd.xlane.f32.xlu2 %v1037_v37  ;;  %v828_v45 = vpop.f32.mrf.mxu1  ;;  %v6040_v18 = vpop.xlane.xlu2 %1002 }
 0x3f0   : > { %7400 = vst [vmem:[#allocation95_spill] sm:$0xff] %v6040_v18  ;;  %v2182_v18 = vmul.f32 %v5743_v60, %v2114_v5  ;;  %v918_v41 = vmul.f32 %v828_v45, %v828_v45 }
 0x3f1   : > { %v6042_v37 = vpop.xlane.xlu0 %987 }
 0x3f2   : > { %7401 = vst [vmem:[#allocation96_spill] sm:$0xff] %v6042_v37  ;;  %v6044_v26 = vpop.xlane.xlu1 %972  ;;  %v1963_v37 = vpop.f32.mrf.mxu3 }
 0x3f7   : > { %v6050_v17 = vpop.permute.xlu2 %2630  ;;  %v6052_v42 = vpop.f32.mrf.mxu1 }
 0x3f8   : > { %7402 = vst [vmem:[#allocation97_spill] sm:$0xff] %v6050_v17 }
 0x3f9   : > { %7403 = vst [vmem:[#allocation98_spill] sm:$0xff] %v6052_v42  ;;  %v6054_v44 = vpop.permute.xlu0 %2594  ;;  %v1085_v42 = vsel %vm931_vm0, %v918_v41, 0.0 }
 0x3fa   : > { %7404 = vst [vmem:[#allocation99_spill] sm:$0xff] %v6054_v44  ;;  %v6057_v32 = vpop.permute.xlu1 %2516 }
 0x3fb   : > { %7405 = vst [vmem:[#allocation100_spill] sm:$0xff] %v6057_v32 }
 0x3ff   : > { %v6060_v4 = vpop.permute.xlu2 %2642  ;;  %v6066_v17 = vpop.f32.mrf.mxu1 }
 0x400   : > { %7406 = vst [vmem:[#allocation101_spill] sm:$0xff] %v6060_v4 }
 0x401   : > { %v6068_v44 = vpop.xlane.xlu0 %996 }
 0x402   : > { %v6063_v38 = vpop.permute.xlu1 %2528  ;;  %7408 = vst [vmem:[#allocation103_spill] sm:$0xff] %v6068_v44 }
 0x403   : > { %1035 = vadd.xlane.f32.xlu1 %v1034_v58  ;;  %7407 = vst [vmem:[#allocation102_spill] sm:$0xff] %v6063_v38  ;;  %v1964_v58 = vadd.f32 %v5728_v35, %v1963_v37 }
 0x405   : > { %v2117_v32 = vmax.f32 %v1964_v58, 0.0 }
 0x407   : > { %2720 = vperm.xlu2 %4581, %v5889_v19   ;;  %v2185_v45 = vmul.f32 %v5743_v60, %v2117_v32  ;;  %v837_v4 = vpop.f32.mrf.mxu1 }
 0x408   : > { %v921_v37 = vmul.f32 %v837_v4, %v837_v4 }
 0x40a   : > { %v6072_v5 = vpop.xlane.xlu1 %981  ;;  %v1094_v58 = vsel %vm931_vm0, %v921_v37, 0.0 }
 0x40b   : > { %7409 = vst [vmem:[#allocation104_spill] sm:$0xff] %v6072_v5 }
 0x40c   : > { %2262 = vadd.xlane.f32.xlu0 %v2182_v18  ;;  %v6075_v18 = vpop.permute.xlu0 %2432 }
 0x40f   : > { %4583 = vset.pattern.permute.xlu2 %v5167_v56  ;;  %v6077_v56 = vpop.xlane.xlu2 %1011 }
 0x410   : > { %7410 = vst [vmem:[#allocation105_spill] sm:$0xff] %v6077_v56 }
 0x412   : > { %v6081_v41 = vpop.permute.xlu1 %2546 }
 0x413   : > { %7411 = vst [vmem:[#allocation106_spill] sm:$0xff] %v6081_v41 }
 0x414   : > { %1086 = vadd.xlane.f32.xlu0 %v1085_v42  ;;  %v6086_v44 = vpop.xlane.xlu0 %1005 }
 0x415   : > { %7413 = vst [vmem:[#allocation108_spill] sm:$0xff] %v6086_v44 }
 0x417   : > { %2732 = vperm.xlu2 %4583, %v5889_v19   ;;  %v6083_v42 = vpop.permute.xlu2 %2660 }
 0x418   : > { %7412 = vst [vmem:[#allocation107_spill] sm:$0xff] %v6083_v42  ;;  %v1916_v42 = vadd.f32 %v5728_v35, %v5798_v34  ;;  %v6117_v34 = vpop.f32.mrf.mxu1 }
 0x419   : > { %7424 = vst [vmem:[#allocation119_spill] sm:$0xff] %v6117_v34 }
 0x41a   : > { %v6089_v32 = vpop.permute.xlu1 %2558 }
 0x41b   : > { %7414 = vst [vmem:[#allocation109_spill] sm:$0xff] %v6089_v32 }
 0x41c   : > { %2268 = vadd.xlane.f32.xlu0 %v2185_v45  ;;  %2726 = vperm.xlu1 %4582, %v5889_v19   ;;  %v6091_v56 = vpop.permute.xlu0 %2624 }
 0x41d   : > { %7415 = vst [vmem:[#allocation110_spill] sm:$0xff] %v6091_v56  ;;  %v1913_v56 = vadd.f32 %v5728_v35, %v5781_v46  ;;  %v1925_v46 = vadd.f32 %v5728_v35, %v5832_v0  ;;  %v6140_v0 = vld [vmem:[%s7247_s5] ss:$0 sm:$0xff] }
 0x41f   : > { %4586 = vset.pattern.permute.xlu2 %v5241_v11  ;;  %v6093_v45 = vpop.permute.xlu2 %2672  ;;  %v6097_v11 = vpop.f32.mrf.mxu3 }
 0x420   : > { %7416 = vst [vmem:[#allocation111_spill] sm:$0xff] %v6093_v45 }
 0x421   : > { %7418 = vst [vmem:[#allocation113_spill] sm:$0xff] %v6097_v11 }
 0x422   : > { %v6095_v4 = vpop.xlane.xlu1 %990 }
 0x423   : > { %7417 = vst [vmem:[#allocation112_spill] sm:$0xff] %v6095_v4 }
 0x424   : > { %1095 = vadd.xlane.f32.xlu0 %v1094_v58  ;;  %4584 = vset.pattern.permute.xlu1 %v5217_v30  ;;  %v6101_v41 = vpop.xlane.xlu0 %1014  ;;  %v2101_v58 = vmax.f32 %v1916_v42, 0.0 }
 0x425   : > { %7419 = vst [vmem:[#allocation114_spill] sm:$0xff] %v6101_v41  ;;  %v2100_v41 = vmax.f32 %v1913_v56, 0.0  ;;  %v2104_v56 = vmax.f32 %v1925_v46, 0.0  ;;  %v4631_v46 = vld [vmem:[%s4835_s23 + $0x1a8] sm:$0xff] }
 0x426   : > { %v2169_v44 = vmul.f32 %v5743_v60, %v2101_v58 }
 0x427   : > { %v6103_v37 = vpop.xlane.xlu2 %1020  ;;  %v6110_v45 = vpop.f32.mrf.mxu3 }
 0x428   : > { %7420 = vst [vmem:[#allocation115_spill] sm:$0xff] %v6103_v37  ;;  %v905_v37 = vmul.f32 %v5783_v27, %v5783_v27  ;;  %v6133_v27 = vpop.f32.mrf.mxu1 }
 0x42a   : > { %v6106_v30 = vpop.permute.xlu1 %2576  ;;  %v1046_v58 = vsel %vm931_vm0, %v905_v37, 0.0 }
 0x42b   : > { %7421 = vst [vmem:[#allocation116_spill] sm:$0xff] %v6106_v30  ;;  %v2168_v30 = vmul.f32 %v5743_v60, %v2100_v41 }
 0x42c   : > { %v6113_v32 = vpop.permute.xlu0 %2654 }
 0x42d   : > { %7422 = vst [vmem:[#allocation117_spill] sm:$0xff] %v6113_v32 }
 0x42f   : > { %v6115_v4 = vpop.permute.xlu2 %2690  ;;  %v1972_v38 = vpop.f32.mrf.mxu3 }
 0x430   : > { %7423 = vst [vmem:[#allocation118_spill] sm:$0xff] %v6115_v4  ;;  %v1691_v41 = vpop.f32.mrf.mxu2 }
 0x431   : > { %v1692_v37 = vadd.f32 %v6140_v0, %v1691_v41 }
 0x432   : > { %v6119_v42 = vpop.permute.xlu1 %2588 }
 0x433   : > { %7425 = vst [vmem:[#allocation120_spill] sm:$0xff] %v6119_v42 }
 0x434   : > { %v6127_v32 = vpop.xlane.xlu0 %1023 }
 0x435   : > { %7426 = vst [vmem:[#allocation121_spill] sm:$0xff] %v6127_v32  ;;  %v2172_v32 = vmul.f32 %v5743_v60, %v2104_v56 }
 0x437   : > { %v6129_v4 = vpop.permute.xlu2 %2702 }
 0x438   : > { %2804 = vperm.xlu0 %4595, %v5889_v19   ;;  %7427 = vst [vmem:[#allocation122_spill] sm:$0xff] %v6129_v4  ;;  %v1694_v11 = vpop.f32.mrf.mxu2 }
 0x43a   : > { %v6135_v42 = vpop.xlane.xlu1 %999 }
 0x43b   : > { %7428 = vst [vmem:[#allocation123_spill] sm:$0xff] %v6135_v42  ;;  %v6148_v42 = vpop.f32.mrf.mxu3 }
 0x43c   : > { %7430 = vst [vmem:[#allocation125_spill] sm:$0xff] %v6148_v42  ;;  %v4632_v42 = vld [vmem:[%s4835_s23 + $0x1b0] sm:$0xff] }
 0x440   : > { %2236 = vadd.xlane.f32.xlu2 %v2169_v44  ;;  %v904_v44 = vmul.f32 %v5771_v61, %v5771_v61  ;;  %v553_v61 = vpop.f32.mrf.mxu0  ;;  %624 = vmatmul.f32.gmra.mxu0 %v4631_v46  ;;  %v846_v46 = vpop.f32.mrf.mxu1 }
 0x441   : > { %v1477_v34 = vadd.f32 %v5947_v2, %v553_v61 }
 0x442   : > { %v1043_v4 = vsel %vm931_vm0, %v904_v44, 0.0  ;;  %v6151_v41 = vpop.permute.xlu1 %2606  ;;  %v908_v44 = vmul.f32 %v5848_v55, %v5848_v55 }
 0x443   : > { %7431 = vst [vmem:[#allocation126_spill] sm:$0xff] %v6151_v41  ;;  %v1541_v56 = vmax.f32 %v1477_v34, 0.0 }
 0x444   : > { %v1055_v61 = vsel %vm931_vm0, %v908_v44, 0.0 }
 0x445   : > { %1699 = vmatmul.f32.gmra.mxu2 %v1541_v56 }
 0x446   : > { %2234 = vadd.xlane.f32.xlu1 %v2168_v30  ;;  %v1831_v30 = vmax.f32 %v1692_v37, 0.0  ;;  %v1695_v37 = vadd.f32 %v6140_v0, %v1694_v11  ;;  %v1697_v11 = vpop.f32.mrf.mxu2 }
 0x448   : > { %1047 = vadd.xlane.f32.xlu2 %v1046_v58  ;;  %1983 = vmatmul.f32.gmra.mxu3 %v1831_v30  ;;  %v6146_v58 = vpop.permute.xlu0 %2684  ;;  %v556_v41 = vpop.f32.mrf.mxu0 }
 0x449   : > { %7429 = vst [vmem:[#allocation124_spill] sm:$0xff] %v6146_v58  ;;  %v1832_v58 = vmax.f32 %v1695_v37, 0.0  ;;  %627 = vmatmul.f32.gmra.mxu0 %v4632_v42  ;;  %v1478_v55 = vadd.f32 %v5947_v2, %v556_v41  ;;  %v6166_v37 = vpop.f32.mrf.mxu3  ;;  %v6171_v42 = vpop.f32.mrf.mxu1 }
 0x44a   : > { %7435 = vst [vmem:[#allocation130_spill] sm:$0xff] %v6171_v42 }
 0x44b   : > { %v1542_v56 = vmax.f32 %v1478_v55, 0.0 }
 0x44d   : > { %1702 = vmatmul.f32.gmra.mxu2 %v1542_v56 }
 0x44e   : > { %1044 = vadd.xlane.f32.xlu1 %v1043_v4  ;;  %v1316_v4 = vsub.f32 %v5909_v36, %v5665_v59  ;;  %v1698_v59 = vadd.f32 %v6140_v0, %v1697_v11  ;;  %v6169_v36 = vpop.permute.xlu1 %2618 }
 0x44f   : > { %7434 = vst [vmem:[#allocation129_spill] sm:$0xff] %v6169_v36 }
 0x450   : > { %2242 = vadd.xlane.f32.xlu2 %v2172_v32  ;;  %1986 = vmatmul.f32.gmra.mxu3 %v1832_v58  ;;  %v1973_v32 = vadd.f32 %v5728_v35, %v1972_v38  ;;  %v1380_v34 = vmul.f32 0.03125, %v1316_v4  ;;  %v1833_v5 = vmax.f32 %v1698_v59, 0.0 }
 0x452   : > { %v6156_v30 = vpop.xlane.xlu2 %1029  ;;  %v2120_v58 = vmax.f32 %v1973_v32, 0.0  ;;  %v1317_v32 = vsub.f32 %v5920_v31, %v5578_v14 }
 0x453   : > { %7432 = vst [vmem:[#allocation127_spill] sm:$0xff] %v6156_v30  ;;  %v6164_v30 = vpop.xlane.xlu0 %1032 }
 0x454   : > { %7433 = vst [vmem:[#allocation128_spill] sm:$0xff] %v6164_v30  ;;  %v2188_v4 = vmul.f32 %v5743_v60, %v2120_v58  ;;  %v1381_v42 = vmul.f32 0.03125, %v1317_v32 }
 0x458   : > { %1056 = vadd.xlane.f32.xlu2 %v1055_v61  ;;  %1989 = vmatmul.f32.gmra.mxu3 %v1833_v5  ;;  %v559_v61 = vpop.f32.mrf.mxu0 }
 0x459   : > { %630 = vmatmul.f32.gmra.mxu0 %v5651_v48  ;;  %v1479_v56 = vadd.f32 %v5947_v2, %v559_v61  ;;  %v924_v48 = vmul.f32 %v846_v46, %v846_v46  ;;  %v6182_v61 = vpop.f32.mrf.mxu1 }
 0x45a   : > { %v2231_v44 = vpop.xlane.xlu2 %2230 }
 0x45b   : > { %v2358_v38 = vadd.f32 %v2231_v44, %v1380_v34  ;;  %v6179_v44 = vpop.xlane.xlu1 %1008  ;;  %v1543_v36 = vmax.f32 %v1479_v56, 0.0 }
 0x45d   : > { %v2876_v41 = vadd.f32 %v6075_v18, %v2358_v38  ;;  %v2233_v18 = vpop.xlane.xlu0 %2232  ;;  %v1981_v38 = vpop.f32.mrf.mxu3  ;;  %1705 = vmatmul.f32.gmra.mxu2 %v1543_v36 }
 0x45e   : > { %v2359_v14 = vadd.f32 %v2233_v18, %v1381_v42  ;;  %v1982_v31 = vadd.f32 %v5728_v35, %v1981_v38 }
 0x45f   : > { %v3004_v55 = vrot.slane %v2876_v41, 1  ;;  %v3005_v30 = vrot.slane %v2876_v41, 2  ;;  %v3006_v11 = vrot.slane %v2876_v41, 3  ;;  %3452 = vst [vmem:[#allocation1] ss:$9 sm:$0xff] %v2876_v41  ;;  %v3007_v34 = vrot.slane %v2876_v41, 4 }
 0x460   : > { %v3008_v59 = vrot.slane %v2876_v41, 5  ;;  %v3009_v5 = vrot.slane %v2876_v41, 6  ;;  %v3010_v58 = vrot.slane %v2876_v41, 7  ;;  %v2877_v41 = vadd.f32 %v5976_v39, %v2359_v14 }
 0x461   : > { %3454 = vst [vmem:[#allocation1 + $0x1] ss:$9 sm:$0xff] %v3004_v55  ;;  %v1922_v14 = vadd.f32 %v5728_v35, %v5819_v10  ;;  %v1934_v10 = vadd.f32 %v5728_v35, %v5897_v25 }
 0x462   : > { %3456 = vst [vmem:[#allocation1 + $0x2] ss:$9 sm:$0xff] %v3005_v30  ;;  %2274 = vadd.xlane.f32.xlu0 %v2188_v4  ;;  %v1103_v30 = vsel %vm931_vm0, %v924_v48, 0.0  ;;  %v2123_v4 = vmax.f32 %v1982_v31, 0.0  ;;  %v3011_v55 = vrot.slane %v2877_v41, 1  ;;  %v3012_v42 = vrot.slane %v2877_v41, 2 }
 0x463   : > { %3458 = vst [vmem:[#allocation1 + $0x3] ss:$9 sm:$0xff] %v3006_v11  ;;  %v6187_v46 = vpop.permute.xlu1 %2636  ;;  %v3013_v32 = vrot.slane %v2877_v41, 3  ;;  %v3015_v39 = vrot.slane %v2877_v41, 5  ;;  %v2103_v31 = vmax.f32 %v1922_v14, 0.0 }
 0x464   : > { %3460 = vst [vmem:[#allocation1 + $0x4] ss:$9 sm:$0xff] %v3007_v34  ;;  %v2191_v36 = vmul.f32 %v5743_v60, %v2123_v4  ;;  %v855_v34 = vpop.f32.mrf.mxu1 }
 0x465   : > { %3462 = vst [vmem:[#allocation1 + $0x5] ss:$9 sm:$0xff] %v3008_v59  ;;  %v3014_v59 = vrot.slane %v2877_v41, 4  ;;  %v927_v18 = vmul.f32 %v855_v34, %v855_v34  ;;  %v6221_v34 = vpop.xlane.xlu2 %1038 }
 0x466   : > { %3464 = vst [vmem:[#allocation1 + $0x6] ss:$9 sm:$0xff] %v3009_v5  ;;  %v3016_v5 = vrot.slane %v2877_v41, 6 }
 0x467   : > { %3466 = vst [vmem:[#allocation1 + $0x7] ss:$9 sm:$0xff] %v3010_v58  ;;  %2738 = vperm.xlu1 %4584, %v5889_v19   ;;  %v3017_v58 = vrot.slane %v2877_v41, 7  ;;  %v1112_v48 = vsel %vm931_vm0, %v927_v18, 0.0 }
 0x46a   : > { %1104 = vadd.xlane.f32.xlu0 %v1103_v30 }
 0x46b   : > { %v6194_v56 = vpop.permute.xlu1 %2648 }
 0x46e   : > { %v6189_v11 = vld [vmem:[#allocation1] sm:$0xff] }
 0x46f   : > { %3468 = vst [vmem:[#allocation1] ss:$9 sm:$0xff] %v2877_v41  ;;  %4587 = vset.pattern.permute.xlu1 %v5251_v3  ;;  %v2171_v41 = vmul.f32 %v5743_v60, %v2103_v31 }
 0x470   : > { %3469 = vst [vmem:[#allocation1 + $0x1] ss:$9 sm:$0xff] %v3011_v55  ;;  %2750 = vperm.xlu2 %4586, %v5889_v19  }
 0x471   : > { %3470 = vst [vmem:[#allocation1 + $0x2] ss:$9 sm:$0xff] %v3012_v42 }
 0x472   : > { %3471 = vst [vmem:[#allocation1 + $0x3] ss:$9 sm:$0xff] %v3013_v32  ;;  %2280 = vadd.xlane.f32.xlu0 %v2191_v36 }
 0x473   : > { %3472 = vst [vmem:[#allocation1 + $0x4] ss:$9 sm:$0xff] %v3014_v59  ;;  %v6198_v38 = vpop.xlane.xlu1 %1017  ;;  %v911_v59 = vmul.f32 %v5911_v52, %v5911_v52  ;;  %v1318_v52 = vsub.f32 %v5951_v63, %v5656_v24  ;;  %v6252_v24 = vpop.xlane.xlu0 %1041 }
 0x474   : > { %3473 = vst [vmem:[#allocation1 + $0x5] ss:$9 sm:$0xff] %v3015_v39  ;;  %v6230_v39 = vld [vmem:[%s7249_s7] ss:$0 sm:$0xff] }
 0x475   : > { %3474 = vst [vmem:[#allocation1 + $0x6] ss:$9 sm:$0xff] %v3016_v5  ;;  %v1943_v35 = vadd.f32 %v6230_v39, %v5933_v53  ;;  %v1064_v25 = vsel %vm931_vm0, %v911_v59, 0.0  ;;  %v6235_v5 = vpop.permute.xlu2 %2720  ;;  %v1382_v14 = vmul.f32 0.03125, %v1318_v52  ;;  %v914_v53 = vmul.f32 %v5956_v16, %v5956_v16 }
 0x476   : > { %3475 = vst [vmem:[#allocation1 + $0x7] ss:$9 sm:$0xff] %v3017_v58  ;;  %v1319_v59 = vsub.f32 %v5968_v6, %v5675_v15  ;;  %v7271_v52 = vmov 0   ;;  %v1320_v6 = vsub.f32 %v5817_v13, %v5585_v49 }
 0x477   : > { %7437 = vst [vmem:[#allocation132_spill] sm:$0xff] %v6235_v5  ;;  %v2110_v18 = vmax.f32 %v1943_v35, 0.0  ;;  %4599 = vset.pattern.permute.xlu0 %v7271_v52 }
 0x478   : > { %4588 = vset.pattern.permute.xlu2 %v5202_v43  ;;  %v907_v43 = vmul.f32 %v5835_v28, %v5835_v28 }
 0x47a   : > { %1113 = vadd.xlane.f32.xlu0 %v1112_v48  ;;  %v1052_v55 = vsel %vm931_vm0, %v907_v43, 0.0  ;;  %v2178_v48 = vmul.f32 %v5743_v60, %v2110_v18  ;;  %v1383_v18 = vmul.f32 0.03125, %v1319_v59  ;;  %v4634_v59 = vld [vmem:[%s4835_s23 + $0x1c0] sm:$0xff] }
 0x47b   : > { %v6201_v3 = vpop.permute.xlu1 %2666 }
 0x47d   : > { %v6243_v31 = vpop.permute.xlu2 %2732 }
 0x47e   : > { %7439 = vst [vmem:[#allocation134_spill] sm:$0xff] %v6243_v31  ;;  %v7520_v31 = vld [vmem:[#allocation103_spill] sm:$0xff] }
 0x480   : > { %2762 = vperm.xlu2 %4588, %v5889_v19  }
 0x483   : > { %v6206_v30 = vpop.permute.xlu1 %2678 }
 0x488   : > { %4591 = vset.pattern.permute.xlu2 %v5333_v7  ;;  %v2107_v7 = vmax.f32 %v1934_v10, 0.0  ;;  %v6249_v10 = vld [vmem:[#allocation1] sm:$0xff] }
 0x48a   : > { %v2175_v32 = vmul.f32 %v5743_v60, %v2107_v7  ;;  %v1073_v7 = vsel %vm931_vm0, %v914_v53, 0.0 }
 0x48b   : > { %v6209_v4 = vpop.xlane.xlu1 %1026 }
 0x491   : > { %2240 = vadd.xlane.f32.xlu1 %v2171_v41 }
 0x493   : > { %v6214_v36 = vpop.permute.xlu1 %2696 }
 0x499   : > { %1053 = vadd.xlane.f32.xlu1 %v1052_v55 }
 0x49b   : > { %v6218_v42 = vpop.permute.xlu1 %2708 }
 0x49c   : > { %7436 = vst [vmem:[#allocation131_spill] sm:$0xff] %v6218_v42  ;;  %v7567_v42 = vld [vmem:[#allocation97_spill] sm:$0xff] }
 0x4a3   : > { %v6225_v28 = vpop.xlane.xlu1 %1035 }
 0x4a9   : > { %2248 = vadd.xlane.f32.xlu2 %v2175_v32 }
 0x4ab   : > { %v6237_v58 = vpop.permute.xlu1 %2726 }
 0x4ac   : > { %7438 = vst [vmem:[#allocation133_spill] sm:$0xff] %v6237_v58 }
 0x4b1   : > { %1065 = vadd.xlane.f32.xlu2 %v1064_v25 }
 0x4b2   : > { %2756 = vperm.xlu1 %4587, %v5889_v19  }
 0x4b9   : > { %2254 = vadd.xlane.f32.xlu2 %v2178_v48  ;;  %v2235_v41 = vpop.xlane.xlu1 %2234 }
 0x4ba   : > { %v2360_v43 = vadd.f32 %v2235_v41, %v1382_v14  ;;  %4589 = vset.pattern.permute.xlu1 %v5266_v51  ;;  %v6257_v14 = vpop.permute.xlu0 %2714 }
 0x4bb   : > { %7440 = vst [vmem:[#allocation135_spill] sm:$0xff] %v6257_v14 }
 0x4bc   : > { %v2878_v55 = vadd.f32 %v5810_v22, %v2360_v43  ;;  %v2237_v22 = vpop.xlane.xlu2 %2236 }
 0x4bd   : > { %v2361_v48 = vadd.f32 %v2237_v22, %v1383_v18 }
 0x4be   : > { %v3018_v60 = vrot.slane %v2878_v55, 1  ;;  %v3019_v63 = vrot.slane %v2878_v55, 2  ;;  %v3020_v32 = vrot.slane %v2878_v55, 3  ;;  %3477 = vst [vmem:[#allocation1] ss:$9 sm:$0xff] %v2878_v55  ;;  %v3021_v16 = vrot.slane %v2878_v55, 4 }
 0x4bf   : > { %v3022_v35 = vrot.slane %v2878_v55, 5  ;;  %v3023_v51 = vrot.slane %v2878_v55, 6  ;;  %v3024_v25 = vrot.slane %v2878_v55, 7  ;;  %v2879_v15 = vadd.f32 %v5841_v12, %v2361_v48 }
 0x4c0   : > { %3478 = vst [vmem:[#allocation1 + $0x1] ss:$9 sm:$0xff] %v3018_v60  ;;  %v1384_v12 = vmul.f32 0.03125, %v1320_v6  ;;  %v6274_v6 = vld [vmem:[%s7250_s8] ss:$0 sm:$0xff] }
 0x4c1   : > { %1074 = vadd.xlane.f32.xlu2 %v1073_v7  ;;  %3479 = vst [vmem:[#allocation1 + $0x2] ss:$9 sm:$0xff] %v3019_v63  ;;  %v3025_v53 = vrot.slane %v2879_v15, 1  ;;  %v3026_v43 = vrot.slane %v2879_v15, 2  ;;  %v3027_v55 = vrot.slane %v2879_v15, 3  ;;  %v1931_v7 = vadd.f32 %v6230_v39, %v5881_v8 }
 0x4c2   : > { %3480 = vst [vmem:[#allocation1 + $0x3] ss:$9 sm:$0xff] %v3020_v32  ;;  %v2239_v60 = vpop.xlane.xlu0 %2238  ;;  %v3028_v63 = vrot.slane %v2879_v15, 4  ;;  %v562_v32 = vpop.f32.mrf.mxu0  ;;  %633 = vmatmul.f32.gmra.mxu0 %v4634_v59  ;;  %v3030_v13 = vrot.slane %v2879_v15, 6 }
 0x4c3   : > { %3481 = vst [vmem:[#allocation1 + $0x4] ss:$9 sm:$0xff] %v3021_v16  ;;  %v3029_v16 = vrot.slane %v2879_v15, 5  ;;  %v1480_v49 = vadd.f32 %v5947_v2, %v562_v32 }
 0x4c4   : > { %3482 = vst [vmem:[#allocation1 + $0x5] ss:$9 sm:$0xff] %v3022_v35  ;;  %v2362_v35 = vadd.f32 %v2239_v60, %v1384_v12  ;;  %v910_v60 = vmul.f32 %v5902_v1, %v5902_v1 }
 0x4c5   : > { %3483 = vst [vmem:[#allocation1 + $0x6] ss:$9 sm:$0xff] %v3023_v51  ;;  %v3031_v51 = vrot.slane %v2879_v15, 7  ;;  %v1544_v22 = vmax.f32 %v1480_v49, 0.0 }
 0x4c6   : > { %3484 = vst [vmem:[#allocation1 + $0x7] ss:$9 sm:$0xff] %v3024_v25  ;;  %v2106_v25 = vmax.f32 %v1931_v7, 0.0  ;;  %v2880_v48 = vadd.f32 %v5991_v33, %v2362_v35  ;;  %v1061_v1 = vsel %vm931_vm0, %v910_v60, 0.0 }
 0x4c7   : > { %1708 = vmatmul.f32.gmra.mxu2 %v1544_v22 }
 0x4c8   : > { %v1700_v8 = vpop.f32.mrf.mxu2  ;;  %v3035_v32 = vrot.slane %v2880_v48, 4  ;;  %v3036_v12 = vrot.slane %v2880_v48, 5 }
 0x4c9   : > { %v1701_v18 = vadd.f32 %v6140_v0, %v1700_v8 }
 0x4cb   : > { %v6282_v35 = vpop.f32.mrf.mxu3 }
 0x4cd   : > { %v6262_v41 = vld [vmem:[#allocation1] sm:$0xff] }
 0x4ce   : > { %3486 = vst [vmem:[#allocation1] ss:$9 sm:$0xff] %v2879_v15  ;;  %v2174_v15 = vmul.f32 %v6274_v6, %v2106_v25  ;;  %v565_v25 = vpop.f32.mrf.mxu0 }
 0x4cf   : > { %3487 = vst [vmem:[#allocation1 + $0x1] ss:$9 sm:$0xff] %v3025_v53  ;;  %v1834_v53 = vmax.f32 %v1701_v18, 0.0  ;;  %v1481_v18 = vadd.f32 %v5947_v2, %v565_v25  ;;  %v1952_v25 = vadd.f32 %v6230_v39, %v6012_v47 }
 0x4d0   : > { %3488 = vst [vmem:[#allocation1 + $0x2] ss:$9 sm:$0xff] %v3026_v43  ;;  %v3032_v43 = vrot.slane %v2880_v48, 1  ;;  %v1703_v33 = vpop.f32.mrf.mxu2 }
 0x4d1   : > { %3489 = vst [vmem:[#allocation1 + $0x3] ss:$9 sm:$0xff] %v3027_v55  ;;  %1992 = vmatmul.f32.gmra.mxu3 %v1834_v53  ;;  %v3033_v55 = vrot.slane %v2880_v48, 2  ;;  %v1704_v59 = vadd.f32 %v6140_v0, %v1703_v33  ;;  %v4637_v33 = vld [vmem:[%s4835_s23 + $0x1d0] sm:$0xff] }
 0x4d2   : > { %3490 = vst [vmem:[#allocation1 + $0x4] ss:$9 sm:$0xff] %v3028_v63  ;;  %v3034_v63 = vrot.slane %v2880_v48, 3 }
 0x4d3   : > { %3491 = vst [vmem:[#allocation1 + $0x5] ss:$9 sm:$0xff] %v3029_v16  ;;  %v3037_v16 = vrot.slane %v2880_v48, 6  ;;  %v1835_v49 = vmax.f32 %v1704_v59, 0.0  ;;  %v6288_v53 = vpop.f32.mrf.mxu3 }
 0x4d4   : > { %3492 = vst [vmem:[#allocation1 + $0x6] ss:$9 sm:$0xff] %v3030_v13  ;;  %v3038_v13 = vrot.slane %v2880_v48, 7 }
 0x4d5   : > { %3493 = vst [vmem:[#allocation1 + $0x7] ss:$9 sm:$0xff] %v3031_v51 }
 0x4d9   : > { %2780 = vperm.xlu2 %4591, %v5889_v19   ;;  %1995 = vmatmul.f32.gmra.mxu3 %v1835_v49 }
 0x4dc   : > { %v3494_v7 = vld [vmem:[#allocation1] sm:$0xff]  ;;  %2246 = vadd.xlane.f32.xlu1 %v2174_v15  ;;  %v1545_v15 = vmax.f32 %v1481_v18, 0.0  ;;  %v7444_v18 = vld [vmem:[#allocation53_spill] sm:$0xff] }
 0x4dd   : > { %3496 = vst [vmem:[#allocation1 + $0x1] ss:$9 sm:$0xff] %v3032_v43  ;;  %4045 = vperm.xlu0 %4599, %v3494_v7   ;;  %v6293_v43 = vpop.xlane.xlu1 %1044 }
 0x4de   : > { %3497 = vst [vmem:[#allocation1 + $0x2] ss:$9 sm:$0xff] %v3033_v55  ;;  %1711 = vmatmul.f32.gmra.mxu2 %v1545_v15  ;;  %v1990_v55 = vpop.f32.mrf.mxu3 }
 0x4df   : > { %3498 = vst [vmem:[#allocation1 + $0x3] ss:$9 sm:$0xff] %v3034_v63  ;;  %v1991_v7 = vadd.f32 %v6230_v39, %v1990_v55  ;;  %v568_v63 = vpop.f32.mrf.mxu0 }
 0x4e0   : > { %3499 = vst [vmem:[#allocation1 + $0x4] ss:$9 sm:$0xff] %v3035_v32  ;;  %v1706_v51 = vpop.f32.mrf.mxu2  ;;  %v1482_v59 = vadd.f32 %v5947_v2, %v568_v63  ;;  %v7443_v2 = vld [vmem:[#allocation18_spill] sm:$0xff] }
 0x4e1   : > { %4593 = vset.pattern.permute.xlu2 %v7306_v23  ;;  %3500 = vst [vmem:[#allocation1 + $0x5] ss:$9 sm:$0xff] %v3036_v12  ;;  %v1707_v22 = vadd.f32 %v6140_v0, %v1706_v51  ;;  %v4636_v23 = vld [vmem:[%s4835_s23 + $0x1c8] sm:$0xff]  ;;  %v2126_v49 = vmax.f32 %v1991_v7, 0.0  ;;  %v2113_v7 = vmax.f32 %v1952_v25, 0.0 }
 0x4e2   : > { %3501 = vst [vmem:[#allocation1 + $0x6] ss:$9 sm:$0xff] %v3037_v16  ;;  %636 = vmatmul.f32.gmra.mxu0 %v4636_v23  ;;  %v1546_v12 = vmax.f32 %v1482_v59, 0.0 }
 0x4e3   : > { %3502 = vst [vmem:[#allocation1 + $0x7] ss:$9 sm:$0xff] %v3038_v13  ;;  %v1836_v8 = vmax.f32 %v1707_v22, 0.0  ;;  %v2194_v51 = vmul.f32 %v6274_v6, %v2126_v49 }
 0x4e4   : > { %3495 = vst [vmem:[#allocation1] ss:$9 sm:$0xff] %v2880_v48  ;;  %1062 = vadd.xlane.f32.xlu1 %v1061_v1  ;;  %v6291_v48 = vpop.f32.mrf.mxu1  ;;  %v6305_v1 = vpop.xlane.xlu2 %1047 }
 0x4e5   : > { %1998 = vmatmul.f32.gmra.mxu3 %v1836_v8  ;;  %v6299_v32 = vpop.permute.xlu1 %2738 }
 0x4e6   : > { %7441 = vst [vmem:[#allocation136_spill] sm:$0xff] %v6299_v32  ;;  %1714 = vmatmul.f32.gmra.mxu2 %v1546_v12  ;;  %v7445_v12 = vld [vmem:[#allocation16_spill] sm:$0xff] }
 0x4e9   : > { %2792 = vperm.xlu2 %4593, %v5889_v19  }
 0x4ea   : > { %639 = vmatmul.f32.gmra.mxu0 %v4637_v33 }
 0x4ec   : > { %v6296_v60 = vpop.f32.mrf.mxu1 }
 0x4f1   : > { %4596 = vset.pattern.permute.xlu2 %v5389_v62  ;;  %v7442_v62 = vld [vmem:[#allocation49_spill] sm:$0xff] }
 0x4f2   : > { %v1321_v16 = vsub.f32 %v7442_v62, %v5669_v20  ;;  %v6312_v20 = vld [vmem:[#allocation1] sm:$0xff]  ;;  %v7446_v62 = vld [vmem:[#allocation77_spill] sm:$0xff] }
 0x4f4   : > { %v1385_v13 = vmul.f32 0.03125, %v1321_v16  ;;  %v864_v23 = vpop.f32.mrf.mxu1  ;;  %v1322_v16 = vsub.f32 %v7446_v62, %v7445_v12  ;;  %v7447_v12 = vld [vmem:[#allocation11_spill] sm:$0xff] }
 0x4f5   : > { %v930_v55 = vmul.f32 %v864_v23, %v864_v23  ;;  %v2181_v23 = vmul.f32 %v6274_v6, %v2113_v7  ;;  %v1323_v62 = vsub.f32 %v5984_v29, %v7447_v12 }
 0x4f6   : > { %v1386_v25 = vmul.f32 0.03125, %v1322_v16 }
 0x4fd   : > { %2768 = vperm.xlu1 %4589, %v5889_v19  }
 0x504   : > { %v2241_v22 = vpop.xlane.xlu1 %2240 }
 0x505   : > { %v2363_v8 = vadd.f32 %v2241_v22, %v1385_v13  ;;  %4592 = vset.pattern.permute.xlu1 %v7443_v2  ;;  %v1121_v13 = vsel %vm931_vm0, %v930_v55, 0.0  ;;  %v917_v55 = vmul.f32 %v6028_v9, %v6028_v9  ;;  %v7448_v9 = vld [vmem:[#allocation71_spill] sm:$0xff] }
 0x507   : > { %2286 = vadd.xlane.f32.xlu0 %v2194_v51  ;;  %v2881_v15 = vadd.f32 %v7444_v18, %v2363_v8  ;;  %v2243_v51 = vpop.xlane.xlu2 %2242  ;;  %v6318_v18 = vpop.xlane.xlu0 %1050  ;;  %v1082_v7 = vsel %vm931_vm0, %v917_v55, 0.0  ;;  %v920_v55 = vmul.f32 %v6066_v17, %v6066_v17 }
 0x508   : > { %v2364_v2 = vadd.f32 %v2243_v51, %v1386_v25  ;;  %v1387_v51 = vmul.f32 0.03125, %v1323_v62 }
 0x509   : > { %v3039_v63 = vrot.slane %v2881_v15, 1  ;;  %v3040_v33 = vrot.slane %v2881_v15, 2  ;;  %v3041_v59 = vrot.slane %v2881_v15, 3  ;;  %3504 = vst [vmem:[#allocation1] ss:$9 sm:$0xff] %v2881_v15  ;;  %v3042_v49 = vrot.slane %v2881_v15, 4 }
 0x50a   : > { %v3043_v47 = vrot.slane %v2881_v15, 5  ;;  %v3044_v22 = vrot.slane %v2881_v15, 6  ;;  %v3045_v8 = vrot.slane %v2881_v15, 7  ;;  %v1961_v15 = vadd.f32 %v6230_v39, %v6048_v40 }
 0x50b   : > { %3505 = vst [vmem:[#allocation1 + $0x1] ss:$9 sm:$0xff] %v3039_v63  ;;  %v2882_v63 = vadd.f32 %v6003_v50, %v2364_v2  ;;  %v1940_v50 = vadd.f32 %v6230_v39, %v7448_v9  ;;  %v1091_v12 = vsel %vm931_vm0, %v920_v55, 0.0 }
 0x50c   : > { %3506 = vst [vmem:[#allocation1 + $0x2] ss:$9 sm:$0xff] %v3040_v33  ;;  %v2116_v16 = vmax.f32 %v1961_v15, 0.0  ;;  %v7449_v15 = vld [vmem:[#allocation79_spill] sm:$0xff] }
 0x50d   : > { %3507 = vst [vmem:[#allocation1 + $0x3] ss:$9 sm:$0xff] %v3041_v59  ;;  %v3046_v33 = vrot.slane %v2882_v63, 1  ;;  %v3052_v29 = vrot.slane %v2882_v63, 7  ;;  %v2109_v25 = vmax.f32 %v1940_v50, 0.0 }
 0x50e   : > { %3508 = vst [vmem:[#allocation1 + $0x4] ss:$9 sm:$0xff] %v3042_v49  ;;  %v3047_v49 = vrot.slane %v2882_v63, 2 }
 0x50f   : > { %1122 = vadd.xlane.f32.xlu0 %v1121_v13  ;;  %3509 = vst [vmem:[#allocation1 + $0x5] ss:$9 sm:$0xff] %v3043_v47  ;;  %v3048_v47 = vrot.slane %v2882_v63, 3  ;;  %v3049_v13 = vrot.slane %v2882_v63, 4  ;;  %v2245_v40 = vpop.xlane.xlu0 %2244 }
 0x510   : > { %3510 = vst [vmem:[#allocation1 + $0x6] ss:$9 sm:$0xff] %v3044_v22  ;;  %v3050_v22 = vrot.slane %v2882_v63, 5  ;;  %v2365_v2 = vadd.f32 %v2245_v40, %v1387_v51  ;;  %v6343_v51 = vpop.xlane.xlu2 %1056 }
 0x511   : > { %3511 = vst [vmem:[#allocation1 + $0x7] ss:$9 sm:$0xff] %v3045_v8  ;;  %v3051_v8 = vrot.slane %v2882_v63, 6 }
 0x512   : > { %2260 = vadd.xlane.f32.xlu2 %v2181_v23  ;;  %v2184_v23 = vmul.f32 %v6274_v6, %v2116_v16 }
 0x518   : > { %v6326_v59 = vld [vmem:[#allocation1] sm:$0xff] }
 0x519   : > { %3513 = vst [vmem:[#allocation1] ss:$9 sm:$0xff] %v2882_v63  ;;  %v7450_v63 = vld [vmem:[#allocation75_spill] sm:$0xff] }
 0x51a   : > { %1083 = vadd.xlane.f32.xlu2 %v1082_v7  ;;  %3514 = vst [vmem:[#allocation1 + $0x1] ss:$9 sm:$0xff] %v3046_v33  ;;  %v2883_v7 = vadd.f32 %v7449_v15, %v2365_v2  ;;  %v2177_v33 = vmul.f32 %v6274_v6, %v2109_v25  ;;  %v913_v16 = vmul.f32 %v7450_v63, %v7450_v63  ;;  %v7453_v25 = vld [vmem:[#allocation12_spill] sm:$0xff]  ;;  %v7457_v63 = vld [vmem:[#allocation58_spill] sm:$0xff] }
 0x51b   : > { %3515 = vst [vmem:[#allocation1 + $0x2] ss:$9 sm:$0xff] %v3047_v49  ;;  %v7454_v2 = vld [vmem:[#allocation56_spill] sm:$0xff] }
 0x51c   : > { %3516 = vst [vmem:[#allocation1 + $0x3] ss:$9 sm:$0xff] %v3048_v47  ;;  %v3053_v62 = vrot.slane %v2883_v7, 1  ;;  %v3054_v47 = vrot.slane %v2883_v7, 2  ;;  %v3055_v9 = vrot.slane %v2883_v7, 3  ;;  %v3056_v50 = vrot.slane %v2883_v7, 4 }
 0x51d   : > { %3517 = vst [vmem:[#allocation1 + $0x4] ss:$9 sm:$0xff] %v3049_v13  ;;  %v3057_v17 = vrot.slane %v2883_v7, 5  ;;  %v3058_v13 = vrot.slane %v2883_v7, 6  ;;  %v1070_v40 = vsel %vm931_vm0, %v913_v16, 0.0  ;;  %v1324_v55 = vsub.f32 %v7454_v2, %v7453_v25 }
 0x51e   : > { %3518 = vst [vmem:[#allocation1 + $0x5] ss:$9 sm:$0xff] %v3050_v22  ;;  %v3059_v22 = vrot.slane %v2883_v7, 7 }
 0x51f   : > { %3519 = vst [vmem:[#allocation1 + $0x6] ss:$9 sm:$0xff] %v3051_v8  ;;  %v6345_v8 = vpop.xlane.xlu1 %1053  ;;  %v1388_v15 = vmul.f32 0.03125, %v1324_v55 }
 0x520   : > { %3520 = vst [vmem:[#allocation1 + $0x7] ss:$9 sm:$0xff] %v3052_v29 }
 0x522   : > { %2266 = vadd.xlane.f32.xlu2 %v2184_v23  ;;  %v6348_v23 = vpop.permute.xlu2 %2750 }
 0x523   : > { %7451 = vst [vmem:[#allocation49_spill] sm:$0xff] %v6348_v23 }
 0x527   : > { %v6338_v49 = vld [vmem:[#allocation1] sm:$0xff]  ;;  %2252 = vadd.xlane.f32.xlu1 %v2177_v33  ;;  %v6350_v29 = vpop.permute.xlu1 %2756 }
 0x528   : > { %3522 = vst [vmem:[#allocation1] ss:$9 sm:$0xff] %v2883_v7 }
 0x529   : > { %3523 = vst [vmem:[#allocation1 + $0x1] ss:$9 sm:$0xff] %v3053_v62  ;;  %v7456_v62 = vld [vmem:[#allocation19_spill] sm:$0xff] }
 0x52a   : > { %1092 = vadd.xlane.f32.xlu2 %v1091_v12  ;;  %3524 = vst [vmem:[#allocation1 + $0x2] ss:$9 sm:$0xff] %v3054_v47  ;;  %v6357_v7 = vpop.permute.xlu2 %2762 }
 0x52b   : > { %3525 = vst [vmem:[#allocation1 + $0x3] ss:$9 sm:$0xff] %v3055_v9 }
 0x52c   : > { %3526 = vst [vmem:[#allocation1 + $0x4] ss:$9 sm:$0xff] %v3056_v50 }
 0x52d   : > { %3527 = vst [vmem:[#allocation1 + $0x5] ss:$9 sm:$0xff] %v3057_v17 }
 0x52e   : > { %3528 = vst [vmem:[#allocation1 + $0x6] ss:$9 sm:$0xff] %v3058_v13  ;;  %v7458_v13 = vld [vmem:[#allocation22_spill] sm:$0xff] }
 0x52f   : > { %3529 = vst [vmem:[#allocation1 + $0x7] ss:$9 sm:$0xff] %v3059_v22  ;;  %1071 = vadd.xlane.f32.xlu1 %v1070_v40  ;;  %v1325_v40 = vsub.f32 %v5978_v57, %v7458_v13  ;;  %v6365_v22 = vpop.xlane.xlu0 %1059 }
 0x530   : > { %7452 = vst [vmem:[#allocation18_spill] sm:$0xff] %v6350_v29 }
 0x531   : > { %7455 = vst [vmem:[#allocation53_spill] sm:$0xff] %v6357_v7 }
 0x532   : > { %v2249_v55 = vpop.xlane.xlu2 %2248 }
 0x536   : > { %v6361_v47 = vld [vmem:[#allocation1] sm:$0xff] }
 0x542   : > { %2810 = vperm.xlu2 %4596, %v5889_v19  }
 0x548   : > { %2786 = vperm.xlu1 %4592, %v5889_v19  }
 0x54a   : > { %4598 = vset.pattern.permute.xlu2 %v7271_v52  ;;  %v7460_v52 = vld [vmem:[#allocation5_spill] sm:$0xff] }
 0x54b   : > { %4039 = vperm.xlu2 %4598, %v6249_v10  }
 0x54f   : > { %v2247_v33 = vpop.xlane.xlu1 %2246 }
 0x550   : > { %v2366_v12 = vadd.f32 %v2247_v33, %v1388_v15  ;;  %4594 = vset.pattern.permute.xlu1 %v7456_v62  ;;  %v1389_v33 = vmul.f32 0.03125, %v1325_v40  ;;  %v6367_v62 = vpop.permute.xlu0 %2744 }
 0x551   : > { %7459 = vst [vmem:[#allocation16_spill] sm:$0xff] %v6367_v62 }
 0x552   : > { %v2884_v16 = vadd.f32 %v7457_v63, %v2366_v12  ;;  %v2367_v12 = vadd.f32 %v2249_v55, %v1389_v33 }
 0x554   : > { %v3060_v9 = vrot.slane %v2884_v16, 1  ;;  %v3061_v50 = vrot.slane %v2884_v16, 2  ;;  %v3062_v17 = vrot.slane %v2884_v16, 3  ;;  %3531 = vst [vmem:[#allocation1] ss:$9 sm:$0xff] %v2884_v16  ;;  %v3063_v10 = vrot.slane %v2884_v16, 4 }
 0x555   : > { %v3064_v25 = vrot.slane %v2884_v16, 5  ;;  %v3065_v2 = vrot.slane %v2884_v16, 6  ;;  %v3066_v15 = vrot.slane %v2884_v16, 7  ;;  %v2885_v57 = vadd.f32 %v6026_v54, %v2367_v12 }
 0x556   : > { %3532 = vst [vmem:[#allocation1 + $0x1] ss:$9 sm:$0xff] %v3060_v9  ;;  %v1326_v9 = vsub.f32 %v6014_v21, %v7460_v52  ;;  %v1970_v54 = vadd.f32 %v6230_v39, %v6110_v45 }
 0x557   : > { %3533 = vst [vmem:[#allocation1 + $0x2] ss:$9 sm:$0xff] %v3061_v50  ;;  %v3067_v63 = vrot.slane %v2885_v57, 1  ;;  %v3068_v7 = vrot.slane %v2885_v57, 2  ;;  %v3069_v16 = vrot.slane %v2885_v57, 3  ;;  %v1709_v50 = vpop.f32.mrf.mxu2  ;;  %v3071_v55 = vrot.slane %v2885_v57, 5 }
 0x558   : > { %3534 = vst [vmem:[#allocation1 + $0x3] ss:$9 sm:$0xff] %v3062_v17  ;;  %v7461_v17 = vld [vmem:[#allocation85_spill] sm:$0xff]  ;;  %v1390_v21 = vmul.f32 0.03125, %v1326_v9  ;;  %v3072_v52 = vrot.slane %v2885_v57, 6  ;;  %v3073_v33 = vrot.slane %v2885_v57, 7 }
 0x559   : > { %3535 = vst [vmem:[#allocation1 + $0x4] ss:$9 sm:$0xff] %v3063_v10  ;;  %v1949_v40 = vadd.f32 %v6230_v39, %v7461_v17  ;;  %v3070_v10 = vrot.slane %v2885_v57, 4  ;;  %v4638_v9 = vld [vmem:[%s4835_s23 + $0x1d8] sm:$0xff] }
 0x55a   : > { %3536 = vst [vmem:[#allocation1 + $0x5] ss:$9 sm:$0xff] %v3064_v25  ;;  %v1710_v25 = vadd.f32 %v6140_v0, %v1709_v50  ;;  %v7462_v50 = vld [vmem:[#allocation61_spill] sm:$0xff] }
 0x55b   : > { %3537 = vst [vmem:[#allocation1 + $0x6] ss:$9 sm:$0xff] %v3065_v2  ;;  %v2251_v2 = vpop.xlane.xlu0 %2250  ;;  %v2112_v12 = vmax.f32 %v1949_v40, 0.0 }
 0x55c   : > { %3538 = vst [vmem:[#allocation1 + $0x7] ss:$9 sm:$0xff] %v3066_v15  ;;  %v1837_v15 = vmax.f32 %v1710_v25, 0.0 }
 0x55d   : > { %v2180_v45 = vmul.f32 %v6274_v6, %v2112_v12 }
 0x55e   : > { %2001 = vmatmul.f32.gmra.mxu3 %v1837_v15 }
 0x563   : > { %v3539_v13 = vld [vmem:[#allocation1] sm:$0xff] }
 0x564   : > { %3540 = vst [vmem:[#allocation1] ss:$9 sm:$0xff] %v2885_v57  ;;  %4060 = vperm.xlu0 %4599, %v3539_v13   ;;  %v6377_v13 = vpop.f32.mrf.mxu3  ;;  %v6386_v57 = vld [vmem:[%s7245_s3] ss:$0 sm:$0xff] }
 0x565   : > { %3541 = vst [vmem:[#allocation1 + $0x1] ss:$9 sm:$0xff] %v3067_v63  ;;  %v2368_v63 = vadd.f32 %v2251_v2, %v1390_v21  ;;  %v7463_v21 = vld [vmem:[#allocation88_spill] sm:$0xff] }
 0x566   : > { %3542 = vst [vmem:[#allocation1 + $0x2] ss:$9 sm:$0xff] %v3068_v7  ;;  %v2119_v7 = vmax.f32 %v1970_v54, 0.0 }
 0x567   : > { %3543 = vst [vmem:[#allocation1 + $0x3] ss:$9 sm:$0xff] %v3069_v16  ;;  %v2886_v17 = vadd.f32 %v7462_v50, %v2368_v63  ;;  %v571_v16 = vpop.f32.mrf.mxu0  ;;  %642 = vmatmul.f32.gmra.mxu0 %v4638_v9  ;;  %v923_v63 = vmul.f32 %v6133_v27, %v6133_v27 }
 0x568   : > { %3544 = vst [vmem:[#allocation1 + $0x4] ss:$9 sm:$0xff] %v3070_v10  ;;  %v2187_v10 = vmul.f32 %v6274_v6, %v2119_v7  ;;  %v1483_v40 = vadd.f32 %v6386_v57, %v571_v16 }
 0x569   : > { %3545 = vst [vmem:[#allocation1 + $0x5] ss:$9 sm:$0xff] %v3071_v55  ;;  %v3074_v2 = vrot.slane %v2886_v17, 1  ;;  %v1712_v55 = vpop.f32.mrf.mxu2  ;;  %v3075_v15 = vrot.slane %v2886_v17, 2  ;;  %v3076_v12 = vrot.slane %v2886_v17, 3  ;;  %v3077_v7 = vrot.slane %v2886_v17, 4 }
 0x56a   : > { %3546 = vst [vmem:[#allocation1 + $0x6] ss:$9 sm:$0xff] %v3072_v52  ;;  %v1547_v25 = vmax.f32 %v1483_v40, 0.0  ;;  %v916_v52 = vmul.f32 %v7463_v21, %v7463_v21  ;;  %v3078_v16 = vrot.slane %v2886_v17, 5  ;;  %v4640_v40 = vld [vmem:[%s4835_s23 + $0x1e0] sm:$0xff]  ;;  %v3079_v21 = vrot.slane %v2886_v17, 6 }
 0x56b   : > { %3547 = vst [vmem:[#allocation1 + $0x7] ss:$9 sm:$0xff] %v3073_v33  ;;  %v1713_v33 = vadd.f32 %v6140_v0, %v1712_v55  ;;  %v1100_v55 = vsel %vm931_vm0, %v923_v63, 0.0 }
 0x56c   : > { %1717 = vmatmul.f32.gmra.mxu2 %v1547_v25  ;;  %v6396_v50 = vpop.f32.mrf.mxu3  ;;  %v1079_v25 = vsel %vm931_vm0, %v916_v52, 0.0 }
 0x56f   : > { %v574_v9 = vpop.f32.mrf.mxu0  ;;  %645 = vmatmul.f32.gmra.mxu0 %v4640_v40  ;;  %v6410_v40 = vpop.xlane.xlu1 %1062 }
 0x570   : > { %v1484_v27 = vadd.f32 %v6386_v57, %v574_v9 }
 0x572   : > { %v6389_v54 = vld [vmem:[#allocation1] sm:$0xff]  ;;  %2258 = vadd.xlane.f32.xlu1 %v2180_v45  ;;  %v1838_v45 = vmax.f32 %v1713_v33, 0.0 }
 0x573   : > { %3549 = vst [vmem:[#allocation1] ss:$9 sm:$0xff] %v2886_v17 }
 0x574   : > { %2272 = vadd.xlane.f32.xlu2 %v2187_v10  ;;  %3550 = vst [vmem:[#allocation1 + $0x1] ss:$9 sm:$0xff] %v3074_v2  ;;  %v1979_v10 = vadd.f32 %v6230_v39, %v6166_v37  ;;  %2004 = vmatmul.f32.gmra.mxu3 %v1838_v45  ;;  %v3080_v2 = vrot.slane %v2886_v17, 7  ;;  %v926_v17 = vmul.f32 %v6182_v61, %v6182_v61 }
 0x575   : > { %3551 = vst [vmem:[#allocation1 + $0x2] ss:$9 sm:$0xff] %v3075_v15  ;;  %v1548_v15 = vmax.f32 %v1484_v27, 0.0 }
 0x576   : > { %3552 = vst [vmem:[#allocation1 + $0x3] ss:$9 sm:$0xff] %v3076_v12  ;;  %v2122_v33 = vmax.f32 %v1979_v10, 0.0  ;;  %v1999_v12 = vpop.f32.mrf.mxu3  ;;  %v1109_v9 = vsel %vm931_vm0, %v926_v17, 0.0  ;;  %v7468_v17 = vld [vmem:[#allocation93_spill] sm:$0xff] }
 0x577   : > { %3553 = vst [vmem:[#allocation1 + $0x4] ss:$9 sm:$0xff] %v3077_v7  ;;  %1720 = vmatmul.f32.gmra.mxu2 %v1548_v15  ;;  %v2000_v52 = vadd.f32 %v6230_v39, %v1999_v12  ;;  %v1715_v7 = vpop.f32.mrf.mxu2  ;;  %v577_v10 = vpop.f32.mrf.mxu0 }
 0x578   : > { %3554 = vst [vmem:[#allocation1 + $0x5] ss:$9 sm:$0xff] %v3078_v16  ;;  %v2190_v37 = vmul.f32 %v6274_v6, %v2122_v33  ;;  %v1716_v63 = vadd.f32 %v6140_v0, %v1715_v7  ;;  %v6414_v27 = vpop.permute.xlu1 %2768  ;;  %v1485_v61 = vadd.f32 %v6386_v57, %v577_v10  ;;  %v6420_v12 = vpop.xlane.xlu2 %1065  ;;  %v7467_v7 = vmov 0   ;;  %v7470_v10 = vld [vmem:[#allocation84_spill] sm:$0xff] }
 0x579   : > { %3555 = vst [vmem:[#allocation1 + $0x6] ss:$9 sm:$0xff] %v3079_v21  ;;  %v2129_v45 = vmax.f32 %v2000_v52, 0.0 }
 0x57a   : > { %3556 = vst [vmem:[#allocation1 + $0x7] ss:$9 sm:$0xff] %v3080_v2  ;;  %1080 = vadd.xlane.f32.xlu1 %v1079_v25  ;;  %v1839_v16 = vmax.f32 %v1716_v63, 0.0  ;;  %v4641_v25 = vld [vmem:[%s4835_s23 + $0x1e8] sm:$0xff]  ;;  %v1549_v0 = vmax.f32 %v1485_v61, 0.0 }
 0x57b   : > { %v2197_v21 = vmul.f32 %v6274_v6, %v2129_v45  ;;  %648 = vmatmul.f32.gmra.mxu0 %v4641_v25  ;;  %7464 = vst [vmem:[#allocation77_spill] sm:$0xff] %v6414_v27  ;;  %v7465_v2 = vld [vmem:[#allocation20_spill] sm:$0xff] }
 0x57c   : > { %1101 = vadd.xlane.f32.xlu2 %v1100_v55  ;;  %2007 = vmatmul.f32.gmra.mxu3 %v1839_v16  ;;  %v7466_v55 = vld [vmem:[#allocation64_spill] sm:$0xff] }
 0x57d   : > { %v1327_v15 = vsub.f32 %v7466_v55, %v7465_v2 }
 0x57f   : > { %1723 = vmatmul.f32.gmra.mxu2 %v1549_v0  ;;  %v1391_v33 = vmul.f32 0.03125, %v1327_v15 }
 0x580   : > { %v2255_v55 = vpop.xlane.xlu2 %2254 }
 0x581   : > { %v6424_v45 = vld [vmem:[#allocation1] sm:$0xff] }
 0x584   : > { %2278 = vadd.xlane.f32.xlu2 %v2190_v37 }
 0x58c   : > { %1110 = vadd.xlane.f32.xlu2 %v1109_v9 }
 0x58e   : > { %2292 = vadd.xlane.f32.xlu0 %v2197_v21 }
 0x593   : > { %2798 = vperm.xlu1 %4594, %v5889_v19   ;;  %v7469_v19 = vld [vmem:[#allocation25_spill] sm:$0xff] }
 0x594   : > { %v1328_v25 = vsub.f32 %v7470_v10, %v7469_v19  ;;  %v4642_v19 = vld [vmem:[%s4835_s23 + $0x1f0] sm:$0xff] }
 0x59a   : > { %v2253_v37 = vpop.xlane.xlu1 %2252 }
 0x59b   : > { %v2369_v52 = vadd.f32 %v2253_v37, %v1391_v33  ;;  %4597 = vset.pattern.permute.xlu1 %v7467_v7  ;;  %v1392_v33 = vmul.f32 0.03125, %v1328_v25  ;;  %v7471_v7 = vld [vmem:[#allocation82_spill] sm:$0xff] }
 0x59d   : > { %v2887_v63 = vadd.f32 %v7468_v17, %v2369_v52  ;;  %v2370_v37 = vadd.f32 %v2255_v55, %v1392_v33  ;;  %v6429_v52 = vpop.xlane.xlu0 %1068 }
 0x59f   : > { %v3081_v16 = vrot.slane %v2887_v63, 1  ;;  %v3082_v9 = vrot.slane %v2887_v63, 2  ;;  %v3083_v21 = vrot.slane %v2887_v63, 3  ;;  %3558 = vst [vmem:[#allocation1] ss:$9 sm:$0xff] %v2887_v63  ;;  %v3084_v61 = vrot.slane %v2887_v63, 4 }
 0x5a0   : > { %v3085_v0 = vrot.slane %v2887_v63, 5  ;;  %v3086_v2 = vrot.slane %v2887_v63, 6  ;;  %v3087_v15 = vrot.slane %v2887_v63, 7  ;;  %v2888_v17 = vadd.f32 %v7471_v7, %v2370_v37 }
 0x5a1   : > { %3559 = vst [vmem:[#allocation1 + $0x1] ss:$9 sm:$0xff] %v3081_v16  ;;  %v580_v16 = vpop.f32.mrf.mxu0  ;;  %651 = vmatmul.f32.gmra.mxu0 %v4642_v19 }
 0x5a2   : > { %3560 = vst [vmem:[#allocation1 + $0x2] ss:$9 sm:$0xff] %v3082_v9  ;;  %v1486_v63 = vadd.f32 %v6386_v57, %v580_v16  ;;  %v3088_v9 = vrot.slane %v2888_v17, 1  ;;  %v3089_v25 = vrot.slane %v2888_v17, 2  ;;  %v3092_v33 = vrot.slane %v2888_v17, 5 }
 0x5a3   : > { %3561 = vst [vmem:[#allocation1 + $0x3] ss:$9 sm:$0xff] %v3083_v21  ;;  %v3093_v7 = vrot.slane %v2888_v17, 6 }
 0x5a4   : > { %4048 = vperm.xlu2 %4598, %v6312_v20   ;;  %3562 = vst [vmem:[#allocation1 + $0x4] ss:$9 sm:$0xff] %v3084_v61  ;;  %v7472_v20 = vld [vmem:[#allocation10_spill] sm:$0xff]  ;;  %v1550_v61 = vmax.f32 %v1486_v63, 0.0 }
 0x5a5   : > { %3563 = vst [vmem:[#allocation1 + $0x5] ss:$9 sm:$0xff] %v3085_v0  ;;  %v1329_v10 = vsub.f32 %v6044_v26, %v7472_v20  ;;  %v3090_v0 = vrot.slane %v2888_v17, 3  ;;  %v3094_v26 = vrot.slane %v2888_v17, 7  ;;  %v7474_v20 = vld [vmem:[#allocation67_spill] sm:$0xff] }
 0x5a6   : > { %3564 = vst [vmem:[#allocation1 + $0x6] ss:$9 sm:$0xff] %v3086_v2  ;;  %v7473_v2 = vld [vmem:[#allocation94_spill] sm:$0xff]  ;;  %1726 = vmatmul.f32.gmra.mxu2 %v1550_v61 }
 0x5a7   : > { %3565 = vst [vmem:[#allocation1 + $0x7] ss:$9 sm:$0xff] %v3087_v15  ;;  %v1958_v55 = vadd.f32 %v6230_v39, %v7473_v2  ;;  %v2257_v15 = vpop.xlane.xlu0 %2256  ;;  %v1393_v37 = vmul.f32 0.03125, %v1329_v10 }
 0x5a9   : > { %v2115_v16 = vmax.f32 %v1958_v55, 0.0  ;;  %v2371_v19 = vadd.f32 %v2257_v15, %v1393_v37  ;;  %v583_v63 = vpop.f32.mrf.mxu0 }
 0x5ab   : > { %v2183_v61 = vmul.f32 %v6274_v6, %v2115_v16 }
 0x5ac   : > { %4054 = vperm.xlu2 %4598, %v6338_v49   ;;  %v3091_v49 = vrot.slane %v2888_v17, 4 }
 0x5ae   : > { %v3566_v21 = vld [vmem:[#allocation1] sm:$0xff] }
 0x5af   : > { %3567 = vst [vmem:[#allocation1] ss:$9 sm:$0xff] %v2888_v17  ;;  %4069 = vperm.xlu0 %4599, %v3566_v21   ;;  %v1487_v21 = vadd.f32 %v6386_v57, %v583_v63  ;;  %v7475_v17 = vld [vmem:[#allocation98_spill] sm:$0xff] }
 0x5b0   : > { %3568 = vst [vmem:[#allocation1 + $0x1] ss:$9 sm:$0xff] %v3088_v9  ;;  %v4643_v9 = vld [vmem:[%s4835_s23 + $0x1f8] sm:$0xff]  ;;  %v919_v55 = vmul.f32 %v7475_v17, %v7475_v17  ;;  %s4411_s23 = sshll.u32 %s340_s14, 4  ;;  %s4412_s23 = int_to_ptr.vmem [resolvable:$true] %s4411_s23 }
 0x5b1   : > { %3569 = vst [vmem:[#allocation1 + $0x2] ss:$9 sm:$0xff] %v3089_v25  ;;  %654 = vmatmul.f32.gmra.mxu0 %v4643_v9  ;;  %v2889_v25 = vadd.f32 %v7474_v20, %v2371_v19  ;;  %v1551_v2 = vmax.f32 %v1487_v21, 0.0  ;;  %v1988_v19 = vadd.f32 %v6230_v39, %v6288_v53  ;;  %v6451_v21 = vpop.xlane.xlu2 %1074  ;;  %v929_v20 = vmul.f32 %v6296_v60, %v6296_v60 }
 0x5b2   : > { %3570 = vst [vmem:[#allocation1 + $0x3] ss:$9 sm:$0xff] %v3090_v0 }
 0x5b3   : > { %3571 = vst [vmem:[#allocation1 + $0x4] ss:$9 sm:$0xff] %v3091_v49  ;;  %1729 = vmatmul.f32.gmra.mxu2 %v1551_v2  ;;  %v3095_v10 = vrot.slane %v2889_v25, 1  ;;  %v3096_v49 = vrot.slane %v2889_v25, 2  ;;  %v3097_v15 = vrot.slane %v2889_v25, 3  ;;  %v3099_v37 = vrot.slane %v2889_v25, 5 }
 0x5b4   : > { %3572 = vst [vmem:[#allocation1 + $0x5] ss:$9 sm:$0xff] %v3092_v33  ;;  %v3098_v33 = vrot.slane %v2889_v25, 4  ;;  %v3101_v16 = vrot.slane %v2889_v25, 7  ;;  %v2125_v63 = vmax.f32 %v1988_v19, 0.0 }
 0x5b5   : > { %3573 = vst [vmem:[#allocation1 + $0x6] ss:$9 sm:$0xff] %v3093_v7  ;;  %v3100_v7 = vrot.slane %v2889_v25, 6 }
 0x5b6   : > { %3574 = vst [vmem:[#allocation1 + $0x7] ss:$9 sm:$0xff] %v3094_v26  ;;  %v1088_v26 = vsel %vm931_vm0, %v919_v55, 0.0  ;;  %v2193_v9 = vmul.f32 %v6274_v6, %v2125_v63 }
 0x5b7   : > { %7476 = vst [vmem:[#allocation11_spill] sm:$0xff] %v6451_v21 }
 0x5b9   : > { %v6458_v2 = vpop.permute.xlu2 %2780 }
 0x5ba   : > { %7477 = vst [vmem:[#allocation71_spill] sm:$0xff] %v6458_v2 }
 0x5bd   : > { %v6443_v0 = vld [vmem:[#allocation1] sm:$0xff]  ;;  %2264 = vadd.xlane.f32.xlu1 %v2183_v61  ;;  %v6455_v61 = vpop.xlane.xlu1 %1071 }
 0x5be   : > { %3576 = vst [vmem:[#allocation1] ss:$9 sm:$0xff] %v2889_v25  ;;  %v1118_v25 = vsel %vm931_vm0, %v929_v20, 0.0 }
 0x5bf   : > { %3577 = vst [vmem:[#allocation1 + $0x1] ss:$9 sm:$0xff] %v3095_v10  ;;  %v586_v10 = vpop.f32.mrf.mxu0 }
 0x5c0   : > { %3578 = vst [vmem:[#allocation1 + $0x2] ss:$9 sm:$0xff] %v3096_v49  ;;  %v1488_v53 = vadd.f32 %v6386_v57, %v586_v10  ;;  %v7479_v49 = vld [vmem:[#allocation23_spill] sm:$0xff]  ;;  %v7483_v10 = vld [vmem:[#allocation28_spill] sm:$0xff] }
 0x5c1   : > { %3579 = vst [vmem:[#allocation1 + $0x3] ss:$9 sm:$0xff] %v3097_v15  ;;  %v7480_v15 = vld [vmem:[#allocation72_spill] sm:$0xff] }
 0x5c2   : > { %3580 = vst [vmem:[#allocation1 + $0x4] ss:$9 sm:$0xff] %v3098_v33  ;;  %v1552_v55 = vmax.f32 %v1488_v53, 0.0  ;;  %v1330_v33 = vsub.f32 %v7480_v15, %v7479_v49 }
 0x5c3   : > { %3581 = vst [vmem:[#allocation1 + $0x5] ss:$9 sm:$0xff] %v3099_v37  ;;  %v6466_v37 = vpop.permute.xlu2 %2792 }
 0x5c4   : > { %3582 = vst [vmem:[#allocation1 + $0x6] ss:$9 sm:$0xff] %v3100_v7  ;;  %1732 = vmatmul.f32.gmra.mxu2 %v1552_v55  ;;  %v1394_v60 = vmul.f32 0.03125, %v1330_v33 }
 0x5c5   : > { %3583 = vst [vmem:[#allocation1 + $0x7] ss:$9 sm:$0xff] %v3101_v16  ;;  %1089 = vadd.xlane.f32.xlu1 %v1088_v26  ;;  %v6460_v17 = vpop.permute.xlu1 %2786  ;;  %v7482_v16 = vld [vmem:[#allocation100_spill] sm:$0xff] }
 0x5c6   : > { %7478 = vst [vmem:[#allocation79_spill] sm:$0xff] %v6460_v17  ;;  %v6473_v17 = vpop.xlane.xlu0 %1077 }
 0x5c7   : > { %7481 = vst [vmem:[#allocation75_spill] sm:$0xff] %v6466_v37 }
 0x5c8   : > { %7485 = vst [vmem:[#allocation12_spill] sm:$0xff] %v6473_v17 }
 0x5cb   : > { %v2261_v33 = vpop.xlane.xlu2 %2260 }
 0x5cc   : > { %v6469_v63 = vld [vmem:[#allocation1] sm:$0xff] }
 0x5d5   : > { %2284 = vadd.xlane.f32.xlu2 %v2193_v9 }
 0x5dd   : > { %1119 = vadd.xlane.f32.xlu2 %v1118_v25 }
 0x5de   : > { %4036 = vperm.xlu1 %4597, %v6189_v11   ;;  %v7484_v11 = vld [vmem:[#allocation90_spill] sm:$0xff] }
 0x5df   : > { %v1331_v53 = vsub.f32 %v7484_v11, %v7483_v10  ;;  %v6476_v10 = vpop.permute.xlu0 %2774 }
 0x5e0   : > { %7486 = vst [vmem:[#allocation56_spill] sm:$0xff] %v6476_v10 }
 0x5e5   : > { %v2259_v7 = vpop.xlane.xlu1 %2258 }
 0x5e6   : > { %v2372_v26 = vadd.f32 %v2259_v7, %v1394_v60  ;;  %v1395_v7 = vmul.f32 0.03125, %v1331_v53 }
 0x5e8   : > { %v2890_v19 = vadd.f32 %v7482_v16, %v2372_v26  ;;  %v589_v26 = vpop.f32.mrf.mxu0  ;;  %v2373_v16 = vadd.f32 %v2261_v33, %v1395_v7 }
 0x5e9   : > { %v1489_v37 = vadd.f32 %v6386_v57, %v589_v26 }
 0x5ea   : > { %v3102_v9 = vrot.slane %v2890_v19, 1  ;;  %v3103_v20 = vrot.slane %v2890_v19, 2  ;;  %v3104_v25 = vrot.slane %v2890_v19, 3  ;;  %3585 = vst [vmem:[#allocation1] ss:$9 sm:$0xff] %v2890_v19  ;;  %v3105_v49 = vrot.slane %v2890_v19, 4 }
 0x5eb   : > { %v3106_v55 = vrot.slane %v2890_v19, 5  ;;  %v3107_v15 = vrot.slane %v2890_v19, 6  ;;  %v3108_v60 = vrot.slane %v2890_v19, 7  ;;  %v1553_v11 = vmax.f32 %v1489_v37, 0.0  ;;  %v6483_v19 = vld [vmem:[%s7247_s5] ss:$0 sm:$0xff] }
 0x5ec   : > { %3586 = vst [vmem:[#allocation1 + $0x1] ss:$9 sm:$0xff] %v3102_v9  ;;  %v7487_v9 = vld [vmem:[#allocation69_spill] sm:$0xff] }
 0x5ed   : > { %3587 = vst [vmem:[#allocation1 + $0x2] ss:$9 sm:$0xff] %v3103_v20  ;;  %v2891_v2 = vadd.f32 %v7487_v9, %v2373_v16  ;;  %1735 = vmatmul.f32.gmra.mxu2 %v1553_v11  ;;  %v7488_v37 = vld [vmem:[#allocation9_spill] sm:$0xff] }
 0x5ee   : > { %3588 = vst [vmem:[#allocation1 + $0x3] ss:$9 sm:$0xff] %v3104_v25  ;;  %v7490_v16 = vld [vmem:[#allocation113_spill] sm:$0xff] }
 0x5ef   : > { %3589 = vst [vmem:[#allocation1 + $0x4] ss:$9 sm:$0xff] %v3105_v49  ;;  %v1718_v20 = vpop.f32.mrf.mxu2  ;;  %v3109_v49 = vrot.slane %v2891_v2, 1  ;;  %v3110_v7 = vrot.slane %v2891_v2, 2  ;;  %v3111_v26 = vrot.slane %v2891_v2, 3  ;;  %v1967_v11 = vadd.f32 %v6230_v39, %v7490_v16  ;;  %v6492_v39 = vpop.f32.mrf.mxu3 }
 0x5f0   : > { %3590 = vst [vmem:[#allocation1 + $0x5] ss:$9 sm:$0xff] %v3106_v55  ;;  %v1719_v25 = vadd.f32 %v6483_v19, %v1718_v20  ;;  %v592_v53 = vpop.f32.mrf.mxu0  ;;  %v3112_v9 = vrot.slane %v2891_v2, 4  ;;  %v2263_v20 = vpop.xlane.xlu0 %2262  ;;  %v3113_v10 = vrot.slane %v2891_v2, 5 }
 0x5f1   : > { %3591 = vst [vmem:[#allocation1 + $0x6] ss:$9 sm:$0xff] %v3107_v15  ;;  %v1490_v33 = vadd.f32 %v6386_v57, %v592_v53  ;;  %v3114_v53 = vrot.slane %v2891_v2, 6 }
 0x5f2   : > { %3592 = vst [vmem:[#allocation1 + $0x7] ss:$9 sm:$0xff] %v3108_v60  ;;  %v1840_v15 = vmax.f32 %v1719_v25, 0.0  ;;  %v7489_v60 = vld [vmem:[#allocation104_spill] sm:$0xff] }
 0x5f3   : > { %v1554_v25 = vmax.f32 %v1490_v33, 0.0 }
 0x5f4   : > { %2010 = vmatmul.f32.gmra.mxu3 %v1840_v15 }
 0x5f5   : > { %4063 = vperm.xlu2 %4598, %v6389_v54   ;;  %v1332_v54 = vsub.f32 %v7489_v60, %v7488_v37  ;;  %v3115_v37 = vrot.slane %v2891_v2, 7  ;;  %1738 = vmatmul.f32.gmra.mxu2 %v1554_v25 }
 0x5f7   : > { %v1396_v27 = vmul.f32 0.03125, %v1332_v54 }
 0x5f9   : > { %v3593_v55 = vld [vmem:[#allocation1] sm:$0xff]  ;;  %v2374_v15 = vadd.f32 %v2263_v20, %v1396_v27 }
 0x5fa   : > { %3594 = vst [vmem:[#allocation1] ss:$9 sm:$0xff] %v2891_v2  ;;  %4078 = vperm.xlu0 %4599, %v3593_v55   ;;  %v1721_v29 = vpop.f32.mrf.mxu2  ;;  %v7492_v2 = vld [vmem:[#allocation119_spill] sm:$0xff] }
 0x5fb   : > { %3595 = vst [vmem:[#allocation1 + $0x1] ss:$9 sm:$0xff] %v3109_v49  ;;  %v1722_v55 = vadd.f32 %v6483_v19, %v1721_v29  ;;  %v2118_v49 = vmax.f32 %v1967_v11, 0.0 }
 0x5fc   : > { %3596 = vst [vmem:[#allocation1 + $0x2] ss:$9 sm:$0xff] %v3110_v7  ;;  %v7491_v7 = vld [vmem:[#allocation102_spill] sm:$0xff] }
 0x5fd   : > { %3597 = vst [vmem:[#allocation1 + $0x3] ss:$9 sm:$0xff] %v3111_v26  ;;  %v1841_v60 = vmax.f32 %v1722_v55, 0.0  ;;  %v2892_v26 = vadd.f32 %v7491_v7, %v2374_v15  ;;  %v2186_v33 = vmul.f32 %v6274_v6, %v2118_v49  ;;  %v6506_v55 = vld [vmem:[%s7249_s7] ss:$0 sm:$0xff] }
 0x5fe   : > { %3598 = vst [vmem:[#allocation1 + $0x4] ss:$9 sm:$0xff] %v3112_v9  ;;  %v6500_v9 = vpop.f32.mrf.mxu3  ;;  %v1997_v49 = vadd.f32 %v6506_v55, %v6396_v50  ;;  %v595_v50 = vpop.f32.mrf.mxu0 }
 0x5ff   : > { %3599 = vst [vmem:[#allocation1 + $0x5] ss:$9 sm:$0xff] %v3113_v10  ;;  %2013 = vmatmul.f32.gmra.mxu3 %v1841_v60  ;;  %v3116_v54 = vrot.slane %v2892_v26, 1  ;;  %v922_v10 = vmul.f32 %v7492_v2, %v7492_v2  ;;  %v3117_v29 = vrot.slane %v2892_v26, 2  ;;  %v3118_v27 = vrot.slane %v2892_v26, 3 }
 0x600   : > { %3600 = vst [vmem:[#allocation1 + $0x6] ss:$9 sm:$0xff] %v3114_v53  ;;  %v3119_v11 = vrot.slane %v2892_v26, 4  ;;  %v3120_v20 = vrot.slane %v2892_v26, 5  ;;  %v3121_v25 = vrot.slane %v2892_v26, 6  ;;  %v2128_v15 = vmax.f32 %v1997_v49, 0.0 }
 0x601   : > { %3601 = vst [vmem:[#allocation1 + $0x7] ss:$9 sm:$0xff] %v3115_v37  ;;  %v1097_v53 = vsel %vm931_vm0, %v922_v10, 0.0  ;;  %v3122_v37 = vrot.slane %v2892_v26, 7  ;;  %v7497_v49 = vld [vmem:[#allocation80_spill] sm:$0xff] }
 0x606   : > { %v2008_v60 = vpop.f32.mrf.mxu3 }
 0x607   : > { %v2009_v7 = vadd.f32 %v6506_v55, %v2008_v60 }
 0x608   : > { %v6496_v16 = vld [vmem:[#allocation1] sm:$0xff]  ;;  %2270 = vadd.xlane.f32.xlu1 %v2186_v33  ;;  %v2196_v33 = vmul.f32 %v6274_v6, %v2128_v15 }
 0x609   : > { %3603 = vst [vmem:[#allocation1] ss:$9 sm:$0xff] %v2892_v26  ;;  %v2132_v2 = vmax.f32 %v2009_v7, 0.0 }
 0x60a   : > { %3604 = vst [vmem:[#allocation1 + $0x1] ss:$9 sm:$0xff] %v3116_v54  ;;  %v1724_v54 = vpop.f32.mrf.mxu2 }
 0x60b   : > { %3605 = vst [vmem:[#allocation1 + $0x2] ss:$9 sm:$0xff] %v3117_v29  ;;  %v1725_v26 = vadd.f32 %v6483_v19, %v1724_v54  ;;  %v6513_v29 = vpop.xlane.xlu1 %1080 }
 0x60c   : > { %3606 = vst [vmem:[#allocation1 + $0x3] ss:$9 sm:$0xff] %v3118_v27  ;;  %v2200_v27 = vmul.f32 %v6274_v6, %v2132_v2  ;;  %v7498_v6 = vld [vmem:[#allocation87_spill] sm:$0xff] }
 0x60d   : > { %3607 = vst [vmem:[#allocation1 + $0x4] ss:$9 sm:$0xff] %v3119_v11  ;;  %v1842_v10 = vmax.f32 %v1725_v26, 0.0  ;;  %v6516_v11 = vpop.xlane.xlu2 %1083 }
 0x60e   : > { %3608 = vst [vmem:[#allocation1 + $0x5] ss:$9 sm:$0xff] %v3120_v20 }
 0x60f   : > { %3609 = vst [vmem:[#allocation1 + $0x6] ss:$9 sm:$0xff] %v3121_v25  ;;  %2016 = vmatmul.f32.gmra.mxu3 %v1842_v10  ;;  %v1491_v25 = vadd.f32 %v6386_v57, %v595_v50  ;;  %v7500_v50 = vld [vmem:[#allocation96_spill] sm:$0xff] }
 0x610   : > { %3610 = vst [vmem:[#allocation1 + $0x7] ss:$9 sm:$0xff] %v3122_v37  ;;  %1098 = vadd.xlane.f32.xlu1 %v1097_v53  ;;  %v7496_v37 = vld [vmem:[#allocation26_spill] sm:$0xff] }
 0x611   : > { %7493 = vst [vmem:[#allocation19_spill] sm:$0xff] %v6513_v29  ;;  %v1555_v53 = vmax.f32 %v1491_v25, 0.0  ;;  %v1333_v15 = vsub.f32 %v7497_v49, %v7496_v37 }
 0x612   : > { %7494 = vst [vmem:[#allocation58_spill] sm:$0xff] %v6516_v11 }
 0x613   : > { %v6518_v20 = vpop.permute.xlu1 %2798  ;;  %1741 = vmatmul.f32.gmra.mxu2 %v1555_v53  ;;  %v1397_v60 = vmul.f32 0.03125, %v1333_v15 }
 0x614   : > { %7495 = vst [vmem:[#allocation22_spill] sm:$0xff] %v6518_v20 }
 0x615   : > { %v2267_v7 = vpop.xlane.xlu2 %2266 }
 0x617   : > { %v6525_v2 = vld [vmem:[#allocation1] sm:$0xff] }
 0x61e   : > { %2290 = vadd.xlane.f32.xlu2 %v2196_v33 }
 0x624   : > { %2298 = vadd.xlane.f32.xlu0 %v2200_v27 }
 0x629   : > { %4042 = vperm.xlu1 %4597, %v6262_v41   ;;  %v7499_v41 = vld [vmem:[#allocation31_spill] sm:$0xff] }
 0x62a   : > { %v1334_v25 = vsub.f32 %v7500_v50, %v7499_v41 }
 0x62c   : > { %v1398_v15 = vmul.f32 0.03125, %v1334_v25 }
 0x630   : > { %v2265_v33 = vpop.xlane.xlu1 %2264 }
 0x631   : > { %v2375_v54 = vadd.f32 %v2265_v33, %v1397_v60  ;;  %v6530_v60 = vpop.xlane.xlu2 %1092  ;;  %v598_v33 = vpop.f32.mrf.mxu0 }
 0x632   : > { %7501 = vst [vmem:[#allocation5_spill] sm:$0xff] %v6530_v60 }
 0x633   : > { %v2893_v26 = vadd.f32 %v7498_v6, %v2375_v54  ;;  %v1727_v54 = vpop.f32.mrf.mxu2  ;;  %v2376_v6 = vadd.f32 %v2267_v7, %v1398_v15 }
 0x634   : > { %v1728_v41 = vadd.f32 %v6483_v19, %v1727_v54 }
 0x635   : > { %v3123_v10 = vrot.slane %v2893_v26, 1  ;;  %v3124_v27 = vrot.slane %v2893_v26, 2  ;;  %v3125_v20 = vrot.slane %v2893_v26, 3  ;;  %3612 = vst [vmem:[#allocation1] ss:$9 sm:$0xff] %v2893_v26  ;;  %v3126_v23 = vrot.slane %v2893_v26, 4 }
 0x636   : > { %4072 = vperm.xlu2 %4598, %v6443_v0   ;;  %v3127_v37 = vrot.slane %v2893_v26, 5  ;;  %v3128_v53 = vrot.slane %v2893_v26, 6  ;;  %v3129_v49 = vrot.slane %v2893_v26, 7  ;;  %v1492_v0 = vadd.f32 %v6386_v57, %v598_v33  ;;  %v7505_v33 = vld [vmem:[#allocation14_spill] sm:$0xff] }
 0x637   : > { %3613 = vst [vmem:[#allocation1 + $0x1] ss:$9 sm:$0xff] %v3123_v10  ;;  %v6535_v10 = vpop.xlane.xlu0 %1086 }
 0x638   : > { %3614 = vst [vmem:[#allocation1 + $0x2] ss:$9 sm:$0xff] %v3124_v27  ;;  %v1556_v26 = vmax.f32 %v1492_v0, 0.0  ;;  %v7503_v27 = vld [vmem:[#allocation76_spill] sm:$0xff] }
 0x639   : > { %3615 = vst [vmem:[#allocation1 + $0x3] ss:$9 sm:$0xff] %v3125_v20  ;;  %v1843_v20 = vmax.f32 %v1728_v41, 0.0  ;;  %v2894_v50 = vadd.f32 %v7503_v27, %v2376_v6  ;;  %v6538_v7 = vpop.permute.xlu2 %2810 }
 0x63a   : > { %3616 = vst [vmem:[#allocation1 + $0x4] ss:$9 sm:$0xff] %v3126_v23  ;;  %1744 = vmatmul.f32.gmra.mxu2 %v1556_v26  ;;  %v601_v23 = vpop.f32.mrf.mxu0  ;;  %v7507_v26 = vld [vmem:[#allocation125_spill] sm:$0xff] }
 0x63b   : > { %3617 = vst [vmem:[#allocation1 + $0x5] ss:$9 sm:$0xff] %v3127_v37  ;;  %2019 = vmatmul.f32.gmra.mxu3 %v1843_v20  ;;  %v1730_v25 = vpop.f32.mrf.mxu2  ;;  %v3130_v37 = vrot.slane %v2894_v50, 1  ;;  %v1493_v15 = vadd.f32 %v6386_v57, %v601_v23  ;;  %v3131_v60 = vrot.slane %v2894_v50, 2  ;;  %v3132_v0 = vrot.slane %v2894_v50, 3  ;;  %v6546_v23 = vpop.xlane.xlu1 %1089 }
 0x63c   : > { %3618 = vst [vmem:[#allocation1 + $0x6] ss:$9 sm:$0xff] %v3128_v53  ;;  %v1976_v20 = vadd.f32 %v6506_v55, %v7507_v26  ;;  %v3133_v27 = vrot.slane %v2894_v50, 4  ;;  %v3134_v62 = vrot.slane %v2894_v50, 5  ;;  %v7510_v26 = vld [vmem:[#allocation106_spill] sm:$0xff] }
 0x63d   : > { %3619 = vst [vmem:[#allocation1 + $0x7] ss:$9 sm:$0xff] %v3129_v49  ;;  %v1731_v49 = vadd.f32 %v6483_v19, %v1730_v25  ;;  %v1557_v6 = vmax.f32 %v1493_v15, 0.0 }
 0x63e   : > { %4081 = vperm.xlu2 %4598, %v6496_v16   ;;  %7502 = vst [vmem:[#allocation85_spill] sm:$0xff] %v6535_v10  ;;  %v7506_v16 = vld [vmem:[#allocation112_spill] sm:$0xff] }
 0x63f   : > { %7504 = vst [vmem:[#allocation61_spill] sm:$0xff] %v6538_v7  ;;  %v1335_v54 = vsub.f32 %v7506_v16, %v7505_v33  ;;  %v1844_v41 = vmax.f32 %v1731_v49, 0.0  ;;  %v2269_v7 = vpop.xlane.xlu0 %2268  ;;  %v3135_v33 = vrot.slane %v2894_v50, 6  ;;  %v2121_v49 = vmax.f32 %v1976_v20, 0.0 }
 0x640   : > { %7508 = vst [vmem:[#allocation88_spill] sm:$0xff] %v6546_v23 }
 0x641   : > { %v1399_v25 = vmul.f32 0.03125, %v1335_v54  ;;  %v6558_v54 = vld [vmem:[%s7250_s8] ss:$0 sm:$0xff] }
 0x642   : > { %1747 = vmatmul.f32.gmra.mxu2 %v1557_v6 }
 0x643   : > { %2022 = vmatmul.f32.gmra.mxu3 %v1844_v41  ;;  %v2377_v16 = vadd.f32 %v2269_v7, %v1399_v25  ;;  %v7511_v25 = vld [vmem:[#allocation130_spill] sm:$0xff] }
 0x644   : > { %v3620_v53 = vld [vmem:[#allocation1] sm:$0xff] }
 0x645   : > { %3621 = vst [vmem:[#allocation1] ss:$9 sm:$0xff] %v2894_v50  ;;  %4087 = vperm.xlu0 %4599, %v3620_v53   ;;  %v3136_v53 = vrot.slane %v2894_v50, 7  ;;  %v2895_v23 = vadd.f32 %v7510_v26, %v2377_v16 }
 0x646   : > { %3622 = vst [vmem:[#allocation1 + $0x1] ss:$9 sm:$0xff] %v3130_v37  ;;  %v7509_v37 = vlaneseq }
 0x647   : > { %3623 = vst [vmem:[#allocation1 + $0x2] ss:$9 sm:$0xff] %v3131_v60  ;;  %v3137_v41 = vrot.slane %v2895_v23, 1  ;;  %v3139_v16 = vrot.slane %v2895_v23, 3  ;;  %v3141_v26 = vrot.slane %v2895_v23, 5 }
 0x648   : > { %3624 = vst [vmem:[#allocation1 + $0x3] ss:$9 sm:$0xff] %v3132_v0  ;;  %v6549_v15 = vand.u32 127, %v7509_v37  ;;  %v4040_v0 = vpop.permute.xlu2 %4039  ;;  %v3143_v37 = vrot.slane %v2895_v23, 7 }
 0x649   : > { %3625 = vst [vmem:[#allocation1 + $0x4] ss:$9 sm:$0xff] %v3133_v27 }
 0x64a   : > { %3626 = vst [vmem:[#allocation1 + $0x5] ss:$9 sm:$0xff] %v3134_v62  ;;  %v6552_v60 = vadd.s32 4294967288, %v6549_v15  ;;  %v2189_v62 = vmul.f32 %v6558_v54, %v2121_v49  ;;  %v3140_v49 = vrot.slane %v2895_v23, 4 }
 0x64b   : > { %3627 = vst [vmem:[#allocation1 + $0x6] ss:$9 sm:$0xff] %v3135_v33  ;;  %v925_v33 = vmul.f32 %v7511_v25, %v7511_v25  ;;  %v1733_v25 = vpop.f32.mrf.mxu2 }
 0x64c   : > { %3628 = vst [vmem:[#allocation1 + $0x7] ss:$9 sm:$0xff] %v3136_v53  ;;  %v4231_v6 = vperm.slane %v4040_v0, %v6552_v60  ;;  %v3138_v53 = vrot.slane %v2895_v23, 2  ;;  %v3142_v0 = vrot.slane %v2895_v23, 6 }
 0x650   : > { %v4037_v50 = vpop.permute.xlu1 %4036 }
 0x651   : > { %v4229_v7 = vperm.slane %v4037_v50, %v6549_v15  ;;  %v1106_v50 = vsel %vm931_vm0, %v925_v33, 0.0 }
 0x653   : > { %v3629_v20 = vld [vmem:[#allocation1] sm:$0xff]  ;;  %v6564_v27 = vsel %vm4232_vm1, %v4231_v6, %v4229_v7  ;;  %2276 = vadd.xlane.f32.xlu1 %v2189_v62  ;;  %v2006_v62 = vadd.f32 %v6506_v55, %v6500_v9  ;;  %v2273_v9 = vpop.xlane.xlu2 %2272 }
 0x654   : > { %3630 = vst [vmem:[#allocation1] ss:$9 sm:$0xff] %v2895_v23  ;;  %v604_v23 = vpop.f32.mrf.mxu0 }
 0x655   : > { %3631 = vst [vmem:[#allocation1 + $0x1] ss:$9 sm:$0xff] %v3137_v41  ;;  %v2131_v6 = vmax.f32 %v2006_v62, 0.0  ;;  %v6572_v41 = vpop.xlane.xlu0 %1095 }
 0x656   : > { %3632 = vst [vmem:[#allocation1 + $0x2] ss:$9 sm:$0xff] %v3138_v53  ;;  %v1734_v53 = vadd.f32 %v6483_v19, %v1733_v25 }
 0x657   : > { %3633 = vst [vmem:[#allocation1 + $0x3] ss:$9 sm:$0xff] %v3139_v16  ;;  %v2199_v7 = vmul.f32 %v6558_v54, %v2131_v6 }
 0x658   : > { %3634 = vst [vmem:[#allocation1 + $0x4] ss:$9 sm:$0xff] %v3140_v49  ;;  %v1845_v16 = vmax.f32 %v1734_v53, 0.0  ;;  %v1494_v49 = vadd.f32 %v6386_v57, %v604_v23 }
 0x659   : > { %3635 = vst [vmem:[#allocation1 + $0x5] ss:$9 sm:$0xff] %v3141_v26 }
 0x65a   : > { %3636 = vst [vmem:[#allocation1 + $0x6] ss:$9 sm:$0xff] %v3142_v0  ;;  %2025 = vmatmul.f32.gmra.mxu3 %v1845_v16  ;;  %v1558_v26 = vmax.f32 %v1494_v49, 0.0  ;;  %v7514_v0 = vld [vmem:[#allocation29_spill] sm:$0xff]  ;;  %v7517_v16 = vld [vmem:[#allocation78_spill] sm:$0xff] }
 0x65b   : > { %3637 = vst [vmem:[#allocation1 + $0x7] ss:$9 sm:$0xff] %v3143_v37  ;;  %1107 = vadd.xlane.f32.xlu1 %v1106_v50  ;;  %v7515_v50 = vld [vmem:[#allocation86_spill] sm:$0xff]  ;;  %v6583_v53 = vpop.xlane.xlu2 %1101 }
 0x65c   : > { %7512 = vst [vmem:[#allocation20_spill] sm:$0xff] %v6572_v41  ;;  %v1336_v62 = vsub.f32 %v7515_v50, %v7514_v0  ;;  %1750 = vmatmul.f32.gmra.mxu2 %v1558_v26  ;;  %v7519_v49 = vld [vmem:[#allocation34_spill] sm:$0xff]  ;;  %v607_v50 = vpop.f32.mrf.mxu0 }
 0x65d   : > { %v6575_v33 = vpop.permute.xlu0 %2804  ;;  %7516 = vst [vmem:[#allocation93_spill] sm:$0xff] %v6583_v53  ;;  %v1337_v0 = vsub.f32 %v7520_v31, %v7519_v49 }
 0x65e   : > { %7513 = vst [vmem:[#allocation64_spill] sm:$0xff] %v6575_v33  ;;  %v1400_v6 = vmul.f32 0.03125, %v1336_v62 }
 0x662   : > { %v6588_v23 = vld [vmem:[#allocation1] sm:$0xff] }
 0x663   : > { %v6594_v49 = vpop.xlane.xlu2 %2278 }
 0x664   : > { %v610_v11 = vpop.f32.mrf.mxu0 }
 0x665   : > { %v6579_v37 = vpop.xlane.xlu0 %2274 }
 0x667   : > { %2296 = vadd.xlane.f32.xlu2 %v2199_v7 }
 0x66d   : > { %v6586_v41 = vpop.xlane.xlu0 %1104 }
 0x66e   : > { %7518 = vst [vmem:[#allocation25_spill] sm:$0xff] %v6586_v41 }
 0x670   : > { %v1736_v41 = vpop.f32.mrf.mxu2 }
 0x671   : > { %v1737_v31 = vadd.f32 %v6483_v19, %v1736_v41 }
 0x674   : > { %4051 = vperm.xlu1 %4597, %v6326_v59  }
 0x67b   : > { %v2271_v25 = vpop.xlane.xlu1 %2270 }
 0x67c   : > { %v2378_v7 = vadd.f32 %v2271_v25, %v1400_v6  ;;  %v1495_v6 = vadd.f32 %v6386_v57, %v607_v50  ;;  %v1846_v50 = vmax.f32 %v1737_v31, 0.0 }
 0x67e   : > { %v2896_v33 = vadd.f32 %v7517_v16, %v2378_v7  ;;  %v1559_v7 = vmax.f32 %v1495_v6, 0.0  ;;  %v1401_v16 = vmul.f32 0.03125, %v1337_v0  ;;  %2028 = vmatmul.f32.gmra.mxu3 %v1846_v50  ;;  %v6607_v50 = vpop.xlane.xlu2 %1110 }
 0x67f   : > { %4090 = vperm.xlu2 %4598, %v3629_v20   ;;  %7524 = vst [vmem:[#allocation84_spill] sm:$0xff] %v6607_v50 }
 0x680   : > { %v3144_v59 = vrot.slane %v2896_v33, 1  ;;  %v3145_v32 = vrot.slane %v2896_v33, 2  ;;  %v3146_v10 = vrot.slane %v2896_v33, 3  ;;  %3639 = vst [vmem:[#allocation1] ss:$9 sm:$0xff] %v2896_v33  ;;  %v3147_v26 = vrot.slane %v2896_v33, 4  ;;  %1753 = vmatmul.f32.gmra.mxu2 %v1559_v7 }
 0x681   : > { %v3148_v62 = vrot.slane %v2896_v33, 5  ;;  %v3149_v25 = vrot.slane %v2896_v33, 6  ;;  %v3150_v20 = vrot.slane %v2896_v33, 7  ;;  %v2379_v53 = vadd.f32 %v2273_v9, %v1401_v16  ;;  %v1739_v9 = vpop.f32.mrf.mxu2 }
 0x682   : > { %3640 = vst [vmem:[#allocation1 + $0x1] ss:$9 sm:$0xff] %v3144_v59  ;;  %v6596_v59 = vpop.xlane.xlu0 %2280  ;;  %v1740_v41 = vadd.f32 %v6483_v19, %v1739_v9 }
 0x683   : > { %3641 = vst [vmem:[#allocation1 + $0x2] ss:$9 sm:$0xff] %v3145_v32  ;;  %v1496_v32 = vadd.f32 %v6386_v57, %v610_v11  ;;  %v1985_v11 = vadd.f32 %v6506_v55, %v6282_v35 }
 0x684   : > { %3642 = vst [vmem:[#allocation1 + $0x3] ss:$9 sm:$0xff] %v3146_v10  ;;  %v7521_v10 = vld [vmem:[#allocation109_spill] sm:$0xff]  ;;  %v1847_v57 = vmax.f32 %v1740_v41, 0.0 }
 0x685   : > { %3643 = vst [vmem:[#allocation1 + $0x4] ss:$9 sm:$0xff] %v3147_v26  ;;  %v2897_v33 = vadd.f32 %v7521_v10, %v2379_v53  ;;  %v1560_v0 = vmax.f32 %v1496_v32, 0.0  ;;  %v6600_v26 = vpop.f32.mrf.mxu3  ;;  %v2124_v41 = vmax.f32 %v1985_v11, 0.0 }
 0x686   : > { %3644 = vst [vmem:[#allocation1 + $0x5] ss:$9 sm:$0xff] %v3148_v62  ;;  %2031 = vmatmul.f32.gmra.mxu3 %v1847_v57  ;;  %v4049_v11 = vpop.permute.xlu2 %4048 }
 0x687   : > { %3645 = vst [vmem:[#allocation1 + $0x6] ss:$9 sm:$0xff] %v3149_v25  ;;  %v3151_v62 = vrot.slane %v2897_v33, 1  ;;  %v7522_v25 = vld [vmem:[#allocation8_spill] sm:$0xff]  ;;  %v3152_v16 = vrot.slane %v2897_v33, 2  ;;  %v3153_v31 = vrot.slane %v2897_v33, 3 }
 0x688   : > { %3646 = vst [vmem:[#allocation1 + $0x7] ss:$9 sm:$0xff] %v3150_v20  ;;  %1756 = vmatmul.f32.gmra.mxu2 %v1560_v0  ;;  %v7523_v20 = vld [vmem:[#allocation123_spill] sm:$0xff]  ;;  %v3154_v53 = vrot.slane %v2897_v33, 4  ;;  %v3155_v10 = vrot.slane %v2897_v33, 5  ;;  %v6611_v0 = vpop.xlane.xlu1 %1098 }
 0x689   : > { %v1338_v7 = vsub.f32 %v7523_v20, %v7522_v25  ;;  %7526 = vst [vmem:[#allocation10_spill] sm:$0xff] %v6611_v0  ;;  %v3156_v25 = vrot.slane %v2897_v33, 6  ;;  %v6615_v20 = vadd.s32 4294967280, %v6549_v15 }
 0x68a   : > { %v6609_v32 = vpop.xlane.xlu0 %1113 }
 0x68b   : > { %7525 = vst [vmem:[#allocation82_spill] sm:$0xff] %v6609_v32  ;;  %v1402_v9 = vmul.f32 0.03125, %v1338_v7  ;;  %v2192_v7 = vmul.f32 %v6558_v54, %v2124_v41 }
 0x68c   : > { %7527 = vst [vmem:[#allocation94_spill] sm:$0xff] %v6615_v20 }
 0x68d   : > { %v2014_v35 = vpop.f32.mrf.mxu3 }
 0x68f   : > { %v3647_v6 = vld [vmem:[#allocation1] sm:$0xff] }
 0x690   : > { %3648 = vst [vmem:[#allocation1] ss:$9 sm:$0xff] %v2897_v33  ;;  %4096 = vperm.xlu0 %4599, %v3647_v6   ;;  %v3157_v6 = vrot.slane %v2897_v33, 7  ;;  %v6623_v33 = vadd.s32 4294967264, %v6549_v15 }
 0x691   : > { %3649 = vst [vmem:[#allocation1 + $0x1] ss:$9 sm:$0xff] %v3151_v62  ;;  %v2380_v62 = vadd.f32 %v6579_v37, %v1402_v9  ;;  %v2015_v37 = vadd.f32 %v6506_v55, %v2014_v35 }
 0x692   : > { %3650 = vst [vmem:[#allocation1 + $0x2] ss:$9 sm:$0xff] %v3152_v16  ;;  %v7528_v16 = vld [vmem:[#allocation92_spill] sm:$0xff]  ;;  %v4046_v57 = vpop.permute.xlu0 %4045 }
 0x693   : > { %3651 = vst [vmem:[#allocation1 + $0x3] ss:$9 sm:$0xff] %v3153_v31  ;;  %v2898_v32 = vadd.f32 %v7528_v16, %v2380_v62  ;;  %v6619_v31 = vadd.s32 4294967272, %v6549_v15  ;;  %v4243_v16 = vperm.slane %v4049_v11, %v6623_v33  ;;  %v2134_v50 = vmax.f32 %v2015_v37, 0.0 }
 0x694   : > { %3652 = vst [vmem:[#allocation1 + $0x4] ss:$9 sm:$0xff] %v3154_v53 }
 0x695   : > { %3653 = vst [vmem:[#allocation1 + $0x5] ss:$9 sm:$0xff] %v3155_v10  ;;  %v3158_v9 = vrot.slane %v2898_v32, 1  ;;  %v3159_v41 = vrot.slane %v2898_v32, 2  ;;  %v3160_v0 = vrot.slane %v2898_v32, 3  ;;  %v3161_v58 = vrot.slane %v2898_v32, 4 }
 0x696   : > { %3654 = vst [vmem:[#allocation1 + $0x6] ss:$9 sm:$0xff] %v3156_v25  ;;  %v928_v25 = vmul.f32 %v6291_v48, %v6291_v48  ;;  %v2202_v29 = vmul.f32 %v6558_v54, %v2134_v50  ;;  %v3164_v5 = vrot.slane %v2898_v32, 7  ;;  %v6645_v50 = vld [vmem:[%s7245_s3] ss:$0 sm:$0xff] }
 0x697   : > { %3655 = vst [vmem:[#allocation1 + $0x7] ss:$9 sm:$0xff] %v3157_v6  ;;  %v4239_v6 = vperm.slane %v4046_v57, %v6619_v31  ;;  %v3162_v57 = vrot.slane %v2898_v32, 5 }
 0x698   : > { %7529 = vst [vmem:[#allocation67_spill] sm:$0xff] %v6619_v31  ;;  %v1115_v11 = vsel %vm931_vm0, %v928_v25, 0.0  ;;  %v613_v25 = vpop.f32.mrf.mxu0  ;;  %vm4386_vm0 = vcmask 1040384  }
 0x699   : > { %7530 = vst [vmem:[#allocation98_spill] sm:$0xff] %v6623_v33 }
 0x69b   : > { %v4043_v53 = vpop.permute.xlu1 %4042 }
 0x69c   : > { %v4235_v10 = vperm.slane %v4043_v53, %v6615_v20 }
 0x69e   : > { %v3656_v62 = vld [vmem:[#allocation1] sm:$0xff]  ;;  %2282 = vadd.xlane.f32.xlu1 %v2192_v7  ;;  %v4237_v35 = vsel %vm4236_vm2, %v4235_v10, %v6564_v27  ;;  %v3163_v7 = vrot.slane %v2898_v32, 6  ;;  %v2017_v27 = vpop.f32.mrf.mxu3  ;;  %v1742_v10 = vpop.f32.mrf.mxu2 }
 0x69f   : > { %3657 = vst [vmem:[#allocation1] ss:$9 sm:$0xff] %v2898_v32  ;;  %v4241_v53 = vsel %vm4240_vm3, %v4239_v6, %v4237_v35  ;;  %v2018_v37 = vadd.f32 %v6506_v55, %v2017_v27  ;;  %v7531_v32 = vld [vmem:[#allocation32_spill] sm:$0xff] }
 0x6a0   : > { %3658 = vst [vmem:[#allocation1 + $0x1] ss:$9 sm:$0xff] %v3158_v9  ;;  %v6635_v48 = vsel %vm4244_vm4, %v4243_v16, %v4241_v53  ;;  %v1743_v9 = vadd.f32 %v6483_v19, %v1742_v10  ;;  %v616_v35 = vpop.f32.mrf.mxu0  ;;  %v7533_v10 = vld [vmem:[#allocation81_spill] sm:$0xff] }
 0x6a1   : > { %3659 = vst [vmem:[#allocation1 + $0x2] ss:$9 sm:$0xff] %v3159_v41  ;;  %v2135_v6 = vmax.f32 %v2018_v37, 0.0  ;;  %v7532_v41 = vld [vmem:[#allocation95_spill] sm:$0xff]  ;;  %v1498_v53 = vadd.f32 %v6645_v50, %v616_v35 }
 0x6a2   : > { %3660 = vst [vmem:[#allocation1 + $0x3] ss:$9 sm:$0xff] %v3160_v0  ;;  %v1848_v0 = vmax.f32 %v1743_v9, 0.0  ;;  %v1339_v16 = vsub.f32 %v7532_v41, %v7531_v32 }
 0x6a3   : > { %3661 = vst [vmem:[#allocation1 + $0x4] ss:$9 sm:$0xff] %v3161_v58  ;;  %v2203_v58 = vmul.f32 %v6558_v54, %v2135_v6 }
 0x6a4   : > { %3662 = vst [vmem:[#allocation1 + $0x5] ss:$9 sm:$0xff] %v3162_v57  ;;  %2034 = vmatmul.f32.gmra.mxu3 %v1848_v0  ;;  %v1403_v57 = vmul.f32 0.03125, %v1339_v16 }
 0x6a5   : > { %3663 = vst [vmem:[#allocation1 + $0x6] ss:$9 sm:$0xff] %v3163_v7  ;;  %v1562_v7 = vmax.f32 %v1498_v53, 0.0 }
 0x6a6   : > { %3664 = vst [vmem:[#allocation1 + $0x7] ss:$9 sm:$0xff] %v3164_v5  ;;  %1116 = vadd.xlane.f32.xlu1 %v1115_v11  ;;  %v1497_v5 = vadd.f32 %v6645_v50, %v613_v25 }
 0x6a8   : > { %2302 = vadd.xlane.f32.xlu2 %v2202_v29  ;;  %v1561_v29 = vmax.f32 %v1497_v5, 0.0  ;;  %v7534_v5 = vld [vmem:[#allocation37_spill] sm:$0xff] }
 0x6aa   : > { %1759 = vmatmul.f32.gmra.mxu2 %v1561_v29  ;;  %v7535_v29 = vld [vmem:[#allocation108_spill] sm:$0xff] }
 0x6ab   : > { %v1340_v32 = vsub.f32 %v7535_v29, %v7534_v5 }
 0x6ad   : > { %v6654_v0 = vld [vmem:[#allocation1] sm:$0xff] }
 0x6b2   : > { %1762 = vmatmul.f32.gmra.mxu2 %v1562_v7 }
 0x6ba   : > { %2304 = vadd.xlane.f32.xlu0 %v2203_v58 }
 0x6bd   : > { %v1745_v37 = vpop.f32.mrf.mxu2 }
 0x6be   : > { %v1746_v6 = vadd.f32 %v6483_v19, %v1745_v37  ;;  %v1404_v37 = vmul.f32 0.03125, %v1340_v32 }
 0x6bf   : > { %4057 = vperm.xlu1 %4597, %v6361_v47   ;;  %v619_v47 = vpop.f32.mrf.mxu0 }
 0x6c0   : > { %4099 = vperm.xlu2 %4598, %v3656_v62   ;;  %v1849_v16 = vmax.f32 %v1746_v6, 0.0  ;;  %v1499_v53 = vadd.f32 %v6645_v50, %v619_v47  ;;  %v2382_v6 = vadd.f32 %v6594_v49, %v1404_v37  ;;  %v1994_v49 = vadd.f32 %v6506_v55, %v6377_v13 }
 0x6c1   : > { %v6676_v13 = vadd.s32 4294967248, %v6549_v15 }
 0x6c2   : > { %2037 = vmatmul.f32.gmra.mxu3 %v1849_v16  ;;  %v7537_v16 = vld [vmem:[#allocation7_spill] sm:$0xff] }
 0x6c3   : > { %v1341_v32 = vsub.f32 %v6179_v44, %v7537_v16  ;;  %v4055_v16 = vpop.permute.xlu2 %4054 }
 0x6c5   : > { %v1405_v37 = vmul.f32 0.03125, %v1341_v32 }
 0x6c6   : > { %v2277_v11 = vpop.xlane.xlu1 %2276 }
 0x6c7   : > { %v2381_v27 = vadd.f32 %v2277_v11, %v1403_v57  ;;  %v1563_v11 = vmax.f32 %v1499_v53, 0.0  ;;  %v622_v32 = vpop.f32.mrf.mxu0 }
 0x6c9   : > { %v2899_v9 = vadd.f32 %v7533_v10, %v2381_v27  ;;  %v6659_v27 = vpop.f32.mrf.mxu3  ;;  %v1748_v10 = vpop.f32.mrf.mxu2  ;;  %1765 = vmatmul.f32.gmra.mxu2 %v1563_v11 }
 0x6ca   : > { %v1749_v5 = vadd.f32 %v6483_v19, %v1748_v10 }
 0x6cb   : > { %v3165_v62 = vrot.slane %v2899_v9, 1  ;;  %v3166_v58 = vrot.slane %v2899_v9, 2  ;;  %v3167_v25 = vrot.slane %v2899_v9, 3  ;;  %3666 = vst [vmem:[#allocation1] ss:$9 sm:$0xff] %v2899_v9  ;;  %v3168_v41 = vrot.slane %v2899_v9, 4 }
 0x6cc   : > { %v3169_v35 = vrot.slane %v2899_v9, 5  ;;  %v3170_v57 = vrot.slane %v2899_v9, 6  ;;  %v3171_v7 = vrot.slane %v2899_v9, 7  ;;  %v1850_v47 = vmax.f32 %v1749_v5, 0.0 }
 0x6cd   : > { %3667 = vst [vmem:[#allocation1 + $0x1] ss:$9 sm:$0xff] %v3165_v62  ;;  %v7536_v62 = vld [vmem:[#allocation116_spill] sm:$0xff] }
 0x6ce   : > { %3668 = vst [vmem:[#allocation1 + $0x2] ss:$9 sm:$0xff] %v3166_v58  ;;  %v2900_v58 = vadd.f32 %v7536_v62, %v2382_v6  ;;  %2040 = vmatmul.f32.gmra.mxu3 %v1850_v47  ;;  %v6669_v11 = vpop.xlane.xlu1 %1107  ;;  %v2383_v6 = vadd.f32 %v6596_v59, %v1405_v37  ;;  %v2127_v47 = vmax.f32 %v1994_v49, 0.0  ;;  %v6673_v62 = vadd.s32 4294967256, %v6549_v15 }
 0x6cf   : > { %3669 = vst [vmem:[#allocation1 + $0x3] ss:$9 sm:$0xff] %v3167_v25  ;;  %v1500_v59 = vadd.f32 %v6645_v50, %v622_v32 }
 0x6d0   : > { %3670 = vst [vmem:[#allocation1 + $0x4] ss:$9 sm:$0xff] %v3168_v41  ;;  %v3172_v25 = vrot.slane %v2900_v58, 1  ;;  %v3173_v41 = vrot.slane %v2900_v58, 2  ;;  %v3177_v10 = vrot.slane %v2900_v58, 6  ;;  %v3178_v44 = vrot.slane %v2900_v58, 7 }
 0x6d1   : > { %3671 = vst [vmem:[#allocation1 + $0x5] ss:$9 sm:$0xff] %v3169_v35  ;;  %v2023_v9 = vpop.f32.mrf.mxu3  ;;  %v3174_v35 = vrot.slane %v2900_v58, 3  ;;  %v1564_v49 = vmax.f32 %v1500_v59, 0.0 }
 0x6d2   : > { %3672 = vst [vmem:[#allocation1 + $0x6] ss:$9 sm:$0xff] %v3170_v57  ;;  %v2024_v53 = vadd.f32 %v6506_v55, %v2023_v9  ;;  %v3175_v57 = vrot.slane %v2900_v58, 4 }
 0x6d3   : > { %3673 = vst [vmem:[#allocation1 + $0x7] ss:$9 sm:$0xff] %v3171_v7  ;;  %v3176_v7 = vrot.slane %v2900_v58, 5  ;;  %1768 = vmatmul.f32.gmra.mxu2 %v1564_v49 }
 0x6d4   : > { %7538 = vst [vmem:[#allocation23_spill] sm:$0xff] %v6669_v11  ;;  %v2137_v5 = vmax.f32 %v2024_v53, 0.0  ;;  %v4251_v53 = vperm.slane %v4055_v16, %v6676_v13 }
 0x6d5   : > { %7539 = vst [vmem:[#allocation72_spill] sm:$0xff] %v6673_v62 }
 0x6d6   : > { %v2205_v9 = vmul.f32 %v6558_v54, %v2137_v5 }
 0x6da   : > { %v3674_v29 = vld [vmem:[#allocation1] sm:$0xff] }
 0x6db   : > { %3675 = vst [vmem:[#allocation1] ss:$9 sm:$0xff] %v2900_v58  ;;  %4105 = vperm.xlu0 %4599, %v3674_v29   ;;  %v2195_v58 = vmul.f32 %v6558_v54, %v2127_v47 }
 0x6dc   : > { %3676 = vst [vmem:[#allocation1 + $0x1] ss:$9 sm:$0xff] %v3172_v25  ;;  %v7540_v25 = vld [vmem:[#allocation83_spill] sm:$0xff] }
 0x6dd   : > { %3677 = vst [vmem:[#allocation1 + $0x2] ss:$9 sm:$0xff] %v3173_v41  ;;  %v2901_v29 = vadd.f32 %v7540_v25, %v2383_v6 }
 0x6de   : > { %3678 = vst [vmem:[#allocation1 + $0x3] ss:$9 sm:$0xff] %v3174_v35 }
 0x6df   : > { %3679 = vst [vmem:[#allocation1 + $0x4] ss:$9 sm:$0xff] %v3175_v57  ;;  %v3179_v57 = vrot.slane %v2901_v29, 1  ;;  %v3181_v5 = vrot.slane %v2901_v29, 3  ;;  %v3182_v6 = vrot.slane %v2901_v29, 4  ;;  %v3183_v47 = vrot.slane %v2901_v29, 5  ;;  %v1751_v59 = vpop.f32.mrf.mxu2 }
 0x6e0   : > { %3680 = vst [vmem:[#allocation1 + $0x5] ss:$9 sm:$0xff] %v3176_v7  ;;  %v3184_v25 = vrot.slane %v2901_v29, 6  ;;  %v3185_v32 = vrot.slane %v2901_v29, 7 }
 0x6e1   : > { %3681 = vst [vmem:[#allocation1 + $0x6] ss:$9 sm:$0xff] %v3177_v10  ;;  %v3180_v10 = vrot.slane %v2901_v29, 2 }
 0x6e2   : > { %3682 = vst [vmem:[#allocation1 + $0x7] ss:$9 sm:$0xff] %v3178_v44 }
 0x6e6   : > { %v4052_v41 = vpop.permute.xlu1 %4051 }
 0x6e7   : > { %v4247_v35 = vperm.slane %v4052_v41, %v6673_v62 }
 0x6e9   : > { %2308 = vadd.xlane.f32.xlu2 %v2205_v9  ;;  %v3683_v7 = vld [vmem:[#allocation1] sm:$0xff]  ;;  %v4249_v37 = vsel %vm4248_vm5, %v4247_v35, %v6635_v48  ;;  %2288 = vadd.xlane.f32.xlu1 %v2195_v58  ;;  %v625_v9 = vpop.f32.mrf.mxu0  ;;  %v2026_v58 = vpop.f32.mrf.mxu3  ;;  %v1752_v35 = vadd.f32 %v6483_v19, %v1751_v59 }
 0x6ea   : > { %3684 = vst [vmem:[#allocation1] ss:$9 sm:$0xff] %v2901_v29  ;;  %v6687_v44 = vsel %vm4252_vm6, %v4251_v53, %v4249_v37  ;;  %v1501_v16 = vadd.f32 %v6645_v50, %v625_v9  ;;  %v2027_v41 = vadd.f32 %v6506_v55, %v2026_v58 }
 0x6eb   : > { %3685 = vst [vmem:[#allocation1 + $0x1] ss:$9 sm:$0xff] %v3179_v57  ;;  %v1851_v49 = vmax.f32 %v1752_v35, 0.0 }
 0x6ec   : > { %3686 = vst [vmem:[#allocation1 + $0x2] ss:$9 sm:$0xff] %v3180_v10  ;;  %v1565_v48 = vmax.f32 %v1501_v16, 0.0  ;;  %v2138_v53 = vmax.f32 %v2027_v41, 0.0  ;;  %v7543_v41 = vld [vmem:[#allocation120_spill] sm:$0xff] }
 0x6ed   : > { %3687 = vst [vmem:[#allocation1 + $0x3] ss:$9 sm:$0xff] %v3181_v5  ;;  %2043 = vmatmul.f32.gmra.mxu3 %v1851_v49  ;;  %v7541_v5 = vld [vmem:[#allocation35_spill] sm:$0xff] }
 0x6ee   : > { %3688 = vst [vmem:[#allocation1 + $0x4] ss:$9 sm:$0xff] %v3182_v6  ;;  %1771 = vmatmul.f32.gmra.mxu2 %v1565_v48  ;;  %v2206_v57 = vmul.f32 %v6558_v54, %v2138_v53  ;;  %v7542_v6 = vld [vmem:[#allocation105_spill] sm:$0xff] }
 0x6ef   : > { %3689 = vst [vmem:[#allocation1 + $0x5] ss:$9 sm:$0xff] %v3183_v47  ;;  %v1342_v47 = vsub.f32 %v7542_v6, %v7541_v5 }
 0x6f0   : > { %3690 = vst [vmem:[#allocation1 + $0x6] ss:$9 sm:$0xff] %v3184_v25 }
 0x6f1   : > { %3691 = vst [vmem:[#allocation1 + $0x7] ss:$9 sm:$0xff] %v3185_v32  ;;  %v628_v10 = vpop.f32.mrf.mxu0 }
 0x6f2   : > { %v1502_v25 = vadd.f32 %v6645_v50, %v628_v10  ;;  %v7545_v10 = vld [vmem:[#allocation114_spill] sm:$0xff] }
 0x6f4   : > { %v1566_v16 = vmax.f32 %v1502_v25, 0.0  ;;  %v2285_v25 = vpop.xlane.xlu2 %2284 }
 0x6f6   : > { %1774 = vmatmul.f32.gmra.mxu2 %v1566_v16 }
 0x6f8   : > { %v6703_v53 = vld [vmem:[#allocation1] sm:$0xff] }
 0x701   : > { %4108 = vperm.xlu2 %4598, %v3683_v7   ;;  %v1406_v7 = vmul.f32 0.03125, %v1342_v47  ;;  %v6699_v32 = vpop.f32.mrf.mxu3 }
 0x702   : > { %4066 = vperm.xlu1 %4597, %v6424_v45  }
 0x703   : > { %v1754_v29 = vpop.f32.mrf.mxu2 }
 0x704   : > { %v1755_v37 = vadd.f32 %v6483_v19, %v1754_v29 }
 0x705   : > { %2310 = vadd.xlane.f32.xlu0 %v2206_v57 }
 0x706   : > { %v1852_v9 = vmax.f32 %v1755_v37, 0.0  ;;  %v7544_v37 = vld [vmem:[#allocation40_spill] sm:$0xff] }
 0x707   : > { %v1343_v5 = vsub.f32 %v7545_v10, %v7544_v37  ;;  %v7547_v10 = vld [vmem:[#allocation17_spill] sm:$0xff] }
 0x708   : > { %2046 = vmatmul.f32.gmra.mxu3 %v1852_v9 }
 0x709   : > { %v2032_v16 = vpop.f32.mrf.mxu3 }
 0x70a   : > { %4075 = vperm.xlu1 %4597, %v6469_v63  }
 0x70b   : > { %v1757_v48 = vpop.f32.mrf.mxu2 }
 0x70c   : > { %v1758_v63 = vadd.f32 %v6483_v19, %v1757_v48  ;;  %v2033_v48 = vadd.f32 %v6506_v55, %v2032_v16 }
 0x70e   : > { %v1853_v35 = vmax.f32 %v1758_v63, 0.0  ;;  %v7546_v63 = vld [vmem:[#allocation99_spill] sm:$0xff] }
 0x710   : > { %2049 = vmatmul.f32.gmra.mxu3 %v1853_v35  ;;  %v2140_v35 = vmax.f32 %v2033_v48, 0.0 }
 0x711   : > { %v2283_v45 = vpop.xlane.xlu1 %2282 }
 0x712   : > { %v2384_v58 = vadd.f32 %v2283_v45, %v1406_v7  ;;  %v1407_v7 = vmul.f32 0.03125, %v1343_v5 }
 0x714   : > { %v2902_v59 = vadd.f32 %v7543_v41, %v2384_v58  ;;  %v2385_v45 = vadd.f32 %v2285_v25, %v1407_v7  ;;  %v2287_v58 = vpop.xlane.xlu0 %2286 }
 0x716   : > { %v3186_v49 = vrot.slane %v2902_v59, 1  ;;  %v3187_v57 = vrot.slane %v2902_v59, 2  ;;  %v3188_v29 = vrot.slane %v2902_v59, 3  ;;  %3693 = vst [vmem:[#allocation1] ss:$9 sm:$0xff] %v2902_v59  ;;  %v3189_v6 = vrot.slane %v2902_v59, 4 }
 0x717   : > { %v3190_v47 = vrot.slane %v2902_v59, 5  ;;  %v3191_v9 = vrot.slane %v2902_v59, 6  ;;  %v3192_v19 = vrot.slane %v2902_v59, 7  ;;  %v2903_v41 = vadd.f32 %v7546_v63, %v2385_v45 }
 0x718   : > { %3694 = vst [vmem:[#allocation1 + $0x1] ss:$9 sm:$0xff] %v3186_v49  ;;  %v1344_v59 = vsub.f32 %v6198_v38, %v7547_v10 }
 0x719   : > { %3695 = vst [vmem:[#allocation1 + $0x2] ss:$9 sm:$0xff] %v3187_v57  ;;  %v3193_v37 = vrot.slane %v2903_v41, 1  ;;  %v2208_v57 = vmul.f32 %v6558_v54, %v2140_v35  ;;  %v3195_v5 = vrot.slane %v2903_v41, 3  ;;  %v6718_v16 = vpop.xlane.xlu1 %1116  ;;  %v3198_v7 = vrot.slane %v2903_v41, 6 }
 0x71a   : > { %3696 = vst [vmem:[#allocation1 + $0x3] ss:$9 sm:$0xff] %v3188_v29  ;;  %v3194_v29 = vrot.slane %v2903_v41, 2  ;;  %v1408_v38 = vmul.f32 0.03125, %v1344_v59  ;;  %v3199_v45 = vrot.slane %v2903_v41, 7  ;;  %v6721_v35 = vadd.s32 4294967240, %v6549_v15 }
 0x71b   : > { %3697 = vst [vmem:[#allocation1 + $0x4] ss:$9 sm:$0xff] %v3189_v6  ;;  %v2003_v6 = vadd.f32 %v6506_v55, %v6492_v39  ;;  %v631_v39 = vpop.f32.mrf.mxu0 }
 0x71c   : > { %3698 = vst [vmem:[#allocation1 + $0x5] ss:$9 sm:$0xff] %v3190_v47  ;;  %v3196_v47 = vrot.slane %v2903_v41, 4  ;;  %v6716_v25 = vpop.xlane.xlu0 %1122  ;;  %v2386_v48 = vadd.f32 %v2287_v58, %v1408_v38 }
 0x71d   : > { %3699 = vst [vmem:[#allocation1 + $0x6] ss:$9 sm:$0xff] %v3191_v9  ;;  %v6714_v9 = vpop.xlane.xlu2 %1119  ;;  %v2130_v63 = vmax.f32 %v2003_v6, 0.0 }
 0x71e   : > { %3700 = vst [vmem:[#allocation1 + $0x7] ss:$9 sm:$0xff] %v3192_v19  ;;  %v3197_v19 = vrot.slane %v2903_v41, 5 }
 0x71f   : > { %7548 = vst [vmem:[#allocation100_spill] sm:$0xff] %v6714_v9 }
 0x720   : > { %7549 = vst [vmem:[#allocation28_spill] sm:$0xff] %v6716_v25 }
 0x721   : > { %7550 = vst [vmem:[#allocation90_spill] sm:$0xff] %v6718_v16 }
 0x724   : > { %v4061_v59 = vpop.permute.xlu0 %4060 }
 0x725   : > { %v3701_v49 = vld [vmem:[#allocation1] sm:$0xff]  ;;  %v4064_v6 = vpop.permute.xlu2 %4063 }
 0x726   : > { %3702 = vst [vmem:[#allocation1] ss:$9 sm:$0xff] %v2903_v41  ;;  %4114 = vperm.xlu0 %4599, %v3701_v49   ;;  %v7551_v49 = vld [vmem:[#allocation89_spill] sm:$0xff]  ;;  %v6730_v41 = vadd.s32 4294967224, %v6549_v15 }
 0x727   : > { %3703 = vst [vmem:[#allocation1 + $0x1] ss:$9 sm:$0xff] %v3193_v37  ;;  %v1503_v37 = vadd.f32 %v6645_v50, %v631_v39  ;;  %v2904_v10 = vadd.f32 %v7551_v49, %v2386_v48  ;;  %v634_v49 = vpop.f32.mrf.mxu0 }
 0x728   : > { %3704 = vst [vmem:[#allocation1 + $0x2] ss:$9 sm:$0xff] %v3194_v29  ;;  %v6726_v29 = vadd.s32 4294967232, %v6549_v15  ;;  %v4263_v48 = vperm.slane %v4064_v6, %v6730_v41 }
 0x729   : > { %3705 = vst [vmem:[#allocation1 + $0x3] ss:$9 sm:$0xff] %v3195_v5  ;;  %v1567_v5 = vmax.f32 %v1503_v37, 0.0  ;;  %v3202_v39 = vrot.slane %v2904_v10, 3  ;;  %v3205_v25 = vrot.slane %v2904_v10, 6  ;;  %v3206_v9 = vrot.slane %v2904_v10, 7 }
 0x72a   : > { %2314 = vadd.xlane.f32.xlu2 %v2208_v57  ;;  %3706 = vst [vmem:[#allocation1 + $0x4] ss:$9 sm:$0xff] %v3196_v47  ;;  %v2198_v57 = vmul.f32 %v6558_v54, %v2130_v63  ;;  %v4259_v38 = vperm.slane %v4061_v59, %v6726_v29 }
 0x72b   : > { %3707 = vst [vmem:[#allocation1 + $0x5] ss:$9 sm:$0xff] %v3197_v19  ;;  %1777 = vmatmul.f32.gmra.mxu2 %v1567_v5  ;;  %v3200_v19 = vrot.slane %v2904_v10, 1  ;;  %v1504_v5 = vadd.f32 %v6645_v50, %v634_v49 }
 0x72c   : > { %3708 = vst [vmem:[#allocation1 + $0x6] ss:$9 sm:$0xff] %v3198_v7 }
 0x72d   : > { %3709 = vst [vmem:[#allocation1 + $0x7] ss:$9 sm:$0xff] %v3199_v45  ;;  %v3201_v45 = vrot.slane %v2904_v10, 2  ;;  %v1568_v6 = vmax.f32 %v1504_v5, 0.0 }
 0x731   : > { %v4058_v58 = vpop.permute.xlu1 %4057 }
 0x732   : > { %v4255_v47 = vperm.slane %v4058_v58, %v6721_v35  ;;  %v3203_v58 = vrot.slane %v2904_v10, 4 }
 0x733   : > { %1780 = vmatmul.f32.gmra.mxu2 %v1568_v6  ;;  %v7553_v6 = vld [vmem:[#allocation115_spill] sm:$0xff] }
 0x734   : > { %v3710_v7 = vld [vmem:[#allocation1] sm:$0xff]  ;;  %2294 = vadd.xlane.f32.xlu1 %v2198_v57  ;;  %v4257_v63 = vsel %vm4256_vm7, %v4255_v47, %v6687_v44  ;;  %v3204_v57 = vrot.slane %v2904_v10, 5  ;;  %v637_v44 = vpop.f32.mrf.mxu0 }
 0x735   : > { %3711 = vst [vmem:[#allocation1] ss:$9 sm:$0xff] %v2904_v10  ;;  %v4261_v37 = vsel %vm4260_vm8, %v4259_v38, %v4257_v63  ;;  %v1505_v47 = vadd.f32 %v6645_v50, %v637_v44  ;;  %v6747_v63 = vld [vmem:[%s7247_s5] ss:$0 sm:$0xff] }
 0x736   : > { %3712 = vst [vmem:[#allocation1 + $0x1] ss:$9 sm:$0xff] %v3200_v19  ;;  %v6740_v59 = vsel %vm4264_vm9, %v4263_v48, %v4261_v37  ;;  %v2035_v19 = vpop.f32.mrf.mxu3 }
 0x737   : > { %3713 = vst [vmem:[#allocation1 + $0x2] ss:$9 sm:$0xff] %v3201_v45  ;;  %v1569_v38 = vmax.f32 %v1505_v47, 0.0  ;;  %v1760_v45 = vpop.f32.mrf.mxu2  ;;  %v2036_v48 = vadd.f32 %v6506_v55, %v2035_v19 }
 0x738   : > { %3714 = vst [vmem:[#allocation1 + $0x3] ss:$9 sm:$0xff] %v3202_v39  ;;  %v1761_v10 = vadd.f32 %v6747_v63, %v1760_v45 }
 0x739   : > { %3715 = vst [vmem:[#allocation1 + $0x4] ss:$9 sm:$0xff] %v3203_v58  ;;  %v2141_v39 = vmax.f32 %v2036_v48, 0.0 }
 0x73a   : > { %3716 = vst [vmem:[#allocation1 + $0x5] ss:$9 sm:$0xff] %v3204_v57  ;;  %v7552_v57 = vld [vmem:[#allocation38_spill] sm:$0xff] }
 0x73b   : > { %3717 = vst [vmem:[#allocation1 + $0x6] ss:$9 sm:$0xff] %v3205_v25  ;;  %1783 = vmatmul.f32.gmra.mxu2 %v1569_v38  ;;  %v1854_v25 = vmax.f32 %v1761_v10, 0.0  ;;  %v2209_v37 = vmul.f32 %v6558_v54, %v2141_v39  ;;  %v1345_v44 = vsub.f32 %v7553_v6, %v7552_v57 }
 0x73c   : > { %3718 = vst [vmem:[#allocation1 + $0x7] ss:$9 sm:$0xff] %v3206_v9 }
 0x73d   : > { %2052 = vmatmul.f32.gmra.mxu3 %v1854_v25  ;;  %v1409_v19 = vmul.f32 0.03125, %v1345_v44  ;;  %v7554_v25 = vld [vmem:[#allocation126_spill] sm:$0xff] }
 0x73f   : > { %v1763_v9 = vpop.f32.mrf.mxu2 }
 0x742   : > { %4117 = vperm.xlu2 %4598, %v3710_v7   ;;  %v1764_v7 = vadd.f32 %v6747_v63, %v1763_v9 }
 0x743   : > { %v6765_v9 = vld [vmem:[#allocation1] sm:$0xff] }
 0x744   : > { %v1855_v49 = vmax.f32 %v1764_v7, 0.0 }
 0x745   : > { %v6753_v55 = vpop.f32.mrf.mxu3 }
 0x746   : > { %2055 = vmatmul.f32.gmra.mxu3 %v1855_v49 }
 0x74c   : > { %v1766_v58 = vpop.f32.mrf.mxu2 }
 0x74d   : > { %4084 = vperm.xlu1 %4597, %v6525_v2   ;;  %v1767_v5 = vadd.f32 %v6747_v63, %v1766_v58  ;;  %v6761_v2 = vld [vmem:[%s7249_s7] ss:$0 sm:$0xff] }
 0x74e   : > { %v7555_v58 = vld [vmem:[#allocation43_spill] sm:$0xff] }
 0x74f   : > { %v1856_v47 = vmax.f32 %v1767_v5, 0.0  ;;  %v7556_v5 = vld [vmem:[#allocation121_spill] sm:$0xff] }
 0x750   : > { %2316 = vadd.xlane.f32.xlu0 %v2209_v37  ;;  %v1346_v57 = vsub.f32 %v7556_v5, %v7555_v58  ;;  %v7557_v5 = vld [vmem:[#allocation91_spill] sm:$0xff] }
 0x751   : > { %2058 = vmatmul.f32.gmra.mxu3 %v1856_v47  ;;  %v2041_v38 = vpop.f32.mrf.mxu3 }
 0x752   : > { %v2042_v10 = vadd.f32 %v6761_v2, %v2041_v38  ;;  %v1410_v38 = vmul.f32 0.03125, %v1346_v57 }
 0x754   : > { %v2143_v44 = vmax.f32 %v2042_v10, 0.0  ;;  %v2293_v10 = vpop.xlane.xlu0 %2292 }
 0x75c   : > { %v2289_v45 = vpop.xlane.xlu1 %2288 }
 0x75d   : > { %v2387_v48 = vadd.f32 %v2289_v45, %v1409_v19  ;;  %v2291_v45 = vpop.xlane.xlu2 %2290 }
 0x75e   : > { %v2388_v11 = vadd.f32 %v2291_v45, %v1410_v38 }
 0x75f   : > { %v2905_v39 = vadd.f32 %v7554_v25, %v2387_v48  ;;  %v2211_v48 = vmul.f32 %v6558_v54, %v2143_v44  ;;  %v640_v25 = vpop.f32.mrf.mxu0  ;;  %v7558_v44 = vld [vmem:[#allocation6_spill] sm:$0xff] }
 0x760   : > { %v1506_v58 = vadd.f32 %v6645_v50, %v640_v25  ;;  %v6782_v25 = vadd.s32 4294967208, %v6549_v15 }
 0x761   : > { %v3207_v37 = vrot.slane %v2905_v39, 1  ;;  %v3208_v7 = vrot.slane %v2905_v39, 2  ;;  %v3209_v49 = vrot.slane %v2905_v39, 3  ;;  %3720 = vst [vmem:[#allocation1] ss:$9 sm:$0xff] %v2905_v39  ;;  %v3210_v6 = vrot.slane %v2905_v39, 4 }
 0x762   : > { %v3211_v47 = vrot.slane %v2905_v39, 5  ;;  %v3212_v19 = vrot.slane %v2905_v39, 6  ;;  %v3213_v16 = vrot.slane %v2905_v39, 7  ;;  %v2906_v39 = vadd.f32 %v7557_v5, %v2388_v11 }
 0x763   : > { %3721 = vst [vmem:[#allocation1 + $0x1] ss:$9 sm:$0xff] %v3207_v37  ;;  %v2012_v37 = vadd.f32 %v6761_v2, %v6600_v26  ;;  %v6778_v26 = vadd.s32 4294967216, %v6549_v15 }
 0x764   : > { %3722 = vst [vmem:[#allocation1 + $0x2] ss:$9 sm:$0xff] %v3208_v7  ;;  %v1570_v7 = vmax.f32 %v1506_v58, 0.0  ;;  %v3216_v58 = vrot.slane %v2906_v39, 3  ;;  %v3219_v17 = vrot.slane %v2906_v39, 6  ;;  %v3220_v21 = vrot.slane %v2906_v39, 7 }
 0x765   : > { %3723 = vst [vmem:[#allocation1 + $0x3] ss:$9 sm:$0xff] %v3209_v49  ;;  %v1769_v49 = vpop.f32.mrf.mxu2  ;;  %v4073_v5 = vpop.permute.xlu2 %4072 }
 0x766   : > { %3724 = vst [vmem:[#allocation1 + $0x4] ss:$9 sm:$0xff] %v3210_v6  ;;  %1786 = vmatmul.f32.gmra.mxu2 %v1570_v7  ;;  %v1770_v57 = vadd.f32 %v6747_v63, %v1769_v49  ;;  %v2133_v6 = vmax.f32 %v2012_v37, 0.0  ;;  %v4070_v37 = vpop.permute.xlu0 %4069  ;;  %v6785_v7 = vadd.s32 4294967200, %v6549_v15 }
 0x767   : > { %3725 = vst [vmem:[#allocation1 + $0x5] ss:$9 sm:$0xff] %v3211_v47  ;;  %v1347_v47 = vsub.f32 %v6209_v4, %v7558_v44  ;;  %v643_v38 = vpop.f32.mrf.mxu0  ;;  %v3217_v4 = vrot.slane %v2906_v39, 4  ;;  %v4271_v14 = vperm.slane %v4070_v37, %v6782_v25 }
 0x768   : > { %3726 = vst [vmem:[#allocation1 + $0x6] ss:$9 sm:$0xff] %v3212_v19  ;;  %v3214_v19 = vrot.slane %v2906_v39, 1  ;;  %v1857_v45 = vmax.f32 %v1770_v57, 0.0  ;;  %v1507_v11 = vadd.f32 %v6645_v50, %v643_v38  ;;  %v2201_v49 = vmul.f32 %v6558_v54, %v2133_v6 }
 0x769   : > { %3727 = vst [vmem:[#allocation1 + $0x7] ss:$9 sm:$0xff] %v3213_v16  ;;  %v1411_v44 = vmul.f32 0.03125, %v1347_v47  ;;  %v4275_v54 = vperm.slane %v4073_v5, %v6785_v7  ;;  %v6803_v5 = vadd.s32 4294967176, %v6549_v15 }
 0x76a   : > { %2061 = vmatmul.f32.gmra.mxu3 %v1857_v45  ;;  %v1571_v57 = vmax.f32 %v1507_v11, 0.0  ;;  %v7559_v11 = vld [vmem:[#allocation129_spill] sm:$0xff] }
 0x76b   : > { %2320 = vadd.xlane.f32.xlu2 %v2211_v48  ;;  %v3215_v48 = vrot.slane %v2906_v39, 2  ;;  %v2389_v45 = vadd.f32 %v2293_v10, %v1411_v44  ;;  %v6797_v10 = vadd.s32 4294967192, %v6549_v15  ;;  %7560 = vst [vmem:[#allocation69_spill] sm:$0xff] %v6803_v5 }
 0x76e   : > { %1789 = vmatmul.f32.gmra.mxu2 %v1571_v57 }
 0x770   : > { %v3728_v16 = vld [vmem:[#allocation1] sm:$0xff] }
 0x771   : > { %3729 = vst [vmem:[#allocation1] ss:$9 sm:$0xff] %v2906_v39  ;;  %4123 = vperm.xlu0 %4599, %v3728_v16   ;;  %v3218_v16 = vrot.slane %v2906_v39, 5  ;;  %v6800_v39 = vadd.s32 4294967184, %v6549_v15  ;;  %v1772_v37 = vpop.f32.mrf.mxu2 }
 0x772   : > { %3730 = vst [vmem:[#allocation1 + $0x1] ss:$9 sm:$0xff] %v3214_v19 }
 0x773   : > { %3731 = vst [vmem:[#allocation1 + $0x2] ss:$9 sm:$0xff] %v3215_v48 }
 0x774   : > { %3732 = vst [vmem:[#allocation1 + $0x3] ss:$9 sm:$0xff] %v3216_v58  ;;  %v4067_v38 = vpop.permute.xlu1 %4066  ;;  %v2907_v58 = vadd.f32 %v7559_v11, %v2389_v45 }
 0x775   : > { %3733 = vst [vmem:[#allocation1 + $0x4] ss:$9 sm:$0xff] %v3217_v4  ;;  %v4267_v19 = vperm.slane %v4067_v38, %v6778_v26  ;;  %v646_v4 = vpop.f32.mrf.mxu0 }
 0x776   : > { %3734 = vst [vmem:[#allocation1 + $0x5] ss:$9 sm:$0xff] %v3218_v16  ;;  %v3221_v57 = vrot.slane %v2907_v58, 1  ;;  %v3223_v11 = vrot.slane %v2907_v58, 3 }
 0x777   : > { %3735 = vst [vmem:[#allocation1 + $0x6] ss:$9 sm:$0xff] %v3219_v17  ;;  %v4269_v6 = vsel %vm4268_vm10, %v4267_v19, %v6740_v59  ;;  %2300 = vadd.xlane.f32.xlu1 %v2201_v49  ;;  %v4079_v17 = vpop.permute.xlu0 %4078  ;;  %v4082_v49 = vpop.permute.xlu2 %4081 }
 0x778   : > { %3736 = vst [vmem:[#allocation1 + $0x7] ss:$9 sm:$0xff] %v3220_v21  ;;  %v4273_v47 = vsel %vm4272_vm11, %v4271_v14, %v4269_v6  ;;  %v1773_v21 = vadd.f32 %v6747_v63, %v1772_v37  ;;  %v1508_v14 = vadd.f32 %v6645_v50, %v646_v4  ;;  %v4283_v16 = vperm.slane %v4079_v17, %v6800_v39 }
 0x779   : > { %v4277_v48 = vsel %vm4276_vm12, %v4275_v54, %v4273_v47  ;;  %v3222_v54 = vrot.slane %v2907_v58, 2  ;;  %v4287_v6 = vperm.slane %v4082_v49, %v6803_v5  ;;  %v3224_v4 = vrot.slane %v2907_v58, 4 }
 0x77a   : > { %v1858_v19 = vmax.f32 %v1773_v21, 0.0  ;;  %v1572_v45 = vmax.f32 %v1508_v14, 0.0  ;;  %v3226_v21 = vrot.slane %v2907_v58, 6  ;;  %v3227_v14 = vrot.slane %v2907_v58, 7 }
 0x77c   : > { %v4076_v59 = vpop.permute.xlu1 %4075  ;;  %2064 = vmatmul.f32.gmra.mxu3 %v1858_v19  ;;  %1792 = vmatmul.f32.gmra.mxu2 %v1572_v45  ;;  %v6823_v45 = vld [vmem:[%s7250_s8] ss:$0 sm:$0xff] }
 0x77d   : > { %v4279_v44 = vperm.slane %v4076_v59, %v6797_v10  ;;  %v3225_v59 = vrot.slane %v2907_v58, 5 }
 0x77f   : > { %v3737_v38 = vld [vmem:[#allocation1] sm:$0xff]  ;;  %v4281_v47 = vsel %vm4280_vm13, %v4279_v44, %v4277_v48  ;;  %v2044_v48 = vpop.f32.mrf.mxu3 }
 0x780   : > { %3738 = vst [vmem:[#allocation1] ss:$9 sm:$0xff] %v2907_v58  ;;  %v4285_v37 = vsel %vm4284_vm14, %v4283_v16, %v4281_v47  ;;  %v2045_v49 = vadd.f32 %v6761_v2, %v2044_v48  ;;  %v1775_v16 = vpop.f32.mrf.mxu2  ;;  %v7563_v47 = vld [vmem:[#allocation127_spill] sm:$0xff]  ;;  %v7564_v48 = vld [vmem:[#allocation110_spill] sm:$0xff] }
 0x781   : > { %3739 = vst [vmem:[#allocation1 + $0x1] ss:$9 sm:$0xff] %v3221_v57  ;;  %v6813_v17 = vsel %vm4288_vm15, %v4287_v6, %v4285_v37 }
 0x782   : > { %3740 = vst [vmem:[#allocation1 + $0x2] ss:$9 sm:$0xff] %v3222_v54  ;;  %v2144_v44 = vmax.f32 %v2045_v49, 0.0 }
 0x783   : > { %4126 = vperm.xlu2 %4598, %v3737_v38   ;;  %7561 = vst [vmem:[#allocation9_spill] sm:$0xff] %v6813_v17  ;;  %v1776_v38 = vadd.f32 %v6747_v63, %v1775_v16 }
 0x784   : > { %3741 = vst [vmem:[#allocation1 + $0x3] ss:$9 sm:$0xff] %v3223_v11  ;;  %v2212_v58 = vmul.f32 %v6823_v45, %v2144_v44 }
 0x785   : > { %3742 = vst [vmem:[#allocation1 + $0x4] ss:$9 sm:$0xff] %v3224_v4  ;;  %v1859_v19 = vmax.f32 %v1776_v38, 0.0 }
 0x786   : > { %3743 = vst [vmem:[#allocation1 + $0x5] ss:$9 sm:$0xff] %v3225_v59 }
 0x787   : > { %3744 = vst [vmem:[#allocation1 + $0x6] ss:$9 sm:$0xff] %v3226_v21  ;;  %2067 = vmatmul.f32.gmra.mxu3 %v1859_v19 }
 0x788   : > { %3745 = vst [vmem:[#allocation1 + $0x7] ss:$9 sm:$0xff] %v3227_v14 }
 0x78b   : > { %v6817_v57 = vpop.f32.mrf.mxu3 }
 0x78f   : > { %v6831_v16 = vld [vmem:[#allocation1] sm:$0xff] }
 0x790   : > { %4093 = vperm.xlu1 %4597, %v6588_v23   ;;  %v7562_v23 = vld [vmem:[#allocation41_spill] sm:$0xff] }
 0x791   : > { %v1348_v11 = vsub.f32 %v7563_v47, %v7562_v23 }
 0x793   : > { %v2050_v54 = vpop.f32.mrf.mxu3  ;;  %v1412_v4 = vmul.f32 0.03125, %v1348_v11  ;;  %v2297_v11 = vpop.xlane.xlu2 %2296 }
 0x794   : > { %v2051_v6 = vadd.f32 %v6761_v2, %v2050_v54  ;;  %v7566_v54 = vld [vmem:[#allocation128_spill] sm:$0xff] }
 0x796   : > { %v2146_v37 = vmax.f32 %v2051_v6, 0.0  ;;  %v2021_v6 = vadd.f32 %v6761_v2, %v6659_v27 }
 0x798   : > { %v2214_v59 = vmul.f32 %v6823_v45, %v2146_v37 }
 0x79b   : > { %2322 = vadd.xlane.f32.xlu0 %v2212_v58  ;;  %v7565_v58 = vld [vmem:[#allocation45_spill] sm:$0xff] }
 0x79c   : > { %v1349_v17 = vsub.f32 %v7566_v54, %v7565_v58  ;;  %v2299_v58 = vpop.xlane.xlu0 %2298 }
 0x7a7   : > { %v2295_v21 = vpop.xlane.xlu1 %2294 }
 0x7a8   : > { %v2390_v14 = vadd.f32 %v2295_v21, %v1412_v4  ;;  %v1413_v4 = vmul.f32 0.03125, %v1349_v17  ;;  %v649_v21 = vpop.f32.mrf.mxu0 }
 0x7aa   : > { %v2908_v49 = vadd.f32 %v7564_v48, %v2390_v14  ;;  %v2391_v14 = vadd.f32 %v2297_v11, %v1413_v4  ;;  %v1509_v48 = vadd.f32 %v6645_v50, %v649_v21  ;;  %v4088_v4 = vpop.permute.xlu0 %4087 }
 0x7ac   : > { %2326 = vadd.xlane.f32.xlu2 %v2214_v59  ;;  %v3228_v44 = vrot.slane %v2908_v49, 1  ;;  %v3229_v38 = vrot.slane %v2908_v49, 2  ;;  %v3230_v19 = vrot.slane %v2908_v49, 3  ;;  %3747 = vst [vmem:[#allocation1] ss:$9 sm:$0xff] %v2908_v49  ;;  %v3231_v5 = vrot.slane %v2908_v49, 4 }
 0x7ad   : > { %v3232_v23 = vrot.slane %v2908_v49, 5  ;;  %v3233_v47 = vrot.slane %v2908_v49, 6  ;;  %v3234_v37 = vrot.slane %v2908_v49, 7  ;;  %v2136_v59 = vmax.f32 %v2021_v6, 0.0 }
 0x7ae   : > { %3748 = vst [vmem:[#allocation1 + $0x1] ss:$9 sm:$0xff] %v3228_v44  ;;  %v1573_v54 = vmax.f32 %v1509_v48, 0.0  ;;  %v1778_v44 = vpop.f32.mrf.mxu2 }
 0x7af   : > { %3749 = vst [vmem:[#allocation1 + $0x2] ss:$9 sm:$0xff] %v3229_v38  ;;  %v2204_v27 = vmul.f32 %v6823_v45, %v2136_v59  ;;  %v2909_v38 = vadd.f32 %v7567_v42, %v2391_v14  ;;  %v1779_v49 = vadd.f32 %v6747_v63, %v1778_v44  ;;  %v4091_v14 = vpop.permute.xlu2 %4090 }
 0x7b0   : > { %3750 = vst [vmem:[#allocation1 + $0x3] ss:$9 sm:$0xff] %v3230_v19  ;;  %1795 = vmatmul.f32.gmra.mxu2 %v1573_v54 }
 0x7b1   : > { %3751 = vst [vmem:[#allocation1 + $0x4] ss:$9 sm:$0xff] %v3231_v5  ;;  %v1860_v17 = vmax.f32 %v1779_v49, 0.0  ;;  %v652_v5 = vpop.f32.mrf.mxu0  ;;  %v3235_v19 = vrot.slane %v2909_v38, 1  ;;  %v3237_v59 = vrot.slane %v2909_v38, 3  ;;  %v3238_v21 = vrot.slane %v2909_v38, 4 }
 0x7b2   : > { %3752 = vst [vmem:[#allocation1 + $0x5] ss:$9 sm:$0xff] %v3232_v23  ;;  %v1510_v23 = vadd.f32 %v6645_v50, %v652_v5  ;;  %v3239_v54 = vrot.slane %v2909_v38, 5 }
 0x7b3   : > { %3753 = vst [vmem:[#allocation1 + $0x6] ss:$9 sm:$0xff] %v3233_v47  ;;  %2070 = vmatmul.f32.gmra.mxu3 %v1860_v17  ;;  %v7568_v47 = vld [vmem:[#allocation13_spill] sm:$0xff]  ;;  %v3240_v17 = vrot.slane %v2909_v38, 6 }
 0x7b4   : > { %3754 = vst [vmem:[#allocation1 + $0x7] ss:$9 sm:$0xff] %v3234_v37  ;;  %v1350_v11 = vsub.f32 %v6225_v28, %v7568_v47  ;;  %v3236_v37 = vrot.slane %v2909_v38, 2  ;;  %v1574_v42 = vmax.f32 %v1510_v23, 0.0  ;;  %v4291_v28 = vperm.slane %v4088_v4, %v6552_v60 }
 0x7b6   : > { %v1781_v48 = vpop.f32.mrf.mxu2  ;;  %v1414_v49 = vmul.f32 0.03125, %v1350_v11 }
 0x7b7   : > { %v1782_v44 = vadd.f32 %v6747_v63, %v1781_v48 }
 0x7b8   : > { %1798 = vmatmul.f32.gmra.mxu2 %v1574_v42  ;;  %v2392_v47 = vadd.f32 %v2299_v58, %v1414_v49 }
 0x7b9   : > { %v1861_v23 = vmax.f32 %v1782_v44, 0.0 }
 0x7ba   : > { %2306 = vadd.xlane.f32.xlu1 %v2204_v27 }
 0x7bb   : > { %v3755_v6 = vld [vmem:[#allocation1] sm:$0xff]  ;;  %2073 = vmatmul.f32.gmra.mxu3 %v1861_v23 }
 0x7bc   : > { %3756 = vst [vmem:[#allocation1] ss:$9 sm:$0xff] %v2909_v38  ;;  %4132 = vperm.xlu0 %4599, %v3755_v6   ;;  %v3241_v6 = vrot.slane %v2909_v38, 7 }
 0x7bd   : > { %3757 = vst [vmem:[#allocation1 + $0x1] ss:$9 sm:$0xff] %v3235_v19  ;;  %v4293_v19 = vperm.slane %v4091_v14, %v6615_v20 }
 0x7be   : > { %3758 = vst [vmem:[#allocation1 + $0x2] ss:$9 sm:$0xff] %v3236_v37  ;;  %v1784_v38 = vpop.f32.mrf.mxu2 }
 0x7bf   : > { %3759 = vst [vmem:[#allocation1 + $0x3] ss:$9 sm:$0xff] %v3237_v59  ;;  %v4085_v27 = vpop.permute.xlu1 %4084  ;;  %v655_v59 = vpop.f32.mrf.mxu0  ;;  %v1785_v14 = vadd.f32 %v6747_v63, %v1784_v38 }
 0x7c0   : > { %3760 = vst [vmem:[#allocation1 + $0x4] ss:$9 sm:$0xff] %v3238_v21  ;;  %v4290_v5 = vperm.slane %v4085_v27, %v6549_v15  ;;  %v1511_v42 = vadd.f32 %v6645_v50, %v655_v59  ;;  %v2910_v21 = vadd.f32 %v6187_v46, %v2392_v47  ;;  %v7569_v59 = vld [vmem:[#allocation44_spill] sm:$0xff] }
 0x7c1   : > { %3761 = vst [vmem:[#allocation1 + $0x5] ss:$9 sm:$0xff] %v3239_v54  ;;  %v1862_v48 = vmax.f32 %v1785_v14, 0.0 }
 0x7c2   : > { %3762 = vst [vmem:[#allocation1 + $0x6] ss:$9 sm:$0xff] %v3240_v17  ;;  %v4292_v37 = vsel %vm4232_vm1, %v4291_v28, %v4290_v5  ;;  %v1575_v4 = vmax.f32 %v1511_v42, 0.0  ;;  %v3242_v58 = vrot.slane %v2910_v21, 1  ;;  %v3243_v27 = vrot.slane %v2910_v21, 2  ;;  %v2053_v17 = vpop.f32.mrf.mxu3  ;;  %v2303_v5 = vpop.xlane.xlu2 %2302 }
 0x7c3   : > { %3763 = vst [vmem:[#allocation1 + $0x7] ss:$9 sm:$0xff] %v3241_v6  ;;  %v6851_v11 = vsel %vm4236_vm2, %v4293_v19, %v4292_v37  ;;  %2076 = vmatmul.f32.gmra.mxu3 %v1862_v48  ;;  %v3244_v44 = vrot.slane %v2910_v21, 3  ;;  %v3245_v50 = vrot.slane %v2910_v21, 4  ;;  %v3246_v49 = vrot.slane %v2910_v21, 5 }
 0x7c4   : > { %1801 = vmatmul.f32.gmra.mxu2 %v1575_v4  ;;  %v3247_v28 = vrot.slane %v2910_v21, 6  ;;  %v3248_v46 = vrot.slane %v2910_v21, 7  ;;  %v2054_v6 = vadd.f32 %v6761_v2, %v2053_v17  ;;  %v1351_v42 = vsub.f32 %v6221_v34, %v7569_v59  ;;  %v7571_v34 = vld [vmem:[#allocation47_spill] sm:$0xff] }
 0x7c5   : > { %v1352_v17 = vsub.f32 %v6252_v24, %v7571_v34 }
 0x7c6   : > { %v2147_v23 = vmax.f32 %v2054_v6, 0.0  ;;  %v1415_v38 = vmul.f32 0.03125, %v1351_v42 }
 0x7c8   : > { %v2215_v37 = vmul.f32 %v6823_v45, %v2147_v23 }
 0x7ca   : > { %v3764_v54 = vld [vmem:[#allocation1] sm:$0xff]  ;;  %v6857_v19 = vpop.f32.mrf.mxu3  ;;  %v6859_v47 = vpop.permute.xlu2 %4099 }
 0x7cb   : > { %3765 = vst [vmem:[#allocation1] ss:$9 sm:$0xff] %v2910_v21  ;;  %4135 = vperm.xlu2 %4598, %v3764_v54   ;;  %v7570_v54 = vld [vmem:[#allocation101_spill] sm:$0xff] }
 0x7cc   : > { %3766 = vst [vmem:[#allocation1 + $0x1] ss:$9 sm:$0xff] %v3242_v58 }
 0x7cd   : > { %3767 = vst [vmem:[#allocation1 + $0x2] ss:$9 sm:$0xff] %v3243_v27 }
 0x7ce   : > { %3768 = vst [vmem:[#allocation1 + $0x3] ss:$9 sm:$0xff] %v3244_v44  ;;  %v6868_v44 = vpop.permute.xlu0 %4096 }
 0x7cf   : > { %3769 = vst [vmem:[#allocation1 + $0x4] ss:$9 sm:$0xff] %v3245_v50 }
 0x7d0   : > { %3770 = vst [vmem:[#allocation1 + $0x5] ss:$9 sm:$0xff] %v3246_v49 }
 0x7d1   : > { %3771 = vst [vmem:[#allocation1 + $0x6] ss:$9 sm:$0xff] %v3247_v28 }
 0x7d2   : > { %3772 = vst [vmem:[#allocation1 + $0x7] ss:$9 sm:$0xff] %v3248_v46  ;;  %v6865_v14 = vpop.xlane.xlu2 %2308 }
 0x7d3   : > { %4102 = vperm.xlu1 %4597, %v6654_v0  }
 0x7d4   : > { %v2059_v4 = vpop.f32.mrf.mxu3 }
 0x7d5   : > { %v2060_v21 = vadd.f32 %v6761_v2, %v2059_v4 }
 0x7d7   : > { %v2149_v58 = vmax.f32 %v2060_v21, 0.0  ;;  %v1416_v21 = vmul.f32 0.03125, %v1352_v17 }
 0x7d9   : > { %v6870_v50 = vld [vmem:[#allocation1] sm:$0xff]  ;;  %v2217_v6 = vmul.f32 %v6823_v45, %v2149_v58  ;;  %v2305_v58 = vpop.xlane.xlu0 %2304 }
 0x7e1   : > { %v6884_v17 = vpop.permute.xlu0 %4105 }
 0x7e6   : > { %2328 = vadd.xlane.f32.xlu0 %v2215_v37  ;;  %v2030_v37 = vadd.f32 %v6761_v2, %v6699_v32 }
 0x7e9   : > { %v1787_v24 = vpop.f32.mrf.mxu2 }
 0x7ea   : > { %v2301_v0 = vpop.xlane.xlu1 %2300 }
 0x7eb   : > { %v2393_v48 = vadd.f32 %v2301_v0, %v1415_v38  ;;  %v6877_v38 = vpop.permute.xlu2 %4108  ;;  %v2139_v0 = vmax.f32 %v2030_v37, 0.0 }
 0x7ed   : > { %v2911_v27 = vadd.f32 %v7570_v54, %v2393_v48  ;;  %v2394_v48 = vadd.f32 %v2303_v5, %v1416_v21  ;;  %v1788_v54 = vadd.f32 %v6747_v63, %v1787_v24 }
 0x7ef   : > { %v3249_v49 = vrot.slane %v2911_v27, 1  ;;  %v3250_v28 = vrot.slane %v2911_v27, 2  ;;  %v3251_v46 = vrot.slane %v2911_v27, 3  ;;  %3774 = vst [vmem:[#allocation1] ss:$9 sm:$0xff] %v2911_v27  ;;  %v3252_v23 = vrot.slane %v2911_v27, 4 }
 0x7f0   : > { %v3253_v59 = vrot.slane %v2911_v27, 5  ;;  %v3254_v42 = vrot.slane %v2911_v27, 6  ;;  %v3255_v4 = vrot.slane %v2911_v27, 7  ;;  %v1863_v32 = vmax.f32 %v1788_v54, 0.0 }
 0x7f1   : > { %3775 = vst [vmem:[#allocation1 + $0x1] ss:$9 sm:$0xff] %v3249_v49  ;;  %v2207_v49 = vmul.f32 %v6823_v45, %v2139_v0  ;;  %v2912_v27 = vadd.f32 %v6194_v56, %v2394_v48 }
 0x7f2   : > { %3776 = vst [vmem:[#allocation1 + $0x2] ss:$9 sm:$0xff] %v3250_v28  ;;  %2079 = vmatmul.f32.gmra.mxu3 %v1863_v32 }
 0x7f3   : > { %3777 = vst [vmem:[#allocation1 + $0x3] ss:$9 sm:$0xff] %v3251_v46  ;;  %v6882_v28 = vpop.xlane.xlu2 %2314  ;;  %v1790_v46 = vpop.f32.mrf.mxu2  ;;  %v3256_v34 = vrot.slane %v2912_v27, 1  ;;  %v3260_v21 = vrot.slane %v2912_v27, 5  ;;  %v3261_v48 = vrot.slane %v2912_v27, 6  ;;  %v3262_v32 = vrot.slane %v2912_v27, 7 }
 0x7f4   : > { %3778 = vst [vmem:[#allocation1 + $0x4] ss:$9 sm:$0xff] %v3252_v23  ;;  %2332 = vadd.xlane.f32.xlu2 %v2217_v6  ;;  %v1791_v5 = vadd.f32 %v6747_v63, %v1790_v46  ;;  %v7572_v23 = vld [vmem:[#allocation15_spill] sm:$0xff] }
 0x7f5   : > { %3779 = vst [vmem:[#allocation1 + $0x5] ss:$9 sm:$0xff] %v3253_v59  ;;  %v1353_v37 = vsub.f32 %v6293_v43, %v7572_v23  ;;  %v3257_v59 = vrot.slane %v2912_v27, 2  ;;  %v4297_v43 = vperm.slane %v6868_v44, %v6623_v33 }
 0x7f6   : > { %3780 = vst [vmem:[#allocation1 + $0x6] ss:$9 sm:$0xff] %v3254_v42  ;;  %v3258_v42 = vrot.slane %v2912_v27, 3  ;;  %v1864_v56 = vmax.f32 %v1791_v5, 0.0  ;;  %v6896_v5 = vpop.xlane.xlu0 %2310 }
 0x7f7   : > { %3781 = vst [vmem:[#allocation1 + $0x7] ss:$9 sm:$0xff] %v3255_v4  ;;  %v3259_v4 = vrot.slane %v2912_v27, 4  ;;  %v1417_v24 = vmul.f32 0.03125, %v1353_v37 }
 0x7f9   : > { %v2395_v46 = vadd.f32 %v2305_v58, %v1417_v24 }
 0x7fa   : > { %2082 = vmatmul.f32.gmra.mxu3 %v1864_v56 }
 0x7fb   : > { %v6898_v23 = vpop.permute.xlu2 %4117 }
 0x7fd   : > { %2312 = vadd.xlane.f32.xlu1 %v2207_v49  ;;  %v4299_v49 = vperm.slane %v6859_v47, %v6673_v62  ;;  %v7573_v47 = vld [vmem:[#allocation117_spill] sm:$0xff] }
 0x7fe   : > { %v3782_v6 = vld [vmem:[#allocation1] sm:$0xff]  ;;  %v2913_v58 = vadd.f32 %v7573_v47, %v2395_v46 }
 0x7ff   : > { %3783 = vst [vmem:[#allocation1] ss:$9 sm:$0xff] %v2912_v27  ;;  %4141 = vperm.xlu0 %4599, %v3782_v6   ;;  %v1793_v6 = vpop.f32.mrf.mxu2 }
 0x800   : > { %3784 = vst [vmem:[#allocation1 + $0x1] ss:$9 sm:$0xff] %v3256_v34  ;;  %v1794_v44 = vadd.f32 %v6747_v63, %v1793_v6  ;;  %v3266_v24 = vrot.slane %v2913_v58, 4 }
 0x801   : > { %3785 = vst [vmem:[#allocation1 + $0x2] ss:$9 sm:$0xff] %v3257_v59 }
 0x802   : > { %3786 = vst [vmem:[#allocation1 + $0x3] ss:$9 sm:$0xff] %v3258_v42  ;;  %v4094_v0 = vpop.permute.xlu1 %4093  ;;  %v1865_v59 = vmax.f32 %v1794_v44, 0.0  ;;  %v3263_v42 = vrot.slane %v2913_v58, 1 }
 0x803   : > { %3787 = vst [vmem:[#allocation1 + $0x4] ss:$9 sm:$0xff] %v3259_v4  ;;  %v4295_v54 = vperm.slane %v4094_v0, %v6619_v31  ;;  %v6906_v4 = vpop.permute.xlu0 %4114  ;;  %v3265_v0 = vrot.slane %v2913_v58, 3 }
 0x804   : > { %3788 = vst [vmem:[#allocation1 + $0x5] ss:$9 sm:$0xff] %v3260_v21  ;;  %2085 = vmatmul.f32.gmra.mxu3 %v1865_v59  ;;  %v6908_v21 = vpop.xlane.xlu2 %2320 }
 0x805   : > { %3789 = vst [vmem:[#allocation1 + $0x6] ss:$9 sm:$0xff] %v3261_v48  ;;  %v4296_v34 = vsel %vm4240_vm3, %v4295_v54, %v6851_v11  ;;  %v3264_v11 = vrot.slane %v2913_v58, 2  ;;  %v3267_v48 = vrot.slane %v2913_v58, 5  ;;  %v3268_v54 = vrot.slane %v2913_v58, 6 }
 0x806   : > { %3790 = vst [vmem:[#allocation1 + $0x7] ss:$9 sm:$0xff] %v3262_v32  ;;  %v4298_v37 = vsel %vm4244_vm4, %v4297_v43, %v4296_v34  ;;  %v3269_v43 = vrot.slane %v2913_v58, 7  ;;  %v2062_v32 = vpop.f32.mrf.mxu3 }
 0x807   : > { %v6903_v27 = vsel %vm4248_vm5, %v4299_v49, %v4298_v37  ;;  %v2063_v34 = vadd.f32 %v6761_v2, %v2062_v32 }
 0x809   : > { %v2150_v59 = vmax.f32 %v2063_v34, 0.0 }
 0x80b   : > { %v6910_v49 = vpop.xlane.xlu0 %2316  ;;  %v2218_v47 = vmul.f32 %v6823_v45, %v2150_v59  ;;  %v7575_v59 = vld [vmem:[#allocation107_spill] sm:$0xff] }
 0x80c   : > { %v6913_v46 = vpop.permute.xlu2 %4126 }
 0x80d   : > { %v3791_v56 = vld [vmem:[#allocation1] sm:$0xff] }
 0x80e   : > { %3792 = vst [vmem:[#allocation1] ss:$9 sm:$0xff] %v2913_v58  ;;  %4144 = vperm.xlu2 %4598, %v3791_v56   ;;  %v6918_v37 = vpop.f32.mrf.mxu3 }
 0x80f   : > { %3793 = vst [vmem:[#allocation1 + $0x1] ss:$9 sm:$0xff] %v3263_v42  ;;  %v7574_v42 = vld [vmem:[#allocation46_spill] sm:$0xff] }
 0x810   : > { %3794 = vst [vmem:[#allocation1 + $0x2] ss:$9 sm:$0xff] %v3264_v11  ;;  %v1354_v56 = vsub.f32 %v6305_v1, %v7574_v42 }
 0x811   : > { %3795 = vst [vmem:[#allocation1 + $0x3] ss:$9 sm:$0xff] %v3265_v0 }
 0x812   : > { %3796 = vst [vmem:[#allocation1 + $0x4] ss:$9 sm:$0xff] %v3266_v24  ;;  %v1418_v24 = vmul.f32 0.03125, %v1354_v56  ;;  %v7576_v56 = vld [vmem:[#allocation50_spill] sm:$0xff] }
 0x813   : > { %3797 = vst [vmem:[#allocation1 + $0x5] ss:$9 sm:$0xff] %v3267_v48  ;;  %v6916_v6 = vpop.permute.xlu0 %4123 }
 0x814   : > { %3798 = vst [vmem:[#allocation1 + $0x6] ss:$9 sm:$0xff] %v3268_v54 }
 0x815   : > { %3799 = vst [vmem:[#allocation1 + $0x7] ss:$9 sm:$0xff] %v3269_v43 }
 0x816   : > { %4111 = vperm.xlu1 %4597, %v6703_v53   ;;  %v2068_v11 = vpop.f32.mrf.mxu3 }
 0x817   : > { %v2069_v0 = vadd.f32 %v6761_v2, %v2068_v11  ;;  %v1355_v11 = vsub.f32 %v6318_v18, %v7576_v56 }
 0x819   : > { %v2152_v62 = vmax.f32 %v2069_v0, 0.0  ;;  %v2039_v0 = vadd.f32 %v6761_v2, %v6753_v55 }
 0x81b   : > { %v6923_v58 = vpop.xlane.xlu0 %2322 }
 0x81c   : > { %v6934_v1 = vld [vmem:[#allocation1] sm:$0xff] }
 0x81f   : > { %v6920_v44 = vpop.xlane.xlu2 %2326 }
 0x827   : > { %v4136_v53 = vpop.permute.xlu2 %4135 }
 0x828   : > { %v4322_v48 = vperm.slane %v4136_v53, %v6552_v60  ;;  %v2220_v53 = vmul.f32 %v6823_v45, %v2152_v62 }
 0x829   : > { %2334 = vadd.xlane.f32.xlu0 %v2218_v47 }
 0x82d   : > { %v2307_v54 = vpop.xlane.xlu1 %2306 }
 0x82e   : > { %v4133_v43 = vpop.permute.xlu0 %4132  ;;  %v2396_v32 = vadd.f32 %v2307_v54, %v1418_v24 }
 0x82f   : > { %v4321_v34 = vperm.slane %v4133_v43, %v6549_v15 }
 0x830   : > { %v2914_v33 = vadd.f32 %v7575_v59, %v2396_v32  ;;  %v1419_v32 = vmul.f32 0.03125, %v1355_v11 }
 0x831   : > { %v6932_v31 = vsel %vm4232_vm1, %v4322_v48, %v4321_v34  ;;  %v2142_v34 = vmax.f32 %v2039_v0, 0.0 }
 0x832   : > { %v3270_v47 = vrot.slane %v2914_v33, 1  ;;  %v3271_v42 = vrot.slane %v2914_v33, 2  ;;  %v3272_v20 = vrot.slane %v2914_v33, 3  ;;  %3801 = vst [vmem:[#allocation1] ss:$9 sm:$0xff] %v2914_v33  ;;  %v3273_v24 = vrot.slane %v2914_v33, 4 }
 0x833   : > { %v3274_v54 = vrot.slane %v2914_v33, 5  ;;  %v3275_v43 = vrot.slane %v2914_v33, 6  ;;  %v3276_v48 = vrot.slane %v2914_v33, 7  ;;  %v2397_v59 = vadd.f32 %v6865_v14, %v1419_v32  ;;  %v1796_v55 = vpop.f32.mrf.mxu2 }
 0x834   : > { %3802 = vst [vmem:[#allocation1 + $0x1] ss:$9 sm:$0xff] %v3270_v47  ;;  %v2210_v18 = vmul.f32 %v6823_v45, %v2142_v34  ;;  %v1797_v47 = vadd.f32 %v6747_v63, %v1796_v55 }
 0x835   : > { %3803 = vst [vmem:[#allocation1 + $0x2] ss:$9 sm:$0xff] %v3271_v42  ;;  %v2915_v62 = vadd.f32 %v6201_v3, %v2397_v59  ;;  %v4305_v59 = vperm.slane %v6877_v38, %v6726_v29 }
 0x836   : > { %3804 = vst [vmem:[#allocation1 + $0x3] ss:$9 sm:$0xff] %v3272_v20  ;;  %v7577_v20 = vld [vmem:[#allocation21_spill] sm:$0xff] }
 0x837   : > { %3805 = vst [vmem:[#allocation1 + $0x4] ss:$9 sm:$0xff] %v3273_v24  ;;  %2338 = vadd.xlane.f32.xlu2 %v2220_v53  ;;  %v3277_v42 = vrot.slane %v2915_v62, 1  ;;  %v1356_v56 = vsub.f32 %v6345_v8, %v7577_v20  ;;  %v3278_v11 = vrot.slane %v2915_v62, 2  ;;  %v1866_v53 = vmax.f32 %v1797_v47, 0.0 }
 0x838   : > { %3806 = vst [vmem:[#allocation1 + $0x5] ss:$9 sm:$0xff] %v3274_v54  ;;  %v3279_v14 = vrot.slane %v2915_v62, 3  ;;  %v3280_v24 = vrot.slane %v2915_v62, 4  ;;  %v3281_v0 = vrot.slane %v2915_v62, 5  ;;  %v4303_v8 = vperm.slane %v6884_v17, %v6721_v35 }
 0x839   : > { %3807 = vst [vmem:[#allocation1 + $0x6] ss:$9 sm:$0xff] %v3275_v43  ;;  %2088 = vmatmul.f32.gmra.mxu3 %v1866_v53  ;;  %v1420_v54 = vmul.f32 0.03125, %v1356_v56  ;;  %v3282_v43 = vrot.slane %v2915_v62, 6  ;;  %v3283_v32 = vrot.slane %v2915_v62, 7 }
 0x83a   : > { %3808 = vst [vmem:[#allocation1 + $0x7] ss:$9 sm:$0xff] %v3276_v48 }
 0x83b   : > { %v1799_v34 = vpop.f32.mrf.mxu2 }
 0x83c   : > { %v1800_v47 = vadd.f32 %v6747_v63, %v1799_v34  ;;  %v7579_v34 = vld [vmem:[#allocation48_spill] sm:$0xff] }
 0x840   : > { %2318 = vadd.xlane.f32.xlu1 %v2210_v18  ;;  %v2398_v18 = vadd.f32 %v6896_v5, %v1420_v54 }
 0x841   : > { %v3809_v33 = vld [vmem:[#allocation1] sm:$0xff] }
 0x842   : > { %3810 = vst [vmem:[#allocation1] ss:$9 sm:$0xff] %v2915_v62  ;;  %4150 = vperm.xlu0 %4599, %v3809_v33   ;;  %v1867_v33 = vmax.f32 %v1800_v47, 0.0  ;;  %v7578_v62 = vld [vmem:[#allocation111_spill] sm:$0xff] }
 0x843   : > { %3811 = vst [vmem:[#allocation1 + $0x1] ss:$9 sm:$0xff] %v3277_v42  ;;  %v2916_v20 = vadd.f32 %v7578_v62, %v2398_v18 }
 0x844   : > { %3812 = vst [vmem:[#allocation1 + $0x2] ss:$9 sm:$0xff] %v3278_v11  ;;  %2091 = vmatmul.f32.gmra.mxu3 %v1867_v33 }
 0x845   : > { %3813 = vst [vmem:[#allocation1 + $0x3] ss:$9 sm:$0xff] %v3279_v14  ;;  %v4103_v3 = vpop.permute.xlu1 %4102  ;;  %v3284_v38 = vrot.slane %v2916_v20, 1  ;;  %v3285_v53 = vrot.slane %v2916_v20, 2  ;;  %v3290_v54 = vrot.slane %v2916_v20, 7 }
 0x846   : > { %3814 = vst [vmem:[#allocation1 + $0x4] ss:$9 sm:$0xff] %v3280_v24  ;;  %v4301_v48 = vperm.slane %v4103_v3, %v6676_v13  ;;  %v3287_v24 = vrot.slane %v2916_v20, 4  ;;  %v3289_v3 = vrot.slane %v2916_v20, 6 }
 0x847   : > { %3815 = vst [vmem:[#allocation1 + $0x5] ss:$9 sm:$0xff] %v3281_v0  ;;  %v1802_v56 = vpop.f32.mrf.mxu2  ;;  %v3288_v0 = vrot.slane %v2916_v20, 5 }
 0x848   : > { %3816 = vst [vmem:[#allocation1 + $0x6] ss:$9 sm:$0xff] %v3282_v43  ;;  %v4302_v55 = vsel %vm4252_vm6, %v4301_v48, %v6903_v27  ;;  %v1803_v5 = vadd.f32 %v6747_v63, %v1802_v56  ;;  %v3286_v27 = vrot.slane %v2916_v20, 3  ;;  %v2071_v43 = vpop.f32.mrf.mxu3 }
 0x849   : > { %3817 = vst [vmem:[#allocation1 + $0x7] ss:$9 sm:$0xff] %v3283_v32  ;;  %v4304_v42 = vsel %vm4256_vm7, %v4303_v8, %v4302_v55  ;;  %v2072_v63 = vadd.f32 %v6761_v2, %v2071_v43 }
 0x84a   : > { %v6958_v17 = vsel %vm4260_vm8, %v4305_v59, %v4304_v42  ;;  %v1868_v14 = vmax.f32 %v1803_v5, 0.0  ;;  %v1357_v59 = vsub.f32 %v6343_v51, %v7579_v34  ;;  %v7580_v5 = vld [vmem:[#allocation52_spill] sm:$0xff] }
 0x84b   : > { %v2153_v8 = vmax.f32 %v2072_v63, 0.0  ;;  %v7581_v63 = vld [vmem:[#allocation124_spill] sm:$0xff] }
 0x84c   : > { %2094 = vmatmul.f32.gmra.mxu3 %v1868_v14  ;;  %v1421_v47 = vmul.f32 0.03125, %v1357_v59  ;;  %v2048_v14 = vadd.f32 %v6761_v2, %v6817_v57 }
 0x84d   : > { %v2221_v32 = vmul.f32 %v6823_v45, %v2153_v8 }
 0x850   : > { %v3818_v11 = vld [vmem:[#allocation1] sm:$0xff]  ;;  %v6964_v48 = vpop.f32.mrf.mxu3 }
 0x851   : > { %3819 = vst [vmem:[#allocation1] ss:$9 sm:$0xff] %v2916_v20  ;;  %4153 = vperm.xlu2 %4598, %v3818_v11  }
 0x852   : > { %3820 = vst [vmem:[#allocation1 + $0x1] ss:$9 sm:$0xff] %v3284_v38 }
 0x853   : > { %3821 = vst [vmem:[#allocation1 + $0x2] ss:$9 sm:$0xff] %v3285_v53  ;;  %v1358_v53 = vsub.f32 %v6365_v22, %v7580_v5 }
 0x854   : > { %3822 = vst [vmem:[#allocation1 + $0x3] ss:$9 sm:$0xff] %v3286_v27 }
 0x855   : > { %3823 = vst [vmem:[#allocation1 + $0x4] ss:$9 sm:$0xff] %v3287_v24 }
 0x856   : > { %3824 = vst [vmem:[#allocation1 + $0x5] ss:$9 sm:$0xff] %v3288_v0 }
 0x857   : > { %3825 = vst [vmem:[#allocation1 + $0x6] ss:$9 sm:$0xff] %v3289_v3  ;;  %v1422_v3 = vmul.f32 0.03125, %v1358_v53 }
 0x858   : > { %3826 = vst [vmem:[#allocation1 + $0x7] ss:$9 sm:$0xff] %v3290_v54  ;;  %v2077_v18 = vpop.f32.mrf.mxu3  ;;  %v2145_v54 = vmax.f32 %v2048_v14, 0.0 }
 0x859   : > { %4120 = vperm.xlu1 %4597, %v6765_v9   ;;  %v2078_v55 = vadd.f32 %v6761_v2, %v2077_v18  ;;  %v2400_v43 = vadd.f32 %v6882_v28, %v1422_v3 }
 0x85a   : > { %v2213_v22 = vmul.f32 %v6823_v45, %v2145_v54  ;;  %v7000_v54 = vld [vmem:[%s7249_s7] ss:$0 sm:$0xff] }
 0x85b   : > { %v2155_v62 = vmax.f32 %v2078_v55, 0.0  ;;  %v2918_v8 = vadd.f32 %v7581_v63, %v2400_v43 }
 0x85d   : > { %v2223_v51 = vmul.f32 %v6823_v45, %v2155_v62  ;;  %v3298_v2 = vrot.slane %v2918_v8, 1  ;;  %v3299_v59 = vrot.slane %v2918_v8, 2  ;;  %v3300_v18 = vrot.slane %v2918_v8, 3 }
 0x85e   : > { %v3301_v55 = vrot.slane %v2918_v8, 4  ;;  %v3302_v28 = vrot.slane %v2918_v8, 5 }
 0x85f   : > { %v6971_v20 = vld [vmem:[#allocation1] sm:$0xff] }
 0x86c   : > { %2340 = vadd.xlane.f32.xlu0 %v2221_v32  ;;  %v7582_v32 = vld [vmem:[#allocation24_spill] sm:$0xff] }
 0x86d   : > { %v1359_v34 = vsub.f32 %v6410_v40, %v7582_v32  ;;  %v4311_v40 = vperm.slane %v6898_v23, %v6782_v25 }
 0x870   : > { %v2313_v42 = vpop.xlane.xlu1 %2312 }
 0x871   : > { %v2399_v33 = vadd.f32 %v2313_v42, %v1421_v47  ;;  %v1423_v42 = vmul.f32 0.03125, %v1359_v34 }
 0x873   : > { %v2917_v9 = vadd.f32 %v6206_v30, %v2399_v33  ;;  %v3303_v33 = vrot.slane %v2918_v8, 6 }
 0x875   : > { %v3291_v56 = vrot.slane %v2917_v9, 1  ;;  %v3292_v38 = vrot.slane %v2917_v9, 2  ;;  %v3293_v11 = vrot.slane %v2917_v9, 3  ;;  %3828 = vst [vmem:[#allocation1] ss:$9 sm:$0xff] %v2917_v9  ;;  %v3294_v27 = vrot.slane %v2917_v9, 4  ;;  %v2080_v3 = vpop.f32.mrf.mxu3 }
 0x876   : > { %v3295_v24 = vrot.slane %v2917_v9, 5  ;;  %v3296_v0 = vrot.slane %v2917_v9, 6  ;;  %v3297_v30 = vrot.slane %v2917_v9, 7  ;;  %v4309_v9 = vperm.slane %v6906_v4, %v6778_v26 }
 0x877   : > { %3829 = vst [vmem:[#allocation1 + $0x1] ss:$9 sm:$0xff] %v3291_v56  ;;  %v3304_v56 = vrot.slane %v2918_v8, 7  ;;  %v2081_v43 = vadd.f32 %v7000_v54, %v2080_v3 }
 0x878   : > { %3830 = vst [vmem:[#allocation1 + $0x2] ss:$9 sm:$0xff] %v3292_v38  ;;  %v2401_v38 = vadd.f32 %v6910_v49, %v1423_v42 }
 0x879   : > { %3831 = vst [vmem:[#allocation1 + $0x3] ss:$9 sm:$0xff] %v3293_v11  ;;  %v2156_v63 = vmax.f32 %v2081_v43, 0.0 }
 0x87a   : > { %2344 = vadd.xlane.f32.xlu2 %v2223_v51  ;;  %3832 = vst [vmem:[#allocation1 + $0x4] ss:$9 sm:$0xff] %v3294_v27  ;;  %v7583_v51 = vld [vmem:[#allocation118_spill] sm:$0xff] }
 0x87b   : > { %3833 = vst [vmem:[#allocation1 + $0x5] ss:$9 sm:$0xff] %v3295_v24  ;;  %v2919_v27 = vadd.f32 %v7583_v51, %v2401_v38  ;;  %v2057_v38 = vadd.f32 %v7000_v54, %v6857_v19 }
 0x87c   : > { %3834 = vst [vmem:[#allocation1 + $0x6] ss:$9 sm:$0xff] %v3296_v0 }
 0x87d   : > { %3835 = vst [vmem:[#allocation1 + $0x7] ss:$9 sm:$0xff] %v3297_v30  ;;  %v3305_v4 = vrot.slane %v2919_v27, 1  ;;  %v3306_v24 = vrot.slane %v2919_v27, 2  ;;  %v3307_v23 = vrot.slane %v2919_v27, 3  ;;  %v3308_v49 = vrot.slane %v2919_v27, 4 }
 0x87e   : > { %v3309_v0 = vrot.slane %v2919_v27, 5  ;;  %v3311_v30 = vrot.slane %v2919_v27, 7 }
 0x883   : > { %2324 = vadd.xlane.f32.xlu1 %v2213_v22  ;;  %v7003_v22 = vpop.f32.mrf.mxu3 }
 0x884   : > { %v3836_v57 = vld [vmem:[#allocation1] sm:$0xff] }
 0x885   : > { %3837 = vst [vmem:[#allocation1] ss:$9 sm:$0xff] %v2918_v8  ;;  %4159 = vperm.xlu0 %4599, %v3836_v57   ;;  %v2224_v8 = vmul.f32 %v6823_v45, %v2156_v63 }
 0x886   : > { %3838 = vst [vmem:[#allocation1 + $0x1] ss:$9 sm:$0xff] %v3298_v2  ;;  %v7584_v2 = vld [vmem:[#allocation51_spill] sm:$0xff] }
 0x887   : > { %3839 = vst [vmem:[#allocation1 + $0x2] ss:$9 sm:$0xff] %v3299_v59  ;;  %v1360_v57 = vsub.f32 %v6420_v12, %v7584_v2 }
 0x888   : > { %3840 = vst [vmem:[#allocation1 + $0x3] ss:$9 sm:$0xff] %v3300_v18  ;;  %v4112_v47 = vpop.permute.xlu1 %4111 }
 0x889   : > { %3841 = vst [vmem:[#allocation1 + $0x4] ss:$9 sm:$0xff] %v3301_v55  ;;  %v4307_v62 = vperm.slane %v4112_v47, %v6730_v41 }
 0x88a   : > { %3842 = vst [vmem:[#allocation1 + $0x5] ss:$9 sm:$0xff] %v3302_v28 }
 0x88b   : > { %3843 = vst [vmem:[#allocation1 + $0x6] ss:$9 sm:$0xff] %v3303_v33  ;;  %v4308_v11 = vsel %vm4264_vm9, %v4307_v62, %v6958_v17  ;;  %v3310_v17 = vrot.slane %v2919_v27, 6  ;;  %v2086_v32 = vpop.f32.mrf.mxu3 }
 0x88c   : > { %3844 = vst [vmem:[#allocation1 + $0x7] ss:$9 sm:$0xff] %v3304_v56  ;;  %v4310_v5 = vsel %vm4268_vm10, %v4309_v9, %v4308_v11  ;;  %v2087_v34 = vadd.f32 %v7000_v54, %v2086_v32  ;;  %v7585_v9 = vld [vmem:[#allocation55_spill] sm:$0xff] }
 0x88d   : > { %v6993_v53 = vsel %vm4272_vm11, %v4311_v40, %v4310_v5  ;;  %v1361_v56 = vsub.f32 %v6429_v52, %v7585_v9 }
 0x88e   : > { %v2158_v55 = vmax.f32 %v2087_v34, 0.0 }
 0x88f   : > { %v1425_v51 = vmul.f32 0.03125, %v1361_v56 }
 0x890   : > { %v2226_v12 = vmul.f32 %v6823_v45, %v2158_v55  ;;  %v7588_v55 = vld [vmem:[#allocation131_spill] sm:$0xff] }
 0x893   : > { %v3845_v14 = vld [vmem:[#allocation1] sm:$0xff] }
 0x894   : > { %3846 = vst [vmem:[#allocation1] ss:$9 sm:$0xff] %v2919_v27  ;;  %4162 = vperm.xlu2 %4598, %v3845_v14   ;;  %v2148_v27 = vmax.f32 %v2057_v38, 0.0  ;;  %v7586_v14 = vld [vmem:[#allocation122_spill] sm:$0xff] }
 0x895   : > { %3847 = vst [vmem:[#allocation1 + $0x1] ss:$9 sm:$0xff] %v3305_v4  ;;  %v2403_v4 = vadd.f32 %v6908_v21, %v1425_v51 }
 0x896   : > { %3848 = vst [vmem:[#allocation1 + $0x2] ss:$9 sm:$0xff] %v3306_v24  ;;  %v2216_v52 = vmul.f32 %v6823_v45, %v2148_v27 }
 0x897   : > { %3849 = vst [vmem:[#allocation1 + $0x3] ss:$9 sm:$0xff] %v3307_v23  ;;  %v2921_v24 = vadd.f32 %v7586_v14, %v2403_v4 }
 0x898   : > { %3850 = vst [vmem:[#allocation1 + $0x4] ss:$9 sm:$0xff] %v3308_v49  ;;  %v7587_v49 = vld [vmem:[#allocation27_spill] sm:$0xff] }
 0x899   : > { %3851 = vst [vmem:[#allocation1 + $0x5] ss:$9 sm:$0xff] %v3309_v0  ;;  %v3319_v19 = vrot.slane %v2921_v24, 1  ;;  %v1362_v0 = vsub.f32 %v6455_v61, %v7587_v49  ;;  %v3322_v3 = vrot.slane %v2921_v24, 4  ;;  %v3323_v21 = vrot.slane %v2921_v24, 5 }
 0x89a   : > { %3852 = vst [vmem:[#allocation1 + $0x6] ss:$9 sm:$0xff] %v3310_v17  ;;  %v3320_v17 = vrot.slane %v2921_v24, 2  ;;  %v3325_v32 = vrot.slane %v2921_v24, 7  ;;  %v4317_v61 = vperm.slane %v6913_v46, %v6800_v39 }
 0x89b   : > { %3853 = vst [vmem:[#allocation1 + $0x7] ss:$9 sm:$0xff] %v3311_v30  ;;  %v3321_v30 = vrot.slane %v2921_v24, 3  ;;  %v1426_v63 = vmul.f32 0.03125, %v1362_v0 }
 0x89c   : > { %4129 = vperm.xlu1 %4597, %v6831_v16   ;;  %v1424_v16 = vmul.f32 0.03125, %v1360_v57  ;;  %v4315_v57 = vperm.slane %v6916_v6, %v6797_v10 }
 0x89d   : > { %v2404_v34 = vadd.f32 %v6923_v58, %v1426_v63 }
 0x8a2   : > { %v7010_v47 = vld [vmem:[#allocation1] sm:$0xff] }
 0x8af   : > { %2346 = vadd.xlane.f32.xlu0 %v2224_v8  ;;  %v3324_v8 = vrot.slane %v2921_v24, 6 }
 0x8b3   : > { %v2319_v59 = vpop.xlane.xlu1 %2318 }
 0x8b4   : > { %v2402_v18 = vadd.f32 %v2319_v59, %v1424_v16 }
 0x8b6   : > { %v2920_v28 = vadd.f32 %v6214_v36, %v2402_v18 }
 0x8b8   : > { %v3312_v42 = vrot.slane %v2920_v28, 1  ;;  %v3313_v33 = vrot.slane %v2920_v28, 2  ;;  %v3314_v62 = vrot.slane %v2920_v28, 3  ;;  %3855 = vst [vmem:[#allocation1] ss:$9 sm:$0xff] %v2920_v28  ;;  %v3315_v40 = vrot.slane %v2920_v28, 4 }
 0x8b9   : > { %v3316_v11 = vrot.slane %v2920_v28, 5  ;;  %v3317_v5 = vrot.slane %v2920_v28, 6  ;;  %v3318_v36 = vrot.slane %v2920_v28, 7  ;;  %v2922_v28 = vadd.f32 %v7588_v55, %v2404_v34 }
 0x8ba   : > { %3856 = vst [vmem:[#allocation1 + $0x1] ss:$9 sm:$0xff] %v3312_v42 }
 0x8bb   : > { %3857 = vst [vmem:[#allocation1 + $0x2] ss:$9 sm:$0xff] %v3313_v33  ;;  %v3326_v6 = vrot.slane %v2922_v28, 1  ;;  %v3327_v33 = vrot.slane %v2922_v28, 2  ;;  %v3328_v46 = vrot.slane %v2922_v28, 3  ;;  %v3329_v58 = vrot.slane %v2922_v28, 4 }
 0x8bc   : > { %3858 = vst [vmem:[#allocation1 + $0x3] ss:$9 sm:$0xff] %v3314_v62  ;;  %v3330_v62 = vrot.slane %v2922_v28, 5  ;;  %v3332_v9 = vrot.slane %v2922_v28, 7  ;;  %v2089_v56 = vpop.f32.mrf.mxu3 }
 0x8bd   : > { %2350 = vadd.xlane.f32.xlu2 %v2226_v12  ;;  %3859 = vst [vmem:[#allocation1 + $0x4] ss:$9 sm:$0xff] %v3315_v40  ;;  %v2090_v12 = vadd.f32 %v7000_v54, %v2089_v56  ;;  %v2329_v56 = vpop.xlane.xlu0 %2328 }
 0x8be   : > { %3860 = vst [vmem:[#allocation1 + $0x5] ss:$9 sm:$0xff] %v3316_v11 }
 0x8bf   : > { %3861 = vst [vmem:[#allocation1 + $0x6] ss:$9 sm:$0xff] %v3317_v5  ;;  %v2159_v38 = vmax.f32 %v2090_v12, 0.0  ;;  %v7589_v5 = vld [vmem:[#allocation54_spill] sm:$0xff] }
 0x8c0   : > { %3862 = vst [vmem:[#allocation1 + $0x7] ss:$9 sm:$0xff] %v3318_v36  ;;  %v7590_v36 = vld [vmem:[#allocation11_spill] sm:$0xff] }
 0x8c1   : > { %v2227_v11 = vmul.f32 %v6823_v45, %v2159_v38  ;;  %v1363_v51 = vsub.f32 %v7590_v36, %v7589_v5  ;;  %v7592_v45 = vld [vmem:[#allocation59_spill] sm:$0xff]  ;;  %v7597_v5 = vld [vmem:[#allocation69_spill] sm:$0xff] }
 0x8c6   : > { %2330 = vadd.xlane.f32.xlu1 %v2216_v52  ;;  %v1427_v52 = vmul.f32 0.03125, %v1363_v51 }
 0x8c7   : > { %v3863_v23 = vld [vmem:[#allocation1] sm:$0xff]  ;;  %v7037_v40 = vpop.f32.mrf.mxu3 }
 0x8c8   : > { %3864 = vst [vmem:[#allocation1] ss:$9 sm:$0xff] %v2921_v24  ;;  %4168 = vperm.xlu0 %4599, %v3863_v23   ;;  %v7591_v23 = vld [vmem:[#allocation135_spill] sm:$0xff] }
 0x8c9   : > { %3865 = vst [vmem:[#allocation1 + $0x1] ss:$9 sm:$0xff] %v3319_v19 }
 0x8ca   : > { %3866 = vst [vmem:[#allocation1 + $0x2] ss:$9 sm:$0xff] %v3320_v17 }
 0x8cb   : > { %3867 = vst [vmem:[#allocation1 + $0x3] ss:$9 sm:$0xff] %v3321_v30  ;;  %v4121_v43 = vpop.permute.xlu1 %4120 }
 0x8cc   : > { %3868 = vst [vmem:[#allocation1 + $0x4] ss:$9 sm:$0xff] %v3322_v3  ;;  %v4313_v2 = vperm.slane %v4121_v43, %v6785_v7  ;;  %v7593_v3 = vld [vmem:[#allocation12_spill] sm:$0xff]  ;;  %v7051_v43 = vld [vmem:[%s7250_s8] ss:$0 sm:$0xff] }
 0x8cd   : > { %3869 = vst [vmem:[#allocation1 + $0x5] ss:$9 sm:$0xff] %v3323_v21  ;;  %v1364_v21 = vsub.f32 %v7593_v3, %v7592_v45 }
 0x8ce   : > { %3870 = vst [vmem:[#allocation1 + $0x6] ss:$9 sm:$0xff] %v3324_v8  ;;  %v4314_v16 = vsel %vm4276_vm12, %v4313_v2, %v6993_v53  ;;  %v3331_v53 = vrot.slane %v2922_v28, 6  ;;  %v2066_v2 = vadd.f32 %v7000_v54, %v6918_v37 }
 0x8cf   : > { %3871 = vst [vmem:[#allocation1 + $0x7] ss:$9 sm:$0xff] %v3325_v32  ;;  %v4316_v59 = vsel %vm4280_vm13, %v4315_v57, %v4314_v16  ;;  %v2095_v27 = vpop.f32.mrf.mxu3  ;;  %v1428_v34 = vmul.f32 0.03125, %v1364_v21 }
 0x8d0   : > { %v7032_v18 = vsel %vm4284_vm14, %v4317_v61, %v4316_v59  ;;  %v2096_v4 = vadd.f32 %v7000_v54, %v2095_v27  ;;  %v2151_v16 = vmax.f32 %v2066_v2, 0.0 }
 0x8d1   : > { %v2406_v59 = vadd.f32 %v6920_v44, %v1428_v34  ;;  %v7602_v34 = vld [vmem:[#allocation134_spill] sm:$0xff] }
 0x8d2   : > { %v2161_v19 = vmax.f32 %v2096_v4, 0.0  ;;  %v2219_v55 = vmul.f32 %v7051_v43, %v2151_v16 }
 0x8d4   : > { %v2229_v63 = vmul.f32 %v7051_v43, %v2161_v19  ;;  %v7599_v19 = vld [vmem:[#allocation133_spill] sm:$0xff] }
 0x8d6   : > { %v3872_v42 = vld [vmem:[#allocation1] sm:$0xff] }
 0x8d7   : > { %3873 = vst [vmem:[#allocation1] ss:$9 sm:$0xff] %v2922_v28  ;;  %4171 = vperm.xlu2 %4598, %v3872_v42   ;;  %v7594_v28 = vld [vmem:[#allocation132_spill] sm:$0xff] }
 0x8d8   : > { %3874 = vst [vmem:[#allocation1 + $0x1] ss:$9 sm:$0xff] %v3326_v6  ;;  %v2924_v6 = vadd.f32 %v7594_v28, %v2406_v59 }
 0x8d9   : > { %3875 = vst [vmem:[#allocation1 + $0x2] ss:$9 sm:$0xff] %v3327_v33  ;;  %v7595_v33 = vld [vmem:[#allocation30_spill] sm:$0xff] }
 0x8da   : > { %3876 = vst [vmem:[#allocation1 + $0x3] ss:$9 sm:$0xff] %v3328_v46  ;;  %v3340_v37 = vrot.slane %v2924_v6, 1  ;;  %v7596_v46 = vld [vmem:[#allocation19_spill] sm:$0xff]  ;;  %v3344_v44 = vrot.slane %v2924_v6, 5  ;;  %v3346_v51 = vrot.slane %v2924_v6, 7 }
 0x8db   : > { %3877 = vst [vmem:[#allocation1 + $0x4] ss:$9 sm:$0xff] %v3329_v58  ;;  %v1365_v58 = vsub.f32 %v7596_v46, %v7595_v33 }
 0x8dc   : > { %3878 = vst [vmem:[#allocation1 + $0x5] ss:$9 sm:$0xff] %v3330_v62  ;;  %v3341_v62 = vrot.slane %v2924_v6, 2 }
 0x8dd   : > { %3879 = vst [vmem:[#allocation1 + $0x6] ss:$9 sm:$0xff] %v3331_v53  ;;  %v3342_v53 = vrot.slane %v2924_v6, 3  ;;  %v1429_v38 = vmul.f32 0.03125, %v1365_v58 }
 0x8de   : > { %3880 = vst [vmem:[#allocation1 + $0x7] ss:$9 sm:$0xff] %v3332_v9  ;;  %v3343_v9 = vrot.slane %v2924_v6, 4 }
 0x8df   : > { %4138 = vperm.xlu1 %4597, %v6870_v50   ;;  %v2407_v27 = vadd.f32 %v2329_v56, %v1429_v38 }
 0x8e5   : > { %v7044_v49 = vld [vmem:[#allocation1] sm:$0xff] }
 0x8f2   : > { %2352 = vadd.xlane.f32.xlu0 %v2227_v11  ;;  %v3345_v11 = vrot.slane %v2924_v6, 6 }
 0x8f6   : > { %v2325_v14 = vpop.xlane.xlu1 %2324 }
 0x8f7   : > { %v2405_v24 = vadd.f32 %v2325_v14, %v1427_v52  ;;  %v7598_v14 = vld [vmem:[#allocation9_spill] sm:$0xff] }
 0x8f9   : > { %v2923_v50 = vadd.f32 %v7591_v23, %v2405_v24  ;;  %v2925_v23 = vadd.f32 %v7599_v19, %v2407_v27 }
 0x8fb   : > { %v3333_v0 = vrot.slane %v2923_v50, 1  ;;  %v3334_v17 = vrot.slane %v2923_v50, 2  ;;  %v3335_v30 = vrot.slane %v2923_v50, 3  ;;  %3882 = vst [vmem:[#allocation1] ss:$9 sm:$0xff] %v2923_v50  ;;  %v3336_v8 = vrot.slane %v2923_v50, 4 }
 0x8fc   : > { %v3337_v57 = vrot.slane %v2923_v50, 5  ;;  %v3338_v32 = vrot.slane %v2923_v50, 6  ;;  %v3339_v61 = vrot.slane %v2923_v50, 7  ;;  %v3347_v50 = vrot.slane %v2925_v23, 1 }
 0x8fd   : > { %3883 = vst [vmem:[#allocation1 + $0x1] ss:$9 sm:$0xff] %v3333_v0  ;;  %v3350_v45 = vrot.slane %v2925_v23, 4  ;;  %v3351_v3 = vrot.slane %v2925_v23, 5  ;;  %v3353_v21 = vrot.slane %v2925_v23, 7 }
 0x8fe   : > { %3884 = vst [vmem:[#allocation1 + $0x2] ss:$9 sm:$0xff] %v3334_v17  ;;  %v3348_v17 = vrot.slane %v2925_v23, 2 }
 0x8ff   : > { %3885 = vst [vmem:[#allocation1 + $0x3] ss:$9 sm:$0xff] %v3335_v30  ;;  %v3349_v30 = vrot.slane %v2925_v23, 3 }
 0x900   : > { %2356 = vadd.xlane.f32.xlu2 %v2229_v63  ;;  %3886 = vst [vmem:[#allocation1 + $0x4] ss:$9 sm:$0xff] %v3336_v8  ;;  %v7600_v63 = vld [vmem:[#allocation57_spill] sm:$0xff]  ;;  %v7601_v8 = vld [vmem:[#allocation58_spill] sm:$0xff] }
 0x901   : > { %3887 = vst [vmem:[#allocation1 + $0x5] ss:$9 sm:$0xff] %v3337_v57  ;;  %v1366_v2 = vsub.f32 %v7601_v8, %v7600_v63 }
 0x902   : > { %3888 = vst [vmem:[#allocation1 + $0x6] ss:$9 sm:$0xff] %v3338_v32 }
 0x903   : > { %3889 = vst [vmem:[#allocation1 + $0x7] ss:$9 sm:$0xff] %v3339_v61  ;;  %v1430_v57 = vmul.f32 0.03125, %v1366_v2  ;;  %v7609_v2 = vld [vmem:[#allocation67_spill] sm:$0xff] }
 0x909   : > { %2336 = vadd.xlane.f32.xlu1 %v2219_v55 }
 0x90a   : > { %v3890_v42 = vld [vmem:[#allocation1] sm:$0xff] }
 0x90b   : > { %3891 = vst [vmem:[#allocation1] ss:$9 sm:$0xff] %v2924_v6  ;;  %4177 = vperm.xlu0 %4599, %v3890_v42   ;;  %v7604_v42 = vld [vmem:[#allocation85_spill] sm:$0xff] }
 0x90c   : > { %3892 = vst [vmem:[#allocation1 + $0x1] ss:$9 sm:$0xff] %v3340_v37  ;;  %v7603_v37 = vld [vmem:[#allocation62_spill] sm:$0xff] }
 0x90d   : > { %3893 = vst [vmem:[#allocation1 + $0x2] ss:$9 sm:$0xff] %v3341_v62  ;;  %v1367_v33 = vsub.f32 %v7604_v42, %v7603_v37 }
 0x90e   : > { %3894 = vst [vmem:[#allocation1 + $0x3] ss:$9 sm:$0xff] %v3342_v53  ;;  %v4130_v12 = vpop.permute.xlu1 %4129  ;;  %v2333_v53 = vpop.xlane.xlu2 %2332 }
 0x90f   : > { %3895 = vst [vmem:[#allocation1 + $0x4] ss:$9 sm:$0xff] %v3343_v9  ;;  %v4319_v36 = vperm.slane %v4130_v12, %v7597_v5 }
 0x910   : > { %3896 = vst [vmem:[#allocation1 + $0x5] ss:$9 sm:$0xff] %v3344_v44  ;;  %v1431_v44 = vmul.f32 0.03125, %v1367_v33 }
 0x911   : > { %3897 = vst [vmem:[#allocation1 + $0x6] ss:$9 sm:$0xff] %v3345_v11  ;;  %v4320_v4 = vsel %vm4288_vm15, %v4319_v36, %v7032_v18  ;;  %v3352_v18 = vrot.slane %v2925_v23, 6  ;;  %v7605_v11 = vld [vmem:[#allocation136_spill] sm:$0xff] }
 0x912   : > { %3898 = vst [vmem:[#allocation1 + $0x7] ss:$9 sm:$0xff] %v3346_v51  ;;  %v4383_v52 = vrot.slane %v4320_v4, 7  ;;  %v2409_v12 = vadd.f32 %v2333_v53, %v1431_v44  ;;  %v4142_v51 = vpop.permute.xlu0 %4141  ;;  %v7606_v4 = vld [vmem:[#allocation33_spill] sm:$0xff] }
 0x913   : > { %v7613_v44 = vld [vmem:[#allocation5_spill] sm:$0xff] }
 0x914   : > { %v7065_v24 = vsel %vm4386_vm0, %v7598_v14, %v4383_v52  ;;  %v2927_v36 = vadd.f32 %v7605_v11, %v2409_v12  ;;  %v7607_v52 = vld [vmem:[#allocation88_spill] sm:$0xff] }
 0x915   : > { %v1368_v14 = vsub.f32 %v7607_v52, %v7606_v4 }
 0x916   : > { %v3362_v19 = vrot.slane %v2927_v36, 2  ;;  %v3367_v8 = vrot.slane %v2927_v36, 7 }
 0x919   : > { %v3899_v0 = vld [vmem:[#allocation1] sm:$0xff] }
 0x91a   : > { %3900 = vst [vmem:[#allocation1] ss:$9 sm:$0xff] %v2925_v23  ;;  %4180 = vperm.xlu2 %4598, %v3899_v0   ;;  %v3363_v23 = vrot.slane %v2927_v36, 3  ;;  %v4145_v0 = vpop.permute.xlu2 %4144 }
 0x91b   : > { %3901 = vst [vmem:[#allocation1 + $0x1] ss:$9 sm:$0xff] %v3347_v50  ;;  %v3364_v50 = vrot.slane %v2927_v36, 4 }
 0x91c   : > { %3902 = vst [vmem:[#allocation1 + $0x2] ss:$9 sm:$0xff] %v3348_v17  ;;  %v3365_v17 = vrot.slane %v2927_v36, 5 }
 0x91d   : > { %3903 = vst [vmem:[#allocation1 + $0x3] ss:$9 sm:$0xff] %v3349_v30  ;;  %v2335_v30 = vpop.xlane.xlu0 %2334 }
 0x91e   : > { %3904 = vst [vmem:[#allocation1 + $0x4] ss:$9 sm:$0xff] %v3350_v45 }
 0x91f   : > { %3905 = vst [vmem:[#allocation1 + $0x5] ss:$9 sm:$0xff] %v3351_v3  ;;  %v1432_v3 = vmul.f32 0.03125, %v1368_v14  ;;  %v7615_v14 = vld [vmem:[#allocation65_spill] sm:$0xff] }
 0x920   : > { %3906 = vst [vmem:[#allocation1 + $0x6] ss:$9 sm:$0xff] %v3352_v18  ;;  %v3366_v18 = vrot.slane %v2927_v36, 6 }
 0x921   : > { %3907 = vst [vmem:[#allocation1 + $0x7] ss:$9 sm:$0xff] %v3353_v21  ;;  %v7608_v21 = vld [vmem:[#allocation94_spill] sm:$0xff] }
 0x922   : > { %4147 = vperm.xlu1 %4597, %v6934_v1   ;;  %v2075_v1 = vadd.f32 %v7000_v54, %v6964_v48  ;;  %v3361_v48 = vrot.slane %v2927_v36, 1 }
 0x924   : > { %v2154_v56 = vmax.f32 %v2075_v1, 0.0 }
 0x926   : > { %v2222_v38 = vmul.f32 %v7051_v43, %v2154_v56 }
 0x928   : > { %v7072_v59 = vld [vmem:[#allocation1] sm:$0xff] }
 0x939   : > { %v2331_v32 = vpop.xlane.xlu1 %2330 }
 0x93a   : > { %v2408_v61 = vadd.f32 %v2331_v32, %v1430_v57  ;;  %v4326_v57 = vperm.slane %v4142_v51, %v7609_v2  ;;  %v7610_v32 = vld [vmem:[#allocation98_spill] sm:$0xff] }
 0x93c   : > { %v2926_v16 = vadd.f32 %v7602_v34, %v2408_v61  ;;  %v4328_v61 = vperm.slane %v4145_v0, %v7610_v32  ;;  %v2410_v34 = vadd.f32 %v2335_v30, %v1432_v3  ;;  %v2339_v30 = vpop.xlane.xlu2 %2338 }
 0x93e   : > { %v3354_v55 = vrot.slane %v2926_v16, 1  ;;  %v3355_v28 = vrot.slane %v2926_v16, 2  ;;  %v3356_v6 = vrot.slane %v2926_v16, 3  ;;  %3909 = vst [vmem:[#allocation1] ss:$9 sm:$0xff] %v2926_v16  ;;  %v3357_v46 = vrot.slane %v2926_v16, 4 }
 0x93f   : > { %v3358_v58 = vrot.slane %v2926_v16, 5  ;;  %v3359_v62 = vrot.slane %v2926_v16, 6  ;;  %v3360_v9 = vrot.slane %v2926_v16, 7 }
 0x940   : > { %3910 = vst [vmem:[#allocation1 + $0x1] ss:$9 sm:$0xff] %v3354_v55 }
 0x941   : > { %3911 = vst [vmem:[#allocation1 + $0x2] ss:$9 sm:$0xff] %v3355_v28 }
 0x942   : > { %3912 = vst [vmem:[#allocation1 + $0x3] ss:$9 sm:$0xff] %v3356_v6  ;;  %v7611_v6 = vld [vmem:[#allocation16_spill] sm:$0xff] }
 0x943   : > { %3913 = vst [vmem:[#allocation1 + $0x4] ss:$9 sm:$0xff] %v3357_v46  ;;  %v2928_v37 = vadd.f32 %v7611_v6, %v2410_v34  ;;  %v4151_v34 = vpop.permute.xlu0 %4150  ;;  %v7619_v6 = vld [vmem:[#allocation10_spill] sm:$0xff] }
 0x944   : > { %3914 = vst [vmem:[#allocation1 + $0x5] ss:$9 sm:$0xff] %v3358_v58 }
 0x945   : > { %3915 = vst [vmem:[#allocation1 + $0x6] ss:$9 sm:$0xff] %v3359_v62  ;;  %v3368_v42 = vrot.slane %v2928_v37, 1  ;;  %v3369_v46 = vrot.slane %v2928_v37, 2  ;;  %v3370_v1 = vrot.slane %v2928_v37, 3  ;;  %v3371_v58 = vrot.slane %v2928_v37, 4 }
 0x946   : > { %3916 = vst [vmem:[#allocation1 + $0x7] ss:$9 sm:$0xff] %v3360_v9  ;;  %v3372_v62 = vrot.slane %v2928_v37, 5  ;;  %v3374_v53 = vrot.slane %v2928_v37, 7  ;;  %v7612_v9 = vld [vmem:[#allocation60_spill] sm:$0xff] }
 0x947   : > { %v1369_v56 = vsub.f32 %v7613_v44, %v7612_v9  ;;  %v7620_v44 = vld [vmem:[#allocation72_spill] sm:$0xff] }
 0x949   : > { %v1433_v12 = vmul.f32 0.03125, %v1369_v56 }
 0x94c   : > { %2342 = vadd.xlane.f32.xlu1 %v2222_v38 }
 0x94d   : > { %v3917_v27 = vld [vmem:[#allocation1] sm:$0xff] }
 0x94e   : > { %3918 = vst [vmem:[#allocation1] ss:$9 sm:$0xff] %v2927_v36  ;;  %4186 = vperm.xlu0 %4599, %v3917_v27   ;;  %v7614_v36 = vld [vmem:[#allocation49_spill] sm:$0xff] }
 0x94f   : > { %3919 = vst [vmem:[#allocation1 + $0x1] ss:$9 sm:$0xff] %v3361_v48 }
 0x950   : > { %3920 = vst [vmem:[#allocation1 + $0x2] ss:$9 sm:$0xff] %v3362_v19  ;;  %v7616_v19 = vld [vmem:[#allocation20_spill] sm:$0xff] }
 0x951   : > { %3921 = vst [vmem:[#allocation1 + $0x3] ss:$9 sm:$0xff] %v3363_v23  ;;  %v4139_v45 = vpop.permute.xlu1 %4138  ;;  %v1370_v23 = vsub.f32 %v7616_v19, %v7615_v14 }
 0x952   : > { %3922 = vst [vmem:[#allocation1 + $0x4] ss:$9 sm:$0xff] %v3364_v50  ;;  %v4324_v63 = vperm.slane %v4139_v45, %v7608_v21 }
 0x953   : > { %3923 = vst [vmem:[#allocation1 + $0x5] ss:$9 sm:$0xff] %v3365_v17  ;;  %v1434_v3 = vmul.f32 0.03125, %v1370_v23 }
 0x954   : > { %3924 = vst [vmem:[#allocation1 + $0x6] ss:$9 sm:$0xff] %v3366_v18  ;;  %v4325_v16 = vsel %vm4236_vm2, %v4324_v63, %v6932_v31  ;;  %v3373_v31 = vrot.slane %v2928_v37, 6 }
 0x955   : > { %3925 = vst [vmem:[#allocation1 + $0x7] ss:$9 sm:$0xff] %v3367_v8  ;;  %v4327_v55 = vsel %vm4240_vm3, %v4326_v57, %v4325_v16  ;;  %v2412_v63 = vadd.f32 %v2339_v30, %v1434_v3  ;;  %v7617_v57 = vld [vmem:[#allocation18_spill] sm:$0xff]  ;;  %v7623_v3 = vld [vmem:[#allocation93_spill] sm:$0xff] }
 0x956   : > { %v7089_v28 = vsel %vm4244_vm4, %v4328_v61, %v4327_v55  ;;  %v7618_v55 = vld [vmem:[#allocation36_spill] sm:$0xff] }
 0x957   : > { %v2930_v61 = vadd.f32 %v7617_v57, %v2412_v63 }
 0x959   : > { %v3387_v9 = vrot.slane %v2930_v61, 6 }
 0x95c   : > { %v3926_v33 = vld [vmem:[#allocation1] sm:$0xff] }
 0x95d   : > { %3927 = vst [vmem:[#allocation1] ss:$9 sm:$0xff] %v2928_v37  ;;  %4189 = vperm.xlu2 %4598, %v3926_v33   ;;  %v1371_v37 = vsub.f32 %v7619_v6, %v7618_v55  ;;  %v3384_v33 = vrot.slane %v2930_v61, 3 }
 0x95e   : > { %3928 = vst [vmem:[#allocation1 + $0x1] ss:$9 sm:$0xff] %v3368_v42  ;;  %v3383_v42 = vrot.slane %v2930_v61, 2 }
 0x95f   : > { %3929 = vst [vmem:[#allocation1 + $0x2] ss:$9 sm:$0xff] %v3369_v46  ;;  %v3385_v46 = vrot.slane %v2930_v61, 4 }
 0x960   : > { %3930 = vst [vmem:[#allocation1 + $0x3] ss:$9 sm:$0xff] %v3370_v1  ;;  %v4154_v1 = vpop.permute.xlu2 %4153 }
 0x961   : > { %3931 = vst [vmem:[#allocation1 + $0x4] ss:$9 sm:$0xff] %v3371_v58  ;;  %v3386_v58 = vrot.slane %v2930_v61, 5 }
 0x962   : > { %3932 = vst [vmem:[#allocation1 + $0x5] ss:$9 sm:$0xff] %v3372_v62  ;;  %v2341_v62 = vpop.xlane.xlu0 %2340 }
 0x963   : > { %3933 = vst [vmem:[#allocation1 + $0x6] ss:$9 sm:$0xff] %v3373_v31 }
 0x964   : > { %3934 = vst [vmem:[#allocation1 + $0x7] ss:$9 sm:$0xff] %v3374_v53  ;;  %v1435_v53 = vmul.f32 0.03125, %v1371_v37  ;;  %v7625_v37 = vld [vmem:[#allocation68_spill] sm:$0xff] }
 0x965   : > { %4156 = vperm.xlu1 %4597, %v6971_v20   ;;  %v2084_v20 = vadd.f32 %v7000_v54, %v7003_v22  ;;  %v3382_v22 = vrot.slane %v2930_v61, 1 }
 0x967   : > { %v2157_v18 = vmax.f32 %v2084_v20, 0.0 }
 0x969   : > { %v2225_v8 = vmul.f32 %v7051_v43, %v2157_v18 }
 0x96b   : > { %v7096_v48 = vld [vmem:[#allocation1] sm:$0xff] }
 0x97c   : > { %v2337_v38 = vpop.xlane.xlu1 %2336 }
 0x97d   : > { %v2411_v11 = vadd.f32 %v2337_v38, %v1433_v12  ;;  %v3388_v12 = vrot.slane %v2930_v61, 7  ;;  %v4332_v38 = vperm.slane %v4151_v34, %v6676_v13 }
 0x97f   : > { %v2929_v51 = vadd.f32 %v7614_v36, %v2411_v11  ;;  %v4334_v11 = vperm.slane %v4154_v1, %v6721_v35  ;;  %v2413_v36 = vadd.f32 %v2341_v62, %v1435_v53  ;;  %v2345_v62 = vpop.xlane.xlu2 %2344 }
 0x981   : > { %v3375_v27 = vrot.slane %v2929_v51, 1  ;;  %v3376_v4 = vrot.slane %v2929_v51, 2  ;;  %v3377_v52 = vrot.slane %v2929_v51, 3  ;;  %3936 = vst [vmem:[#allocation1] ss:$9 sm:$0xff] %v2929_v51  ;;  %v3378_v50 = vrot.slane %v2929_v51, 4 }
 0x982   : > { %v3379_v0 = vrot.slane %v2929_v51, 5  ;;  %v3380_v17 = vrot.slane %v2929_v51, 6  ;;  %v3381_v45 = vrot.slane %v2929_v51, 7 }
 0x983   : > { %3937 = vst [vmem:[#allocation1 + $0x1] ss:$9 sm:$0xff] %v3375_v27 }
 0x984   : > { %3938 = vst [vmem:[#allocation1 + $0x2] ss:$9 sm:$0xff] %v3376_v4 }
 0x985   : > { %3939 = vst [vmem:[#allocation1 + $0x3] ss:$9 sm:$0xff] %v3377_v52  ;;  %v7621_v52 = vld [vmem:[#allocation53_spill] sm:$0xff] }
 0x986   : > { %3940 = vst [vmem:[#allocation1 + $0x4] ss:$9 sm:$0xff] %v3378_v50  ;;  %v2931_v14 = vadd.f32 %v7621_v52, %v2413_v36  ;;  %v4160_v36 = vpop.permute.xlu0 %4159 }
 0x987   : > { %3941 = vst [vmem:[#allocation1 + $0x5] ss:$9 sm:$0xff] %v3379_v0 }
 0x988   : > { %3942 = vst [vmem:[#allocation1 + $0x6] ss:$9 sm:$0xff] %v3380_v17  ;;  %v3389_v19 = vrot.slane %v2931_v14, 1  ;;  %v3390_v50 = vrot.slane %v2931_v14, 2  ;;  %v3391_v20 = vrot.slane %v2931_v14, 3  ;;  %v3392_v0 = vrot.slane %v2931_v14, 4 }
 0x989   : > { %3943 = vst [vmem:[#allocation1 + $0x7] ss:$9 sm:$0xff] %v3381_v45  ;;  %v3393_v17 = vrot.slane %v2931_v14, 5  ;;  %v3395_v30 = vrot.slane %v2931_v14, 7  ;;  %v7622_v45 = vld [vmem:[#allocation63_spill] sm:$0xff] }
 0x98a   : > { %v1372_v18 = vsub.f32 %v7623_v3, %v7622_v45  ;;  %v4338_v3 = vperm.slane %v4160_v36, %v6730_v41 }
 0x98c   : > { %v1436_v63 = vmul.f32 0.03125, %v1372_v18 }
 0x98f   : > { %2348 = vadd.xlane.f32.xlu1 %v2225_v8 }
 0x990   : > { %v3944_v16 = vld [vmem:[#allocation1] sm:$0xff] }
 0x991   : > { %3945 = vst [vmem:[#allocation1] ss:$9 sm:$0xff] %v2930_v61  ;;  %4195 = vperm.xlu0 %4599, %v3944_v16   ;;  %v7624_v61 = vld [vmem:[#allocation77_spill] sm:$0xff] }
 0x992   : > { %3946 = vst [vmem:[#allocation1 + $0x1] ss:$9 sm:$0xff] %v3382_v22 }
 0x993   : > { %3947 = vst [vmem:[#allocation1 + $0x2] ss:$9 sm:$0xff] %v3383_v42  ;;  %v7626_v42 = vld [vmem:[#allocation25_spill] sm:$0xff] }
 0x994   : > { %3948 = vst [vmem:[#allocation1 + $0x3] ss:$9 sm:$0xff] %v3384_v33  ;;  %v4148_v31 = vpop.permute.xlu1 %4147  ;;  %v1373_v33 = vsub.f32 %v7626_v42, %v7625_v37 }
 0x995   : > { %3949 = vst [vmem:[#allocation1 + $0x4] ss:$9 sm:$0xff] %v3385_v46  ;;  %v4330_v56 = vperm.slane %v4148_v31, %v7620_v44 }
 0x996   : > { %3950 = vst [vmem:[#allocation1 + $0x5] ss:$9 sm:$0xff] %v3386_v58  ;;  %v1437_v53 = vmul.f32 0.03125, %v1373_v33 }
 0x997   : > { %3951 = vst [vmem:[#allocation1 + $0x6] ss:$9 sm:$0xff] %v3387_v9  ;;  %v4331_v51 = vsel %vm4248_vm5, %v4330_v56, %v7089_v28  ;;  %v3394_v28 = vrot.slane %v2931_v14, 6 }
 0x998   : > { %3952 = vst [vmem:[#allocation1 + $0x7] ss:$9 sm:$0xff] %v3388_v12  ;;  %v4333_v27 = vsel %vm4252_vm6, %v4332_v38, %v4331_v51  ;;  %v2415_v56 = vadd.f32 %v2345_v62, %v1437_v53  ;;  %v7627_v38 = vld [vmem:[#allocation56_spill] sm:$0xff]  ;;  %v7628_v51 = vld [vmem:[#allocation39_spill] sm:$0xff] }
 0x999   : > { %v7113_v4 = vsel %vm4256_vm7, %v4334_v11, %v4333_v27  ;;  %v7629_v27 = vld [vmem:[#allocation23_spill] sm:$0xff] }
 0x99a   : > { %v2933_v11 = vadd.f32 %v7627_v38, %v2415_v56  ;;  %v1374_v52 = vsub.f32 %v7629_v27, %v7628_v51  ;;  %v7633_v56 = vld [vmem:[#allocation79_spill] sm:$0xff] }
 0x99c   : > { %v3409_v45 = vrot.slane %v2933_v11, 7 }
 0x99f   : > { %v3953_v23 = vld [vmem:[#allocation1] sm:$0xff] }
 0x9a0   : > { %4198 = vperm.xlu2 %4598, %v3953_v23   ;;  %3954 = vst [vmem:[#allocation1] ss:$9 sm:$0xff] %v2931_v14  ;;  %v3404_v14 = vrot.slane %v2933_v11, 2  ;;  %v3406_v23 = vrot.slane %v2933_v11, 4 }
 0x9a1   : > { %3955 = vst [vmem:[#allocation1 + $0x1] ss:$9 sm:$0xff] %v3389_v19  ;;  %v3405_v19 = vrot.slane %v2933_v11, 3 }
 0x9a2   : > { %3956 = vst [vmem:[#allocation1 + $0x2] ss:$9 sm:$0xff] %v3390_v50  ;;  %v4163_v50 = vpop.permute.xlu2 %4162 }
 0x9a3   : > { %3957 = vst [vmem:[#allocation1 + $0x3] ss:$9 sm:$0xff] %v3391_v20  ;;  %v3407_v20 = vrot.slane %v2933_v11, 5  ;;  %v4340_v18 = vperm.slane %v4163_v50, %v6778_v26 }
 0x9a4   : > { %3958 = vst [vmem:[#allocation1 + $0x4] ss:$9 sm:$0xff] %v3392_v0  ;;  %v2347_v0 = vpop.xlane.xlu0 %2346 }
 0x9a5   : > { %3959 = vst [vmem:[#allocation1 + $0x5] ss:$9 sm:$0xff] %v3393_v17  ;;  %v1438_v17 = vmul.f32 0.03125, %v1374_v52 }
 0x9a6   : > { %3960 = vst [vmem:[#allocation1 + $0x6] ss:$9 sm:$0xff] %v3394_v28  ;;  %v3408_v28 = vrot.slane %v2933_v11, 6 }
 0x9a7   : > { %3961 = vst [vmem:[#allocation1 + $0x7] ss:$9 sm:$0xff] %v3395_v30 }
 0x9a8   : > { %4165 = vperm.xlu1 %4597, %v7010_v47   ;;  %v2093_v47 = vadd.f32 %v7000_v54, %v7037_v40  ;;  %v3403_v54 = vrot.slane %v2933_v11, 1 }
 0x9aa   : > { %v2160_v9 = vmax.f32 %v2093_v47, 0.0  ;;  %v2351_v52 = vpop.xlane.xlu2 %2350 }
 0x9ac   : > { %v2228_v12 = vmul.f32 %v7051_v43, %v2160_v9 }
 0x9ae   : > { %v7120_v22 = vld [vmem:[#allocation1] sm:$0xff] }
 0x9bf   : > { %v2343_v8 = vpop.xlane.xlu1 %2342 }
 0x9c0   : > { %v2414_v57 = vadd.f32 %v2343_v8, %v1436_v63  ;;  %v2416_v63 = vadd.f32 %v2347_v0, %v1438_v17  ;;  %v7637_v17 = vld [vmem:[#allocation42_spill] sm:$0xff] }
 0x9c2   : > { %v2932_v34 = vadd.f32 %v7624_v61, %v2414_v57 }
 0x9c4   : > { %v3396_v16 = vrot.slane %v2932_v34, 1  ;;  %v3397_v55 = vrot.slane %v2932_v34, 2  ;;  %v3398_v6 = vrot.slane %v2932_v34, 3  ;;  %3963 = vst [vmem:[#allocation1] ss:$9 sm:$0xff] %v2932_v34  ;;  %v3399_v46 = vrot.slane %v2932_v34, 4 }
 0x9c5   : > { %v3400_v1 = vrot.slane %v2932_v34, 5  ;;  %v3401_v58 = vrot.slane %v2932_v34, 6  ;;  %v3402_v31 = vrot.slane %v2932_v34, 7  ;;  %v7630_v34 = vld [vmem:[#allocation71_spill] sm:$0xff] }
 0x9c6   : > { %3964 = vst [vmem:[#allocation1 + $0x1] ss:$9 sm:$0xff] %v3396_v16  ;;  %v2934_v16 = vadd.f32 %v7630_v34, %v2416_v63  ;;  %v4172_v63 = vpop.permute.xlu2 %4171 }
 0x9c7   : > { %3965 = vst [vmem:[#allocation1 + $0x2] ss:$9 sm:$0xff] %v3397_v55 }
 0x9c8   : > { %3966 = vst [vmem:[#allocation1 + $0x3] ss:$9 sm:$0xff] %v3398_v6  ;;  %v3410_v55 = vrot.slane %v2934_v16, 1  ;;  %v3411_v37 = vrot.slane %v2934_v16, 2  ;;  %v3412_v42 = vrot.slane %v2934_v16, 3  ;;  %v3413_v33 = vrot.slane %v2934_v16, 4 }
 0x9c9   : > { %3967 = vst [vmem:[#allocation1 + $0x4] ss:$9 sm:$0xff] %v3399_v46  ;;  %v3414_v46 = vrot.slane %v2934_v16, 5  ;;  %v3416_v47 = vrot.slane %v2934_v16, 7 }
 0x9ca   : > { %3968 = vst [vmem:[#allocation1 + $0x5] ss:$9 sm:$0xff] %v3400_v1  ;;  %v7631_v1 = vld [vmem:[#allocation66_spill] sm:$0xff] }
 0x9cb   : > { %3969 = vst [vmem:[#allocation1 + $0x6] ss:$9 sm:$0xff] %v3401_v58  ;;  %v7632_v58 = vld [vmem:[#allocation84_spill] sm:$0xff] }
 0x9cc   : > { %3970 = vst [vmem:[#allocation1 + $0x7] ss:$9 sm:$0xff] %v3402_v31  ;;  %v1375_v62 = vsub.f32 %v7632_v58, %v7631_v1  ;;  %v7639_v58 = vld [vmem:[#allocation22_spill] sm:$0xff] }
 0x9ce   : > { %v1439_v31 = vmul.f32 0.03125, %v1375_v62 }
 0x9d2   : > { %2354 = vadd.xlane.f32.xlu1 %v2228_v12 }
 0x9d3   : > { %v3971_v40 = vld [vmem:[#allocation1] sm:$0xff] }
 0x9d4   : > { %4204 = vperm.xlu0 %4599, %v3971_v40   ;;  %3972 = vst [vmem:[#allocation1] ss:$9 sm:$0xff] %v2933_v11  ;;  %v7635_v40 = vld [vmem:[#allocation82_spill] sm:$0xff] }
 0x9d5   : > { %3973 = vst [vmem:[#allocation1 + $0x1] ss:$9 sm:$0xff] %v3403_v54 }
 0x9d6   : > { %3974 = vst [vmem:[#allocation1 + $0x2] ss:$9 sm:$0xff] %v3404_v14 }
 0x9d7   : > { %3975 = vst [vmem:[#allocation1 + $0x3] ss:$9 sm:$0xff] %v3405_v19  ;;  %v4157_v43 = vpop.permute.xlu1 %4156 }
 0x9d8   : > { %3976 = vst [vmem:[#allocation1 + $0x4] ss:$9 sm:$0xff] %v3406_v23  ;;  %v4336_v30 = vperm.slane %v4157_v43, %v6726_v29  ;;  %v7636_v23 = vld [vmem:[#allocation75_spill] sm:$0xff] }
 0x9d9   : > { %3977 = vst [vmem:[#allocation1 + $0x5] ss:$9 sm:$0xff] %v3407_v20  ;;  %v4169_v20 = vpop.permute.xlu0 %4168 }
 0x9da   : > { %3978 = vst [vmem:[#allocation1 + $0x6] ss:$9 sm:$0xff] %v3408_v28  ;;  %v4337_v8 = vsel %vm4260_vm8, %v4336_v30, %v7113_v4  ;;  %v3415_v4 = vrot.slane %v2934_v16, 6  ;;  %v7638_v28 = vld [vmem:[#allocation90_spill] sm:$0xff] }
 0x9db   : > { %3979 = vst [vmem:[#allocation1 + $0x7] ss:$9 sm:$0xff] %v3409_v45  ;;  %v4339_v57 = vsel %vm4264_vm9, %v4338_v3, %v4337_v8  ;;  %v1377_v30 = vsub.f32 %v7638_v28, %v7637_v17  ;;  %v2357_v28 = vpop.xlane.xlu2 %2356 }
 0x9dc   : > { %v7137_v61 = vsel %vm4268_vm10, %v4340_v18, %v4339_v57 }
 0x9e1   : > { %v2353_v57 = vpop.xlane.xlu0 %2352 }
 0x9e2   : > { %v3980_v6 = vld [vmem:[#allocation1] sm:$0xff] }
 0x9e3   : > { %4207 = vperm.xlu2 %4598, %v3980_v6   ;;  %3981 = vst [vmem:[#allocation1] ss:$9 sm:$0xff] %v2934_v16  ;;  %v1441_v16 = vmul.f32 0.03125, %v1377_v30 }
 0x9e4   : > { %3982 = vst [vmem:[#allocation1 + $0x1] ss:$9 sm:$0xff] %v3410_v55 }
 0x9e5   : > { %3983 = vst [vmem:[#allocation1 + $0x2] ss:$9 sm:$0xff] %v3411_v37 }
 0x9e6   : > { %3984 = vst [vmem:[#allocation1 + $0x3] ss:$9 sm:$0xff] %v3412_v42  ;;  %v4344_v42 = vperm.slane %v4169_v20, %v6785_v7 }
 0x9e7   : > { %3985 = vst [vmem:[#allocation1 + $0x4] ss:$9 sm:$0xff] %v3413_v33  ;;  %v4346_v33 = vperm.slane %v4172_v63, %v6797_v10 }
 0x9e8   : > { %3986 = vst [vmem:[#allocation1 + $0x5] ss:$9 sm:$0xff] %v3414_v46  ;;  %v2419_v46 = vadd.f32 %v2353_v57, %v1441_v16 }
 0x9e9   : > { %3987 = vst [vmem:[#allocation1 + $0x6] ss:$9 sm:$0xff] %v3415_v4 }
 0x9ea   : > { %3988 = vst [vmem:[#allocation1 + $0x7] ss:$9 sm:$0xff] %v3416_v47  ;;  %v2937_v62 = vadd.f32 %v7639_v58, %v2419_v46  ;;  %v4178_v58 = vpop.permute.xlu0 %4177 }
 0x9eb   : > { %4174 = vperm.xlu1 %4597, %v7044_v49   ;;  %v7634_v49 = vld [vmem:[#allocation70_spill] sm:$0xff] }
 0x9f1   : > { %v3989_v38 = vld [vmem:[#allocation1] sm:$0xff] }
 0x9f3   : > { %4183 = vperm.xlu1 %4597, %v7072_v59   ;;  %v1376_v59 = vsub.f32 %v7635_v40, %v7634_v49  ;;  %v7641_v49 = vld [vmem:[#allocation100_spill] sm:$0xff] }
 0x9fb   : > { %4192 = vperm.xlu1 %4597, %v7096_v48  }
 0xa02   : > { %v2349_v53 = vpop.xlane.xlu1 %2348 }
 0xa03   : > { %v2417_v9 = vadd.f32 %v2349_v53, %v1439_v31  ;;  %4201 = vperm.xlu1 %4597, %v7120_v22   ;;  %v1440_v22 = vmul.f32 0.03125, %v1376_v59  ;;  %v3431_v31 = vrot.slane %v2937_v62, 1 }
 0xa05   : > { %v2935_v12 = vadd.f32 %v7633_v56, %v2417_v9  ;;  %v2418_v19 = vadd.f32 %v2351_v52, %v1440_v22  ;;  %v3432_v9 = vrot.slane %v2937_v62, 2  ;;  %v3433_v56 = vrot.slane %v2937_v62, 3 }
 0xa07   : > { %v3417_v11 = vrot.slane %v2935_v12, 1  ;;  %v3418_v36 = vrot.slane %v2935_v12, 2  ;;  %v3419_v54 = vrot.slane %v2935_v12, 3  ;;  %3990 = vst [vmem:[#allocation1] ss:$9 sm:$0xff] %v2935_v12  ;;  %v3420_v51 = vrot.slane %v2935_v12, 4 }
 0xa08   : > { %v3421_v48 = vrot.slane %v2935_v12, 5  ;;  %v3422_v27 = vrot.slane %v2935_v12, 6  ;;  %v3423_v14 = vrot.slane %v2935_v12, 7  ;;  %v2936_v50 = vadd.f32 %v7636_v23, %v2418_v19  ;;  %v7643_v23 = vld [vmem:[#allocation73_spill] sm:$0xff] }
 0xa09   : > { %3991 = vst [vmem:[#allocation1 + $0x1] ss:$9 sm:$0xff] %v3417_v11  ;;  %v3434_v12 = vrot.slane %v2937_v62, 4  ;;  %v3437_v11 = vrot.slane %v2937_v62, 7 }
 0xa0a   : > { %3992 = vst [vmem:[#allocation1 + $0x2] ss:$9 sm:$0xff] %v3418_v36  ;;  %v3424_v0 = vrot.slane %v2936_v50, 1  ;;  %v3425_v45 = vrot.slane %v2936_v50, 2  ;;  %v3426_v3 = vrot.slane %v2936_v50, 3  ;;  %v3427_v18 = vrot.slane %v2936_v50, 4 }
 0xa0b   : > { %4210 = vperm.xlu1 %4597, %v3989_v38   ;;  %3993 = vst [vmem:[#allocation1 + $0x3] ss:$9 sm:$0xff] %v3419_v54  ;;  %v3428_v8 = vrot.slane %v2936_v50, 5  ;;  %v3429_v55 = vrot.slane %v2936_v50, 6  ;;  %v3430_v37 = vrot.slane %v2936_v50, 7  ;;  %v3435_v38 = vrot.slane %v2937_v62, 5 }
 0xa0c   : > { %3994 = vst [vmem:[#allocation1 + $0x4] ss:$9 sm:$0xff] %v3420_v51  ;;  %v7640_v54 = vld [vmem:[#allocation74_spill] sm:$0xff] }
 0xa0d   : > { %3995 = vst [vmem:[#allocation1 + $0x5] ss:$9 sm:$0xff] %v3421_v48  ;;  %v1378_v40 = vsub.f32 %v7641_v49, %v7640_v54 }
 0xa0e   : > { %3996 = vst [vmem:[#allocation1 + $0x6] ss:$9 sm:$0xff] %v3422_v27  ;;  %v7642_v27 = vld [vmem:[#allocation64_spill] sm:$0xff] }
 0xa0f   : > { %3997 = vst [vmem:[#allocation1 + $0x7] ss:$9 sm:$0xff] %v3423_v14  ;;  %v1442_v59 = vmul.f32 0.03125, %v1378_v40 }
 0xa16   : > { %v3998_v43 = vld [vmem:[#allocation1] sm:$0xff] }
 0xa17   : > { %4213 = vperm.xlu0 %4599, %v3998_v43   ;;  %3999 = vst [vmem:[#allocation1] ss:$9 sm:$0xff] %v2936_v50  ;;  %v7644_v50 = vld [vmem:[#allocation28_spill] sm:$0xff] }
 0xa18   : > { %4000 = vst [vmem:[#allocation1 + $0x1] ss:$9 sm:$0xff] %v3424_v0  ;;  %v1379_v20 = vsub.f32 %v7644_v50, %v7643_v23 }
 0xa19   : > { %4001 = vst [vmem:[#allocation1 + $0x2] ss:$9 sm:$0xff] %v3425_v45 }
 0xa1a   : > { %4002 = vst [vmem:[#allocation1 + $0x3] ss:$9 sm:$0xff] %v3426_v3  ;;  %v4166_v34 = vpop.permute.xlu1 %4165  ;;  %v1443_v45 = vmul.f32 0.03125, %v1379_v20 }
 0xa1b   : > { %4003 = vst [vmem:[#allocation1 + $0x4] ss:$9 sm:$0xff] %v3427_v18  ;;  %v4342_v6 = vperm.slane %v4166_v34, %v6782_v25  ;;  %v7645_v18 = vld [vmem:[#allocation61_spill] sm:$0xff] }
 0xa1c   : > { %4004 = vst [vmem:[#allocation1 + $0x5] ss:$9 sm:$0xff] %v3428_v8  ;;  %v2421_v3 = vadd.f32 %v2357_v28, %v1443_v45 }
 0xa1d   : > { %4005 = vst [vmem:[#allocation1 + $0x6] ss:$9 sm:$0xff] %v3429_v55  ;;  %v4343_v4 = vsel %vm4272_vm11, %v4342_v6, %v7137_v61  ;;  %v3436_v61 = vrot.slane %v2937_v62, 6 }
 0xa1e   : > { %4006 = vst [vmem:[#allocation1 + $0x7] ss:$9 sm:$0xff] %v3430_v37  ;;  %v4345_v47 = vsel %vm4276_vm12, %v4344_v42, %v4343_v4  ;;  %v2939_v63 = vadd.f32 %v7645_v18, %v2421_v3 }
 0xa1f   : > { %v7159_v1 = vsel %vm4280_vm13, %v4346_v33, %v4345_v47  ;;  %v4181_v47 = vpop.permute.xlu2 %4180 }
 0xa20   : > { %v3445_v8 = vrot.slane %v2939_v63, 1  ;;  %v3446_v34 = vrot.slane %v2939_v63, 2  ;;  %v3447_v16 = vrot.slane %v2939_v63, 3  ;;  %v3448_v55 = vrot.slane %v2939_v63, 4 }
 0xa21   : > { %v3449_v6 = vrot.slane %v2939_v63, 5  ;;  %v3450_v37 = vrot.slane %v2939_v63, 6  ;;  %v3451_v42 = vrot.slane %v2939_v63, 7 }
 0xa25   : > { %v4007_v53 = vld [vmem:[#allocation1] sm:$0xff] }
 0xa26   : > { %4216 = vperm.xlu2 %4598, %v4007_v53   ;;  %4008 = vst [vmem:[#allocation1] ss:$9 sm:$0xff] %v2937_v62 }
 0xa27   : > { %4009 = vst [vmem:[#allocation1 + $0x1] ss:$9 sm:$0xff] %v3431_v31  ;;  %v4190_v62 = vpop.permute.xlu2 %4189  ;;  %v4187_v31 = vpop.permute.xlu0 %4186 }
 0xa28   : > { %4010 = vst [vmem:[#allocation1 + $0x2] ss:$9 sm:$0xff] %v3432_v9  ;;  %v4357_v40 = vperm.slane %v4190_v62, %v7609_v2 }
 0xa29   : > { %4011 = vst [vmem:[#allocation1 + $0x3] ss:$9 sm:$0xff] %v3433_v56  ;;  %v4352_v56 = vperm.slane %v4181_v47, %v6549_v15 }
 0xa2a   : > { %4012 = vst [vmem:[#allocation1 + $0x4] ss:$9 sm:$0xff] %v3434_v12 }
 0xa2b   : > { %4013 = vst [vmem:[#allocation1 + $0x5] ss:$9 sm:$0xff] %v3435_v38 }
 0xa2c   : > { %4014 = vst [vmem:[#allocation1 + $0x6] ss:$9 sm:$0xff] %v3436_v61 }
 0xa2d   : > { %4015 = vst [vmem:[#allocation1 + $0x7] ss:$9 sm:$0xff] %v3437_v11  ;;  %v4355_v11 = vperm.slane %v4187_v31, %v7608_v21 }
 0xa2f   : > { %v4199_v12 = vpop.permute.xlu2 %4198  ;;  %v4196_v38 = vpop.permute.xlu0 %4195 }
 0xa30   : > { %v4361_v15 = vperm.slane %v4196_v38, %v7620_v44 }
 0xa34   : > { %v4016_v36 = vld [vmem:[#allocation1] sm:$0xff] }
 0xa35   : > { %4219 = vperm.xlu1 %4597, %v4016_v36  }
 0xa45   : > { %v2355_v51 = vpop.xlane.xlu1 %2354 }
 0xa46   : > { %v2420_v48 = vadd.f32 %v2355_v51, %v1442_v59  ;;  %v4208_v51 = vpop.permute.xlu2 %4207 }
 0xa47   : > { %v4369_v20 = vperm.slane %v4208_v51, %v6730_v41 }
 0xa48   : > { %v2938_v52 = vadd.f32 %v7642_v27, %v2420_v48  ;;  %v4205_v48 = vpop.permute.xlu0 %4204 }
 0xa4a   : > { %v3438_v14 = vrot.slane %v2938_v52, 1  ;;  %v3439_v22 = vrot.slane %v2938_v52, 2  ;;  %v3440_v19 = vrot.slane %v2938_v52, 3  ;;  %4017 = vst [vmem:[#allocation1] ss:$9 sm:$0xff] %v2938_v52  ;;  %v3441_v0 = vrot.slane %v2938_v52, 4 }
 0xa4b   : > { %v3442_v43 = vrot.slane %v2938_v52, 5  ;;  %v3443_v17 = vrot.slane %v2938_v52, 6  ;;  %v3444_v30 = vrot.slane %v2938_v52, 7  ;;  %v4363_v52 = vperm.slane %v4199_v12, %v6676_v13 }
 0xa4c   : > { %4018 = vst [vmem:[#allocation1 + $0x1] ss:$9 sm:$0xff] %v3438_v14 }
 0xa4d   : > { %4019 = vst [vmem:[#allocation1 + $0x2] ss:$9 sm:$0xff] %v3439_v22  ;;  %v4367_v22 = vperm.slane %v4205_v48, %v6726_v29 }
 0xa4e   : > { %4020 = vst [vmem:[#allocation1 + $0x3] ss:$9 sm:$0xff] %v3440_v19 }
 0xa4f   : > { %4021 = vst [vmem:[#allocation1 + $0x4] ss:$9 sm:$0xff] %v3441_v0 }
 0xa50   : > { %4022 = vst [vmem:[#allocation1 + $0x5] ss:$9 sm:$0xff] %v3442_v43 }
 0xa51   : > { %4023 = vst [vmem:[#allocation1 + $0x6] ss:$9 sm:$0xff] %v3443_v17 }
 0xa52   : > { %4024 = vst [vmem:[#allocation1 + $0x7] ss:$9 sm:$0xff] %v3444_v30  ;;  %v4350_v30 = vperm.slane %v4178_v58, %v7597_v5 }
 0xa59   : > { %v4025_v57 = vld [vmem:[#allocation1] sm:$0xff] }
 0xa5a   : > { %4222 = vperm.xlu0 %4599, %v4025_v57   ;;  %4026 = vst [vmem:[#allocation1] ss:$9 sm:$0xff] %v2939_v63 }
 0xa5b   : > { %4027 = vst [vmem:[#allocation1 + $0x1] ss:$9 sm:$0xff] %v3445_v8 }
 0xa5c   : > { %4028 = vst [vmem:[#allocation1 + $0x2] ss:$9 sm:$0xff] %v3446_v34  ;;  %v7646_v34 = vlaneseq }
 0xa5d   : > { %4029 = vst [vmem:[#allocation1 + $0x3] ss:$9 sm:$0xff] %v3447_v16  ;;  %v4175_v46 = vpop.permute.xlu1 %4174 }
 0xa5e   : > { %4030 = vst [vmem:[#allocation1 + $0x4] ss:$9 sm:$0xff] %v3448_v55  ;;  %v4348_v13 = vperm.slane %v4175_v46, %v6800_v39 }
 0xa5f   : > { %4031 = vst [vmem:[#allocation1 + $0x5] ss:$9 sm:$0xff] %v3449_v6 }
 0xa60   : > { %4032 = vst [vmem:[#allocation1 + $0x6] ss:$9 sm:$0xff] %v3450_v37  ;;  %v4349_v41 = vsel %vm4284_vm14, %v4348_v13, %v7159_v1 }
 0xa61   : > { %4033 = vst [vmem:[#allocation1 + $0x7] ss:$9 sm:$0xff] %v3451_v42 }
 0xa65   : > { %v4184_v4 = vpop.permute.xlu1 %4183 }
 0xa66   : > { %v4353_v9 = vperm.slane %v4184_v4, %v6552_v60 }
 0xa68   : > { %v4034_v33 = vld [vmem:[#allocation1] sm:$0xff]  ;;  %v4354_v61 = vsel %vm4232_vm1, %v4353_v9, %v4352_v56  ;;  %vm4388_vm1 = vcmask 1042434  }
 0xa69   : > { %4225 = vperm.xlu2 %4598, %v4034_v33   ;;  %v4356_v54 = vsel %vm4236_vm2, %v4355_v11, %v4354_v61  ;;  %vm4390_vm2 = vcmask 1041408  }
 0xa6a   : > { %v4358_v59 = vsel %vm4240_vm3, %v4357_v40, %v4356_v54  ;;  %vm4395_vm3 = vcmp.lt.s32.totalorder %v7646_v34, 512 }
 0xa6d   : > { %v4193_v53 = vpop.permute.xlu1 %4192 }
 0xa6e   : > { %v4359_v49 = vperm.slane %v4193_v53, %v7610_v32 }
 0xa70   : > { %v4360_v60 = vsel %vm4244_vm4, %v4359_v49, %v4358_v59 }
 0xa71   : > { %v4362_v27 = vsel %vm4248_vm5, %v4361_v15, %v4360_v60 }
 0xa72   : > { %v4364_v32 = vsel %vm4252_vm6, %v4363_v52, %v4362_v27 }
 0xa75   : > { %v4202_v36 = vpop.permute.xlu1 %4201 }
 0xa76   : > { %v4365_v21 = vperm.slane %v4202_v36, %v6721_v35 }
 0xa78   : > { %v4366_v2 = vsel %vm4256_vm7, %v4365_v21, %v4364_v32 }
 0xa79   : > { %v4368_v50 = vsel %vm4260_vm8, %v4367_v22, %v4366_v2 }
 0xa7a   : > { %v4370_v43 = vsel %vm4264_vm9, %v4369_v20, %v4368_v50 }
 0xa7d   : > { %v4211_v14 = vpop.permute.xlu1 %4210 }
 0xa7e   : > { %v4371_v44 = vperm.slane %v4211_v14, %v6778_v26 }
 0xa80   : > { %v4217_v19 = vpop.permute.xlu2 %4216  ;;  %v4372_v17 = vsel %vm4268_vm10, %v4371_v44, %v4370_v43 }
 0xa81   : > { %v4375_v26 = vperm.slane %v4217_v19, %v6785_v7 }
 0xa89   : > { %v4214_v23 = vpop.permute.xlu0 %4213 }
 0xa8a   : > { %v4373_v35 = vperm.slane %v4214_v23, %v6782_v25 }
 0xa8c   : > { %v4374_v29 = vsel %vm4272_vm11, %v4373_v35, %v4372_v17 }
 0xa8d   : > { %v4376_v3 = vsel %vm4276_vm12, %v4375_v26, %v4374_v29 }
 0xaa7   : > { %v4220_v0 = vpop.permute.xlu1 %4219 }
 0xaa8   : > { %v4377_v28 = vperm.slane %v4220_v0, %v6797_v10  ;;  %v4351_v10 = vsel %vm4288_vm15, %v4350_v30, %v4349_v41 }
 0xaaa   : > { %v4378_v63 = vsel %vm4280_vm13, %v4377_v28, %v4376_v3 }
 0xac3   : > { %v4226_v25 = vpop.permute.xlu2 %4225 }
 0xac4   : > { %v4381_v1 = vperm.slane %v4226_v25, %v7597_v5 }
 0xacc   : > { %v4223_v45 = vpop.permute.xlu0 %4222 }
 0xacd   : > { %v4379_v18 = vperm.slane %v4223_v45, %v6800_v39  ;;  %v4384_v39 = vrot.slane %v4351_v10, 6 }
 0xacf   : > { %v4380_v7 = vsel %vm4284_vm14, %v4379_v18, %v4378_v63 }
 0xad0   : > { %v4382_v8 = vsel %vm4288_vm15, %v4381_v1, %v4380_v7 }
 0xad1   : > { %v4385_v57 = vrot.slane %v4382_v8, 5 }
 0xad3   : > { %v4389_v16 = vsel %vm4388_vm1, %v4384_v39, %v4385_v57 }
 0xad4   : > { %v4391_v5 = vsel %vm4390_vm2, %v7065_v24, %v4389_v16 }
 0xad5   : > { %4397 = vst.msk [vmem:[%s340_s14] sm:$0xf] %vm4395_vm3, %v4391_v5 }
 0xad6   : > { %4680 = shalt.err (!%p4677_p4)
}
 0xad7   : > { %4494 = dma.vmem_to_hbm [thread:$0]  (%p4806_p5), %s4412_s23, 64, %s4414_s16, %s4399_s24  }
 0xad8 PF: > { %p4500_p7 = scmp.ge.s32.totalorder %s4715_s12, 2  ;;  %s4425_s25 = sand.u32 1, %s4703_s30  }
 0xad9   : > { %s4426_s29 = scalar_lea.sflag [#allocation3], %s4425_s25 }
 0xada   : > { %p4497_p8 = pnand %p4500_p7, %p4810_p6 }
 0xadc   : > { %p4498_p9 = pneg %p4497_p8 }
 0xade   : > { %4698 = dma.done.wait (%p4498_p9), %s4426_s29, 64  }
 0xadf   : > { %4700 = vsyncadd (%p4498_p9), %s4426_s29, 4294967232  ;;  %p19_p10 = scmp.ge.s32.totalorder %s4793_s15, 4   ;;  %s7647_s30 = smov %s4707_s10 }
 0xae0   : > { %s7648_s10 = smov %s4711_s11  ;;  %s7649_s11 = smov %s4804_s18 }
 0xae1   : > { %s7650_s12 = smov %s4793_s15  ;;  %21 = sbr.rel (!%p19_p10) target bundleno = 3 (0x3), region = 101 }
 0xae6   :  { %4432 = vsyncpa [#allocation3], 1 }
 0xae7   :  { %4434 = vsyncpa [#allocation3 + $0x1], 1 }

</bundles_post_ra>
